<compile_context>
chip_gen: v7x
topology: tpu7x:2x2x1
jax: 0.10.0
libtpu: 0.0.40
codegen_flags: <defaults>
</compile_context>

<pallas_src>
import math
import numpy as np

import jax
import jax.numpy as jnp
from jax.experimental import pallas as pl
from jax.experimental.pallas import tpu as pltpu


# ----------------------------- configuration -------------------------------
B = 2               # images
C = 16              # feature channels
HF = WF = 16        # feature-map spatial size
IMG_H = IMG_W = 32  # image size  -> spatial_scale = 0.5
P = 7               # RoIAlign output size
SR = 2              # sampling_ratio
N_PER_IMG = 8       # proposals per image
HID = 32            # TwoMLPHead representation size
NCLS = 5            # number of classes (incl. background)

SCORE_THRESH = 0.05
NMS_THRESH = 0.5
DET_PER_IMG = 4
MIN_SIZE = 0.01
BBOX_REG_WEIGHTS = (10.0, 10.0, 5.0, 5.0)
BBOX_XFORM_CLIP = math.log(1000.0 / 16.0)

HW = HF * WF
Q = P * P                 # spatial bins per RoI
QN = Q * N_PER_IMG        # rows of the per-image RoIAlign matrix (q-major)
NFG = NCLS - 1            # foreground classes
GRP = 8                   # lane-aligned group width in the packed head
NHEAD = 5 * GRP           # [cls | dx | dy | dw | dh] groups, 8 lanes each
OUT_LANES = 128           # lane-dense kernel output width
NEG_BIAS = -1e9           # bias of padded class-logit lanes (softmax-neutral)


# -------------------- RoIAlign interpolation matrix (glue) -----------------
def _axis_weights(coord, size):
    """Per-axis bilinear weights matching torchvision roi_align (aligned=False).
    coord: (...,) sample coordinates. Returns (..., size) weights with the
    out-of-range ([-1, size]) mask already applied."""
    valid = (coord >= -1.0) & (coord <= size)
    c = jnp.clip(coord, 0.0)
    low = jnp.minimum(jnp.floor(c).astype(jnp.int32), size - 1)
    high = jnp.minimum(low + 1, size - 1)
    c = jnp.where(low >= size - 1, jnp.float32(size - 1), c)
    l = c - low.astype(jnp.float32)
    h = 1.0 - l
    w = (h[..., None] * jax.nn.one_hot(low, size, dtype=jnp.float32)
         + l[..., None] * jax.nn.one_hot(high, size, dtype=jnp.float32))
    return w * valid[..., None].astype(jnp.float32)


def build_roi_align_blocks(proposals_bn4, spatial_scale):
    """Per-image RoIAlign matrices A (B, P*P*N, HW), q-major rows, built directly
    in the needed layout (no one_hot placement, no transpose)."""
    x1 = proposals_bn4[..., 0] * spatial_scale      # (B, N)
    y1 = proposals_bn4[..., 1] * spatial_scale
    x2 = proposals_bn4[..., 2] * spatial_scale
    y2 = proposals_bn4[..., 3] * spatial_scale
    roi_w = jnp.maximum(x2 - x1, 1.0)
    roi_h = jnp.maximum(y2 - y1, 1.0)
    bin_w = roi_w / P
    bin_h = roi_h / P

    frac = (jnp.arange(SR, dtype=jnp.float32) + 0.5) / SR      # (SR,)
    pidx = jnp.arange(P, dtype=jnp.float32)                    # (P,)

    # sample coordinates, (B, P, N, SR)  (bin index before RoI index -> q-major)
    ys = (y1[:, None, :, None]
          + (pidx[None, :, None, None] + frac[None, None, None, :]) * bin_h[:, None, :, None])
    xs = (x1[:, None, :, None]
          + (pidx[None, :, None, None] + frac[None, None, None, :]) * bin_w[:, None, :, None])

    uy = _axis_weights(ys, HF).sum(axis=3)                     # (B, P, N, HF)
    ux = _axis_weights(xs, WF).sum(axis=3)                     # (B, P, N, WF)

    # separable outer product -> (B, Py, Px, N, HF, WF), averaged over SR*SR samples
    a = (uy[:, :, None, :, :, None] * ux[:, None, :, :, None, :]) * (1.0 / (SR * SR))
    # row index = (py*P+px)*N + n  (q-major);  col index = hf*WF + wf
    return a.reshape(B, QN, HW)


# ---------------------------- fused Pallas kernel ----------------------------
def _max_all(x):
    return jnp.max(jnp.max(x, axis=1, keepdims=True), axis=0, keepdims=True)


def _min_all(x):
    return jnp.min(jnp.min(x, axis=1, keepdims=True), axis=0, keepdims=True)


def _sum_all(x):
    return jnp.sum(jnp.sum(x, axis=1, keepdims=True), axis=0, keepdims=True)


def _fused_kernel(a_ref, feat_ref, w6_ref, b6_ref, w7_ref, b7_ref,
                  wcat_ref, bcat_ref, prop_ref, imwh_ref, out_ref):
    b = pl.program_id(0)

    # ---- 1) RoIAlign for this image: one MXU matmul (bf16 x bf16 -> f32) ----
    pooled = jnp.dot(a_ref[...], feat_ref[...],
                     preferred_element_type=jnp.float32)            # (Q*N, C), q-major rows
    pooled = pooled.reshape(Q, N_PER_IMG, C).astype(jnp.bfloat16)   # tile-aligned leading split

    # ---- 2) fc6: one batched contraction over q (K=C per batch) + reduce ----
    h6 = jnp.einsum('qnc,qch->qnh', pooled, w6_ref[...],
                    preferred_element_type=jnp.float32)             # (Q, N, HID)
    h6 = jnp.maximum(jnp.sum(h6, axis=0) + b6_ref[...], 0.0)        # (N, HID)

    # ---- 3) fc7 + packed cls/reg head (lane-aligned 8-wide groups) ----------
    h7 = jnp.maximum(
        jnp.dot(h6.astype(jnp.bfloat16), w7_ref[...],
                preferred_element_type=jnp.float32) + b7_ref[...], 0.0)
    head = jnp.dot(h7.astype(jnp.bfloat16), wcat_ref[...],
                   preferred_element_type=jnp.float32) + bcat_ref[...]   # (N, NHEAD)

    # ---- 4) softmax over classes (padded lanes have bias = -1e9) ------------
    logits = head[:, 0:GRP]
    m = jnp.max(logits, axis=-1, keepdims=True)
    e = jnp.exp(logits - m)
    scores = e * pl.reciprocal(jnp.sum(e, axis=-1, keepdims=True), approx=True)
    scores_fg = scores[:, 1:NCLS]                                    # (N, NFG)

    dx = head[:, 1 * GRP:1 * GRP + NFG] * (1.0 / BBOX_REG_WEIGHTS[0])
    dy = head[:, 2 * GRP:2 * GRP + NFG] * (1.0 / BBOX_REG_WEIGHTS[1])
    dw = jnp.minimum(head[:, 3 * GRP:3 * GRP + NFG] * (1.0 / BBOX_REG_WEIGHTS[2]),
                     BBOX_XFORM_CLIP)
    dh = jnp.minimum(head[:, 4 * GRP:4 * GRP + NFG] * (1.0 / BBOX_REG_WEIGHTS[3]),
                     BBOX_XFORM_CLIP)

    # ---- 5) BoxCoder.decode + clip_boxes_to_image ---------------------------
    p = prop_ref[...]                                                # (N, 4)
    widths = p[:, 2:3] - p[:, 0:1]
    heights = p[:, 3:4] - p[:, 1:2]
    ctr_x = p[:, 0:1] + 0.5 * widths
    ctr_y = p[:, 1:2] + 0.5 * heights

    pred_cx = dx * widths + ctr_x
    pred_cy = dy * heights + ctr_y
    pred_w = jnp.exp(dw) * widths
    pred_h = jnp.exp(dh) * heights

    im_w = imwh_ref[b, 0]
    im_h = imwh_ref[b, 1]
    x1 = jnp.clip(pred_cx - 0.5 * pred_w, 0.0, im_w)
    y1 = jnp.clip(pred_cy - 0.5 * pred_h, 0.0, im_h)
    x2 = jnp.clip(pred_cx + 0.5 * pred_w, 0.0, im_w)
    y2 = jnp.clip(pred_cy + 0.5 * pred_h, 0.0, im_h)

    # ---- 6) score filter + exact class-aware greedy NMS + top-k (in kernel) --
    bw = x2 - x1
    bh = y2 - y1
    active = (scores_fg > SCORE_THRESH) & (bw >= MIN_SIZE) & (bh >= MIN_SIZE)

    colf = jax.lax.broadcasted_iota(jnp.int32, (N_PER_IMG, NFG), 1).astype(jnp.float32)
    rowf = jax.lax.broadcasted_iota(jnp.int32, (N_PER_IMG, NFG), 0).astype(jnp.float32)
    linf = rowf * NFG + colf
    area = bw * bh

    dets = []
    for _ in range(DET_PER_IMG):                 # iterative argmax-and-suppress
        masked = jnp.where(active, scores_fg, -1.0)
        m_s = _max_all(masked)                                   # (1, 1)
        has = m_s > 0.0                                          # (1, 1) bool
        is_max = active & (masked >= m_s)
        min_lin = _min_all(jnp.where(is_max, linf, 1e9))
        pick = (is_max & (linf == min_lin)).astype(jnp.float32)  # one-hot (or all-zero)

        cb_x1 = _sum_all(pick * x1)
        cb_y1 = _sum_all(pick * y1)
        cb_x2 = _sum_all(pick * x2)
        cb_y2 = _sum_all(pick * y2)
        c_star = _sum_all(pick * colf)

        # suppress same-class boxes overlapping the chosen one (incl. itself)
        xx1 = jnp.maximum(x1, cb_x1)
        yy1 = jnp.maximum(y1, cb_y1)
        xx2 = jnp.minimum(x2, cb_x2)
        yy2 = jnp.minimum(y2, cb_y2)
        inter = jnp.maximum(xx2 - xx1, 0.0) * jnp.maximum(yy2 - yy1, 0.0)
        union = area + (cb_x2 - cb_x1) * (cb_y2 - cb_y1) - inter
        iou = jnp.where(union > 0.0, inter / union, 0.0)
        suppress = has & (colf == c_star) & (iou > NMS_THRESH)
        active = active & jnp.logical_not(suppress)

        vf = has.astype(jnp.float32)                             # (1, 1)
        dets.append((cb_x1 * vf, cb_y1 * vf, cb_x2 * vf, cb_y2 * vf,
                     jnp.maximum(m_s, 0.0) * vf, (c_star + 1.0) * vf, vf))

    # ---- 7) build the per-image (N, 128) slab in registers; ONE full store ---
    lane = jax.lax.broadcasted_iota(jnp.int32, (1, OUT_LANES), 1)
    orow = jax.lax.broadcasted_iota(jnp.int32, (N_PER_IMG, 1), 0)
    slab = jnp.zeros((N_PER_IMG, OUT_LANES), jnp.float32)
    for k, vals in enumerate(dets):
        rowvec = jnp.zeros((1, OUT_LANES), jnp.float32)
        for j, v in enumerate(vals):                 # lanes: x1 y1 x2 y2 score label valid
            rowvec = rowvec + (lane == j).astype(jnp.float32) * v
        slab = slab + (orow == k).astype(jnp.float32) * rowvec
    out_ref[...] = slab


def fused_roi_heads_pallas(a_bf16, feat_bf16, packed, proposals_b, imwh):
    in_specs = [
        pl.BlockSpec((None, QN, HW), lambda b: (b, 0, 0)),        # A block (per image)
        pl.BlockSpec((None, HW, C), lambda b: (b, 0, 0)),         # features (per image)
        pl.BlockSpec((Q, C, HID), lambda b: (0, 0, 0)),           # fc6 weight (resident)
        pl.BlockSpec((1, HID), lambda b: (0, 0)),                 # fc6 bias
        pl.BlockSpec((HID, HID), lambda b: (0, 0)),               # fc7 weight
        pl.BlockSpec((1, HID), lambda b: (0, 0)),                 # fc7 bias
        pl.BlockSpec((HID, NHEAD), lambda b: (0, 0)),             # packed cls/reg weight
        pl.BlockSpec((1, NHEAD), lambda b: (0, 0)),               # packed cls/reg bias
        pl.BlockSpec((None, N_PER_IMG, 4), lambda b: (b, 0, 0)),  # proposals (per image)
        pl.BlockSpec(memory_space=pltpu.MemorySpace.SMEM),        # (w, h) per image
    ]
    out_specs = pl.BlockSpec((None, N_PER_IMG, OUT_LANES), lambda b: (b, 0, 0))
    return pl.pallas_call(
        _fused_kernel,
        out_shape=jax.ShapeDtypeStruct((B, N_PER_IMG, OUT_LANES), jnp.float32),
        grid=(B,),
        in_specs=in_specs,
        out_specs=out_specs,
        compiler_params=pltpu.CompilerParams(dimension_semantics=("parallel",)),
    )(a_bf16, feat_bf16, packed["w6"], packed["b6"], packed["w7"], packed["b7"],
      packed["wcat"], packed["bcat"], proposals_b, imwh)


# ------------------------------ jitted forward -------------------------------
@jax.jit
def _device_forward(features_nchw, proposals_b, imwh, spatial_scale, packed):
    a = build_roi_align_blocks(proposals_b, spatial_scale).astype(jnp.bfloat16)
    feat = jnp.transpose(features_nchw, (0, 2, 3, 1)).reshape(B, HW, C).astype(jnp.bfloat16)
    return fused_roi_heads_pallas(a, feat, packed, proposals_b, imwh)


def prepare_packed_params(params):
    """One-time weight permutation / packing (no runtime cost in the forward)."""
    # fc6 rows: PyTorch flatten order c*P*P + q  ->  q-major (P*P, C, HID)
    w6 = params["w6"].reshape(C, Q, HID).transpose(1, 0, 2)

    def pad_cols(w, bias, width, pad_bias=0.0):
        pw = jnp.zeros((HID, width - w.shape[1]), jnp.float32)
        pb = jnp.full((1, width - bias.shape[1]), pad_bias, jnp.float32)
        return jnp.concatenate([w, pw], axis=1), jnp.concatenate([bias, pb], axis=1)

    # group 0: all NCLS class logits (+ pad lanes biased to -1e9 => softmax-neutral)
    wc, bc = pad_cols(params["wcls"], params["bcls"], GRP, pad_bias=NEG_BIAS)
    groups_w, groups_b = [wc], [bc]
    # groups 1..4: dx / dy / dw / dh for foreground classes only (+ zero pad lanes)
    for k in range(4):
        cols = [4 * c + k for c in range(1, NCLS)]
        wk, bk = pad_cols(params["wreg"][:, cols], params["breg"][:, cols], GRP)
        groups_w.append(wk)
        groups_b.append(bk)
    wcat = jnp.concatenate(groups_w, axis=1)
    bcat = jnp.concatenate(groups_b, axis=1)
    return {"w6": w6.astype(jnp.bfloat16), "b6": params["b6"],
            "w7": params["w7"].astype(jnp.bfloat16), "b7": params["b7"],
            "wcat": wcat.astype(jnp.bfloat16), "bcat": bcat}


def xami_roi_heads_forward(features_nchw, proposals_list, image_shapes, packed_params):
    """Inference forward of XAMIRoIHeads (targets=None)."""
    boxes_per_image = [int(p.shape[0]) for p in proposals_list]
    assert boxes_per_image == [N_PER_IMG] * B
    # TODO(synk): variable proposals-per-image would need padded per-image blocks.
    spatial_scale = HF / float(image_shapes[0][0])   # single-level MultiScaleRoIAlign scale

    proposals_b = jnp.stack(proposals_list, axis=0)                       # (B, N, 4)
    imwh = jnp.array([[float(w), float(h)] for (h, w) in image_shapes], jnp.float32)

    slab = _device_forward(features_nchw, proposals_b, imwh,
                           jnp.float32(spatial_scale), packed_params)
    slab = np.asarray(jax.block_until_ready(slab))                        # single host sync

    result = []
    for i in range(B):
        valid = slab[i, :DET_PER_IMG, 6] > 0.5
        c = int(valid.sum())
        result.append({"boxes": slab[i, :c, 0:4].astype(np.float32),
                       "labels": np.rint(slab[i, :c, 5]).astype(np.int64),
                       "scores": slab[i, :c, 4].astype(np.float32)})
    losses = {}  # TODO(synk): training path (matching/sampling/fastrcnn_loss) not implemented
    return result, losses


# --------------------------------- main --------------------------------------
if __name__ == "__main__":
    key = jax.random.PRNGKey(0)
    keys = jax.random.split(key, 8)

    # features in PyTorch NCHW layout
    features = jax.random.normal(keys[0], (B, C, HF, WF), dtype=jnp.float32)

    # proposals: list of (N, 4) boxes in image coordinates (x1, y1, x2, y2)
    xy = jax.random.uniform(keys[1], (B * N_PER_IMG, 2), minval=0.0, maxval=18.0)
    wh = jax.random.uniform(keys[2], (B * N_PER_IMG, 2), minval=4.0, maxval=12.0)
    boxes_all = jnp.concatenate([xy, jnp.minimum(xy + wh, float(IMG_W))], axis=1)
    proposals_list = [boxes_all[:N_PER_IMG], boxes_all[N_PER_IMG:]]
    image_shapes = [(IMG_H, IMG_W), (IMG_H, IMG_W)]

    # deterministic synthetic parameters (TwoMLPHead + FastRCNNPredictor, (in, out) layout)
    params = {
        "w6": jax.random.normal(keys[3], (C * P * P, HID), dtype=jnp.float32) * 0.02,
        "b6": jnp.zeros((1, HID), dtype=jnp.float32),
        "w7": jax.random.normal(keys[4], (HID, HID), dtype=jnp.float32) * 0.02,
        "b7": jnp.zeros((1, HID), dtype=jnp.float32),
        "wcls": jax.random.normal(keys[5], (HID, NCLS), dtype=jnp.float32) * 0.02,
        "bcls": jnp.zeros((1, NCLS), dtype=jnp.float32),
        "wreg": jax.random.normal(keys[6], (HID, NCLS * 4), dtype=jnp.float32) * 0.02,
        "breg": jnp.zeros((1, NCLS * 4), dtype=jnp.float32),
    }
    packed_params = prepare_packed_params(params)

    result, losses = xami_roi_heads_forward(features, proposals_list, image_shapes,
                                            packed_params)

    # basic sanity on shapes/dtypes
    for r in result:
        assert r["boxes"].ndim == 2 and r["boxes"].shape[1] == 4
        assert r["scores"].ndim == 1 and r["labels"].dtype == np.int64
        assert r["boxes"].shape[0] <= DET_PER_IMG

    print("KERNEL_OK")
</pallas_src>

<mosaic_0001>
module attributes {stable_mosaic.version = 11 : i64} {
  func.func @_fused_kernel(%arg0: i32, %arg1: memref<1x392x256xbf16, #tpu.memory_space<vmem>>, %arg2: memref<1x256x16xbf16, #tpu.memory_space<vmem>>, %arg3: memref<49x16x32xbf16, #tpu.memory_space<vmem>>, %arg4: memref<1x32xf32, #tpu.memory_space<vmem>>, %arg5: memref<32x32xbf16, #tpu.memory_space<vmem>>, %arg6: memref<1x32xf32, #tpu.memory_space<vmem>>, %arg7: memref<32x40xbf16, #tpu.memory_space<vmem>>, %arg8: memref<1x40xf32, #tpu.memory_space<vmem>>, %arg9: memref<1x8x4xf32, #tpu.memory_space<vmem>>, %arg10: memref<2x2xf32, #tpu.memory_space<smem>>, %arg11: memref<1x8x128xf32, #tpu.memory_space<vmem>>) attributes {dimension_semantics = [#tpu.dimension_semantics<parallel>], iteration_bounds = array<i64: 2>, scalar_prefetch = 0 : i64, scratch_operands = 0 : i64, tpu.core_type = #tpu.core_type<tc>, window_params = [{transform_indices = @transform_0, window_bounds = array<i64: 1, 392, 256>}, {transform_indices = @transform_1, window_bounds = array<i64: 1, 256, 16>}, {pipeline_mode = #tpu.pipeline_mode<synchronous>, transform_indices = @transform_2, window_bounds = array<i64: 49, 16, 32>}, {pipeline_mode = #tpu.pipeline_mode<synchronous>, transform_indices = @transform_3, window_bounds = array<i64: 1, 32>}, {pipeline_mode = #tpu.pipeline_mode<synchronous>, transform_indices = @transform_4, window_bounds = array<i64: 32, 32>}, {pipeline_mode = #tpu.pipeline_mode<synchronous>, transform_indices = @transform_5, window_bounds = array<i64: 1, 32>}, {pipeline_mode = #tpu.pipeline_mode<synchronous>, transform_indices = @transform_6, window_bounds = array<i64: 32, 40>}, {pipeline_mode = #tpu.pipeline_mode<synchronous>, transform_indices = @transform_7, window_bounds = array<i64: 1, 40>}, {transform_indices = @transform_8, window_bounds = array<i64: 1, 8, 4>}, {transform_indices = @transform_9, window_bounds = array<i64: 2, 2>}, {transform_indices = @transform_10, window_bounds = array<i64: 1, 8, 128>}]} {
    %c0 = arith.constant 0 : index
    %c0_0 = arith.constant 0 : index
    %c0_1 = arith.constant 0 : index
    %0 = vector.load %arg1[%c0, %c0_0, %c0_1] : memref<1x392x256xbf16, #tpu.memory_space<vmem>>, vector<1x392x256xbf16>
    %1 = vector.shape_cast %0 : vector<1x392x256xbf16> to vector<392x256xbf16>
    %c0_2 = arith.constant 0 : index
    %c0_3 = arith.constant 0 : index
    %c0_4 = arith.constant 0 : index
    %2 = vector.load %arg2[%c0_2, %c0_3, %c0_4] : memref<1x256x16xbf16, #tpu.memory_space<vmem>>, vector<1x256x16xbf16>
    %3 = vector.shape_cast %2 : vector<1x256x16xbf16> to vector<256x16xbf16>
    %cst = arith.constant dense<0.000000e+00> : vector<392x16xf32>
    %4 = tpu.matmul %1, %3, %cst {dimension_numbers = #tpu.dot_dimension_numbers<[1], [0], [0], [1], [0, 0, 1, 1], [], []>} : vector<392x256xbf16>, vector<256x16xbf16>, vector<392x16xf32> -> vector<392x16xf32>
    %5 = vector.shape_cast %4 : vector<392x16xf32> to vector<49x8x16xf32>
    %6 = arith.truncf %5 : vector<49x8x16xf32> to vector<49x8x16xbf16>
    %c0_5 = arith.constant 0 : index
    %c0_6 = arith.constant 0 : index
    %c0_7 = arith.constant 0 : index
    %7 = vector.load %arg3[%c0_5, %c0_6, %c0_7] : memref<49x16x32xbf16, #tpu.memory_space<vmem>>, vector<49x16x32xbf16>
    "tpu.trace_start"() <{level = 10 : i32, message = "qnc,qch->qnh"}> : () -> ()
    %cst_8 = arith.constant dense<0.000000e+00> : vector<49x8x32xf32>
    %8 = tpu.matmul %6, %7, %cst_8 {dimension_numbers = #tpu.dot_dimension_numbers<[2], [1], [1], [2], [0, 0, 0, 1, 1, 2], [0], [0]>} : vector<49x8x16xbf16>, vector<49x16x32xbf16>, vector<49x8x32xf32> -> vector<49x8x32xf32>
    "tpu.trace_stop"() : () -> ()
    %cst_9 = arith.constant dense<0.000000e+00> : vector<8x32xf32>
    %9 = vector.multi_reduction <add>, %8, %cst_9 [0] : vector<49x8x32xf32> to vector<8x32xf32>
    %c0_10 = arith.constant 0 : index
    %c0_11 = arith.constant 0 : index
    %10 = vector.load %arg4[%c0_10, %c0_11] : memref<1x32xf32, #tpu.memory_space<vmem>>, vector<1x32xf32>
    %11 = vector.broadcast %10 : vector<1x32xf32> to vector<8x32xf32>
    %12 = arith.addf %9, %11 : vector<8x32xf32>
    %cst_12 = arith.constant 0.000000e+00 : f32
    %13 = vector.broadcast %cst_12 : f32 to vector<8x32xf32>
    %14 = arith.maximumf %12, %13 : vector<8x32xf32>
    %15 = arith.truncf %14 : vector<8x32xf32> to vector<8x32xbf16>
    %c0_13 = arith.constant 0 : index
    %c0_14 = arith.constant 0 : index
    %16 = vector.load %arg5[%c0_13, %c0_14] : memref<32x32xbf16, #tpu.memory_space<vmem>>, vector<32x32xbf16>
    %cst_15 = arith.constant dense<0.000000e+00> : vector<8x32xf32>
    %17 = tpu.matmul %15, %16, %cst_15 {dimension_numbers = #tpu.dot_dimension_numbers<[1], [0], [0], [1], [0, 0, 1, 1], [], []>} : vector<8x32xbf16>, vector<32x32xbf16>, vector<8x32xf32> -> vector<8x32xf32>
    %c0_16 = arith.constant 0 : index
    %c0_17 = arith.constant 0 : index
    %18 = vector.load %arg6[%c0_16, %c0_17] : memref<1x32xf32, #tpu.memory_space<vmem>>, vector<1x32xf32>
    %19 = vector.broadcast %18 : vector<1x32xf32> to vector<8x32xf32>
    %20 = arith.addf %17, %19 : vector<8x32xf32>
    %cst_18 = arith.constant 0.000000e+00 : f32
    %21 = vector.broadcast %cst_18 : f32 to vector<8x32xf32>
    %22 = arith.maximumf %20, %21 : vector<8x32xf32>
    %23 = arith.truncf %22 : vector<8x32xf32> to vector<8x32xbf16>
    %c0_19 = arith.constant 0 : index
    %c0_20 = arith.constant 0 : index
    %24 = vector.load %arg7[%c0_19, %c0_20] : memref<32x40xbf16, #tpu.memory_space<vmem>>, vector<32x40xbf16>
    %cst_21 = arith.constant dense<0.000000e+00> : vector<8x40xf32>
    %25 = tpu.matmul %23, %24, %cst_21 {dimension_numbers = #tpu.dot_dimension_numbers<[1], [0], [0], [1], [0, 0, 1, 1], [], []>} : vector<8x32xbf16>, vector<32x40xbf16>, vector<8x40xf32> -> vector<8x40xf32>
    %c0_22 = arith.constant 0 : index
    %c0_23 = arith.constant 0 : index
    %26 = vector.load %arg8[%c0_22, %c0_23] : memref<1x40xf32, #tpu.memory_space<vmem>>, vector<1x40xf32>
    %27 = vector.broadcast %26 : vector<1x40xf32> to vector<8x40xf32>
    %28 = arith.addf %25, %27 : vector<8x40xf32>
    %29 = vector.extract_strided_slice %28 {offsets = [0, 0], sizes = [8, 8], strides = [1, 1]} : vector<8x40xf32> to vector<8x8xf32>
    %cst_24 = arith.constant dense<0xFF800000> : vector<8xf32>
    %30 = vector.multi_reduction <maximumf>, %29, %cst_24 [1] : vector<8x8xf32> to vector<8xf32>
    %31 = vector.shape_cast %30 : vector<8xf32> to vector<8x1xf32>
    %32 = vector.broadcast %31 : vector<8x1xf32> to vector<8x8xf32>
    %33 = arith.subf %29, %32 : vector<8x8xf32>
    %34 = math.exp %33 : vector<8x8xf32>
    %cst_25 = arith.constant dense<0.000000e+00> : vector<8xf32>
    %35 = vector.multi_reduction <add>, %34, %cst_25 [1] : vector<8x8xf32> to vector<8xf32>
    %36 = vector.shape_cast %35 : vector<8xf32> to vector<8x1xf32>
    %37 = tpu.reciprocal %36 {approx = true} : vector<8x1xf32> -> vector<8x1xf32>
    %38 = vector.broadcast %37 : vector<8x1xf32> to vector<8x8xf32>
    %39 = arith.mulf %34, %38 : vector<8x8xf32>
    %40 = vector.extract_strided_slice %39 {offsets = [0, 1], sizes = [8, 4], strides = [1, 1]} : vector<8x8xf32> to vector<8x4xf32>
    %41 = vector.extract_strided_slice %28 {offsets = [0, 8], sizes = [8, 4], strides = [1, 1]} : vector<8x40xf32> to vector<8x4xf32>
    %cst_26 = arith.constant 1.000000e-01 : f32
    %42 = vector.broadcast %cst_26 : f32 to vector<8x4xf32>
    %43 = arith.mulf %41, %42 : vector<8x4xf32>
    %44 = vector.extract_strided_slice %28 {offsets = [0, 16], sizes = [8, 4], strides = [1, 1]} : vector<8x40xf32> to vector<8x4xf32>
    %cst_27 = arith.constant 1.000000e-01 : f32
    %45 = vector.broadcast %cst_27 : f32 to vector<8x4xf32>
    %46 = arith.mulf %44, %45 : vector<8x4xf32>
    %47 = vector.extract_strided_slice %28 {offsets = [0, 24], sizes = [8, 4], strides = [1, 1]} : vector<8x40xf32> to vector<8x4xf32>
    %cst_28 = arith.constant 2.000000e-01 : f32
    %48 = vector.broadcast %cst_28 : f32 to vector<8x4xf32>
    %49 = arith.mulf %47, %48 : vector<8x4xf32>
    %cst_29 = arith.constant 4.13516665 : f32
    %50 = vector.broadcast %cst_29 : f32 to vector<8x4xf32>
    %51 = arith.minimumf %49, %50 : vector<8x4xf32>
    %52 = vector.extract_strided_slice %28 {offsets = [0, 32], sizes = [8, 4], strides = [1, 1]} : vector<8x40xf32> to vector<8x4xf32>
    %cst_30 = arith.constant 2.000000e-01 : f32
    %53 = vector.broadcast %cst_30 : f32 to vector<8x4xf32>
    %54 = arith.mulf %52, %53 : vector<8x4xf32>
    %cst_31 = arith.constant 4.13516665 : f32
    %55 = vector.broadcast %cst_31 : f32 to vector<8x4xf32>
    %56 = arith.minimumf %54, %55 : vector<8x4xf32>
    %c0_32 = arith.constant 0 : index
    %c0_33 = arith.constant 0 : index
    %c0_34 = arith.constant 0 : index
    %57 = vector.load %arg9[%c0_32, %c0_33, %c0_34] : memref<1x8x4xf32, #tpu.memory_space<vmem>>, vector<1x8x4xf32>
    %58 = vector.shape_cast %57 : vector<1x8x4xf32> to vector<8x4xf32>
    %59 = vector.extract_strided_slice %58 {offsets = [0, 2], sizes = [8, 1], strides = [1, 1]} : vector<8x4xf32> to vector<8x1xf32>
    %60 = vector.extract_strided_slice %58 {offsets = [0, 0], sizes = [8, 1], strides = [1, 1]} : vector<8x4xf32> to vector<8x1xf32>
    %61 = arith.subf %59, %60 : vector<8x1xf32>
    %62 = vector.extract_strided_slice %58 {offsets = [0, 3], sizes = [8, 1], strides = [1, 1]} : vector<8x4xf32> to vector<8x1xf32>
    %63 = vector.extract_strided_slice %58 {offsets = [0, 1], sizes = [8, 1], strides = [1, 1]} : vector<8x4xf32> to vector<8x1xf32>
    %64 = arith.subf %62, %63 : vector<8x1xf32>
    %65 = vector.extract_strided_slice %58 {offsets = [0, 0], sizes = [8, 1], strides = [1, 1]} : vector<8x4xf32> to vector<8x1xf32>
    %cst_35 = arith.constant 5.000000e-01 : f32
    %66 = vector.broadcast %cst_35 : f32 to vector<8x1xf32>
    %67 = arith.mulf %66, %61 : vector<8x1xf32>
    %68 = arith.addf %65, %67 : vector<8x1xf32>
    %69 = vector.extract_strided_slice %58 {offsets = [0, 1], sizes = [8, 1], strides = [1, 1]} : vector<8x4xf32> to vector<8x1xf32>
    %cst_36 = arith.constant 5.000000e-01 : f32
    %70 = vector.broadcast %cst_36 : f32 to vector<8x1xf32>
    %71 = arith.mulf %70, %64 : vector<8x1xf32>
    %72 = arith.addf %69, %71 : vector<8x1xf32>
    %73 = vector.broadcast %61 : vector<8x1xf32> to vector<8x4xf32>
    %74 = arith.mulf %43, %73 : vector<8x4xf32>
    %75 = vector.broadcast %68 : vector<8x1xf32> to vector<8x4xf32>
    %76 = arith.addf %74, %75 : vector<8x4xf32>
    %77 = vector.broadcast %64 : vector<8x1xf32> to vector<8x4xf32>
    %78 = arith.mulf %46, %77 : vector<8x4xf32>
    %79 = vector.broadcast %72 : vector<8x1xf32> to vector<8x4xf32>
    %80 = arith.addf %78, %79 : vector<8x4xf32>
    %81 = math.exp %51 : vector<8x4xf32>
    %82 = vector.broadcast %61 : vector<8x1xf32> to vector<8x4xf32>
    %83 = arith.mulf %81, %82 : vector<8x4xf32>
    %84 = math.exp %56 : vector<8x4xf32>
    %85 = vector.broadcast %64 : vector<8x1xf32> to vector<8x4xf32>
    %86 = arith.mulf %84, %85 : vector<8x4xf32>
    %87 = arith.index_cast %arg0 : i32 to index
    %c0_37 = arith.constant 0 : index
    %88 = memref.load %arg10[%87, %c0_37] : memref<2x2xf32, #tpu.memory_space<smem>>
    %89 = arith.index_cast %arg0 : i32 to index
    %c1 = arith.constant 1 : index
    %90 = memref.load %arg10[%89, %c1] : memref<2x2xf32, #tpu.memory_space<smem>>
    %cst_38 = arith.constant 5.000000e-01 : f32
    %91 = vector.broadcast %cst_38 : f32 to vector<8x4xf32>
    %92 = arith.mulf %91, %83 : vector<8x4xf32>
    %93 = arith.subf %76, %92 : vector<8x4xf32>
    %cst_39 = arith.constant 0.000000e+00 : f32
    %94 = vector.broadcast %cst_39 : f32 to vector<8x4xf32>
    %95 = arith.maximumf %94, %93 : vector<8x4xf32>
    %96 = vector.broadcast %88 : f32 to vector<8x4xf32>
    %97 = arith.minimumf %96, %95 : vector<8x4xf32>
    %cst_40 = arith.constant 5.000000e-01 : f32
    %98 = vector.broadcast %cst_40 : f32 to vector<8x4xf32>
    %99 = arith.mulf %98, %86 : vector<8x4xf32>
    %100 = arith.subf %80, %99 : vector<8x4xf32>
    %cst_41 = arith.constant 0.000000e+00 : f32
    %101 = vector.broadcast %cst_41 : f32 to vector<8x4xf32>
    %102 = arith.maximumf %101, %100 : vector<8x4xf32>
    %103 = vector.broadcast %90 : f32 to vector<8x4xf32>
    %104 = arith.minimumf %103, %102 : vector<8x4xf32>
    %cst_42 = arith.constant 5.000000e-01 : f32
    %105 = vector.broadcast %cst_42 : f32 to vector<8x4xf32>
    %106 = arith.mulf %105, %83 : vector<8x4xf32>
    %107 = arith.addf %76, %106 : vector<8x4xf32>
    %cst_43 = arith.constant 0.000000e+00 : f32
    %108 = vector.broadcast %cst_43 : f32 to vector<8x4xf32>
    %109 = arith.maximumf %108, %107 : vector<8x4xf32>
    %110 = vector.broadcast %88 : f32 to vector<8x4xf32>
    %111 = arith.minimumf %110, %109 : vector<8x4xf32>
    %cst_44 = arith.constant 5.000000e-01 : f32
    %112 = vector.broadcast %cst_44 : f32 to vector<8x4xf32>
    %113 = arith.mulf %112, %86 : vector<8x4xf32>
    %114 = arith.addf %80, %113 : vector<8x4xf32>
    %cst_45 = arith.constant 0.000000e+00 : f32
    %115 = vector.broadcast %cst_45 : f32 to vector<8x4xf32>
    %116 = arith.maximumf %115, %114 : vector<8x4xf32>
    %117 = vector.broadcast %90 : f32 to vector<8x4xf32>
    %118 = arith.minimumf %117, %116 : vector<8x4xf32>
    %119 = arith.subf %111, %97 : vector<8x4xf32>
    %120 = arith.subf %118, %104 : vector<8x4xf32>
    %cst_46 = arith.constant 5.000000e-02 : f32
    %121 = vector.broadcast %cst_46 : f32 to vector<8x4xf32>
    %122 = arith.cmpf ogt, %40, %121 : vector<8x4xf32>
    %cst_47 = arith.constant 0.00999999977 : f32
    %123 = vector.broadcast %cst_47 : f32 to vector<8x4xf32>
    %124 = arith.cmpf oge, %119, %123 : vector<8x4xf32>
    %125 = arith.andi %122, %124 : vector<8x4xi1>
    %cst_48 = arith.constant 0.00999999977 : f32
    %126 = vector.broadcast %cst_48 : f32 to vector<8x4xf32>
    %127 = arith.cmpf oge, %120, %126 : vector<8x4xf32>
    %128 = arith.andi %125, %127 : vector<8x4xi1>
    %129 = tpu.iota {dimensions = array<i32: 1>} : vector<8x4xi32>
    %130 = arith.sitofp %129 : vector<8x4xi32> to vector<8x4xf32>
    %131 = tpu.iota {dimensions = array<i32: 0>} : vector<8x4xi32>
    %132 = arith.sitofp %131 : vector<8x4xi32> to vector<8x4xf32>
    %cst_49 = arith.constant 4.000000e+00 : f32
    %133 = vector.broadcast %cst_49 : f32 to vector<8x4xf32>
    %134 = arith.mulf %132, %133 : vector<8x4xf32>
    %135 = arith.addf %134, %130 : vector<8x4xf32>
    %136 = arith.mulf %119, %120 : vector<8x4xf32>
    %cst_50 = arith.constant -1.000000e+00 : f32
    %137 = vector.broadcast %cst_50 : f32 to vector<8x4xf32>
    %138 = arith.select %128, %40, %137 : vector<8x4xi1>, vector<8x4xf32>
    %cst_51 = arith.constant dense<0xFF800000> : vector<8xf32>
    %139 = vector.multi_reduction <maximumf>, %138, %cst_51 [1] : vector<8x4xf32> to vector<8xf32>
    %140 = vector.shape_cast %139 : vector<8xf32> to vector<8x1xf32>
    %cst_52 = arith.constant dense<0xFF800000> : vector<1xf32>
    %141 = vector.multi_reduction <maximumf>, %140, %cst_52 [0] : vector<8x1xf32> to vector<1xf32>
    %142 = vector.shape_cast %141 : vector<1xf32> to vector<1x1xf32>
    %cst_53 = arith.constant 0.000000e+00 : f32
    %143 = vector.broadcast %cst_53 : f32 to vector<1x1xf32>
    %144 = arith.cmpf ogt, %142, %143 : vector<1x1xf32>
    %145 = vector.broadcast %142 : vector<1x1xf32> to vector<8x4xf32>
    %146 = arith.cmpf oge, %138, %145 : vector<8x4xf32>
    %147 = arith.andi %128, %146 : vector<8x4xi1>
    %cst_54 = arith.constant 1.000000e+09 : f32
    %148 = vector.broadcast %cst_54 : f32 to vector<8x4xf32>
    %149 = arith.select %147, %135, %148 : vector<8x4xi1>, vector<8x4xf32>
    %cst_55 = arith.constant dense<0x7F800000> : vector<8xf32>
    %150 = vector.multi_reduction <minimumf>, %149, %cst_55 [1] : vector<8x4xf32> to vector<8xf32>
    %151 = vector.shape_cast %150 : vector<8xf32> to vector<8x1xf32>
    %cst_56 = arith.constant dense<0x7F800000> : vector<1xf32>
    %152 = vector.multi_reduction <minimumf>, %151, %cst_56 [0] : vector<8x1xf32> to vector<1xf32>
    %153 = vector.shape_cast %152 : vector<1xf32> to vector<1x1xf32>
    %154 = vector.broadcast %153 : vector<1x1xf32> to vector<8x4xf32>
    %155 = arith.cmpf oeq, %135, %154 : vector<8x4xf32>
    %156 = arith.andi %147, %155 : vector<8x4xi1>
    %157 = arith.extui %156 : vector<8x4xi1> to vector<8x4xi32>
    %158 = arith.sitofp %157 : vector<8x4xi32> to vector<8x4xf32>
    %159 = arith.mulf %158, %97 : vector<8x4xf32>
    %cst_57 = arith.constant dense<0.000000e+00> : vector<8xf32>
    %160 = vector.multi_reduction <add>, %159, %cst_57 [1] : vector<8x4xf32> to vector<8xf32>
    %161 = vector.shape_cast %160 : vector<8xf32> to vector<8x1xf32>
    %cst_58 = arith.constant dense<0.000000e+00> : vector<1xf32>
    %162 = vector.multi_reduction <add>, %161, %cst_58 [0] : vector<8x1xf32> to vector<1xf32>
    %163 = vector.shape_cast %162 : vector<1xf32> to vector<1x1xf32>
    %164 = arith.mulf %158, %104 : vector<8x4xf32>
    %cst_59 = arith.constant dense<0.000000e+00> : vector<8xf32>
    %165 = vector.multi_reduction <add>, %164, %cst_59 [1] : vector<8x4xf32> to vector<8xf32>
    %166 = vector.shape_cast %165 : vector<8xf32> to vector<8x1xf32>
    %cst_60 = arith.constant dense<0.000000e+00> : vector<1xf32>
    %167 = vector.multi_reduction <add>, %166, %cst_60 [0] : vector<8x1xf32> to vector<1xf32>
    %168 = vector.shape_cast %167 : vector<1xf32> to vector<1x1xf32>
    %169 = arith.mulf %158, %111 : vector<8x4xf32>
    %cst_61 = arith.constant dense<0.000000e+00> : vector<8xf32>
    %170 = vector.multi_reduction <add>, %169, %cst_61 [1] : vector<8x4xf32> to vector<8xf32>
    %171 = vector.shape_cast %170 : vector<8xf32> to vector<8x1xf32>
    %cst_62 = arith.constant dense<0.000000e+00> : vector<1xf32>
    %172 = vector.multi_reduction <add>, %171, %cst_62 [0] : vector<8x1xf32> to vector<1xf32>
    %173 = vector.shape_cast %172 : vector<1xf32> to vector<1x1xf32>
    %174 = arith.mulf %158, %118 : vector<8x4xf32>
    %cst_63 = arith.constant dense<0.000000e+00> : vector<8xf32>
    %175 = vector.multi_reduction <add>, %174, %cst_63 [1] : vector<8x4xf32> to vector<8xf32>
    %176 = vector.shape_cast %175 : vector<8xf32> to vector<8x1xf32>
    %cst_64 = arith.constant dense<0.000000e+00> : vector<1xf32>
    %177 = vector.multi_reduction <add>, %176, %cst_64 [0] : vector<8x1xf32> to vector<1xf32>
    %178 = vector.shape_cast %177 : vector<1xf32> to vector<1x1xf32>
    %179 = arith.mulf %158, %130 : vector<8x4xf32>
    %cst_65 = arith.constant dense<0.000000e+00> : vector<8xf32>
    %180 = vector.multi_reduction <add>, %179, %cst_65 [1] : vector<8x4xf32> to vector<8xf32>
    %181 = vector.shape_cast %180 : vector<8xf32> to vector<8x1xf32>
    %cst_66 = arith.constant dense<0.000000e+00> : vector<1xf32>
    %182 = vector.multi_reduction <add>, %181, %cst_66 [0] : vector<8x1xf32> to vector<1xf32>
    %183 = vector.shape_cast %182 : vector<1xf32> to vector<1x1xf32>
    %184 = vector.broadcast %163 : vector<1x1xf32> to vector<8x4xf32>
    %185 = arith.maximumf %97, %184 : vector<8x4xf32>
    %186 = vector.broadcast %168 : vector<1x1xf32> to vector<8x4xf32>
    %187 = arith.maximumf %104, %186 : vector<8x4xf32>
    %188 = vector.broadcast %173 : vector<1x1xf32> to vector<8x4xf32>
    %189 = arith.minimumf %111, %188 : vector<8x4xf32>
    %190 = vector.broadcast %178 : vector<1x1xf32> to vector<8x4xf32>
    %191 = arith.minimumf %118, %190 : vector<8x4xf32>
    %192 = arith.subf %189, %185 : vector<8x4xf32>
    %cst_67 = arith.constant 0.000000e+00 : f32
    %193 = vector.broadcast %cst_67 : f32 to vector<8x4xf32>
    %194 = arith.maximumf %192, %193 : vector<8x4xf32>
    %195 = arith.subf %191, %187 : vector<8x4xf32>
    %cst_68 = arith.constant 0.000000e+00 : f32
    %196 = vector.broadcast %cst_68 : f32 to vector<8x4xf32>
    %197 = arith.maximumf %195, %196 : vector<8x4xf32>
    %198 = arith.mulf %194, %197 : vector<8x4xf32>
    %199 = arith.subf %173, %163 : vector<1x1xf32>
    %200 = arith.subf %178, %168 : vector<1x1xf32>
    %201 = arith.mulf %199, %200 : vector<1x1xf32>
    %202 = vector.broadcast %201 : vector<1x1xf32> to vector<8x4xf32>
    %203 = arith.addf %136, %202 : vector<8x4xf32>
    %204 = arith.subf %203, %198 : vector<8x4xf32>
    %cst_69 = arith.constant 0.000000e+00 : f32
    %205 = vector.broadcast %cst_69 : f32 to vector<8x4xf32>
    %206 = arith.cmpf ogt, %204, %205 : vector<8x4xf32>
    %207 = arith.divf %198, %204 : vector<8x4xf32>
    %cst_70 = arith.constant 0.000000e+00 : f32
    %208 = vector.broadcast %cst_70 : f32 to vector<8x4xf32>
    %209 = arith.select %206, %207, %208 : vector<8x4xi1>, vector<8x4xf32>
    %210 = vector.broadcast %183 : vector<1x1xf32> to vector<8x4xf32>
    %211 = arith.cmpf oeq, %130, %210 : vector<8x4xf32>
    %212 = vector.broadcast %144 : vector<1x1xi1> to vector<8x4xi1>
    %213 = arith.andi %212, %211 : vector<8x4xi1>
    %cst_71 = arith.constant 5.000000e-01 : f32
    %214 = vector.broadcast %cst_71 : f32 to vector<8x4xf32>
    %215 = arith.cmpf ogt, %209, %214 : vector<8x4xf32>
    %216 = arith.andi %213, %215 : vector<8x4xi1>
    %cst_72 = arith.constant dense<true> : vector<8x4xi1>
    %217 = arith.xori %216, %cst_72 : vector<8x4xi1>
    %218 = arith.andi %128, %217 : vector<8x4xi1>
    %219 = arith.extui %144 : vector<1x1xi1> to vector<1x1xi32>
    %220 = arith.sitofp %219 : vector<1x1xi32> to vector<1x1xf32>
    %221 = arith.mulf %163, %220 : vector<1x1xf32>
    %222 = arith.mulf %168, %220 : vector<1x1xf32>
    %223 = arith.mulf %173, %220 : vector<1x1xf32>
    %224 = arith.mulf %178, %220 : vector<1x1xf32>
    %cst_73 = arith.constant 0.000000e+00 : f32
    %225 = vector.broadcast %cst_73 : f32 to vector<1x1xf32>
    %226 = arith.maximumf %142, %225 : vector<1x1xf32>
    %227 = arith.mulf %226, %220 : vector<1x1xf32>
    %cst_74 = arith.constant 1.000000e+00 : f32
    %228 = vector.broadcast %cst_74 : f32 to vector<1x1xf32>
    %229 = arith.addf %183, %228 : vector<1x1xf32>
    %230 = arith.mulf %229, %220 : vector<1x1xf32>
    %cst_75 = arith.constant -1.000000e+00 : f32
    %231 = vector.broadcast %cst_75 : f32 to vector<8x4xf32>
    %232 = arith.select %218, %40, %231 : vector<8x4xi1>, vector<8x4xf32>
    %cst_76 = arith.constant dense<0xFF800000> : vector<8xf32>
    %233 = vector.multi_reduction <maximumf>, %232, %cst_76 [1] : vector<8x4xf32> to vector<8xf32>
    %234 = vector.shape_cast %233 : vector<8xf32> to vector<8x1xf32>
    %cst_77 = arith.constant dense<0xFF800000> : vector<1xf32>
    %235 = vector.multi_reduction <maximumf>, %234, %cst_77 [0] : vector<8x1xf32> to vector<1xf32>
    %236 = vector.shape_cast %235 : vector<1xf32> to vector<1x1xf32>
    %cst_78 = arith.constant 0.000000e+00 : f32
    %237 = vector.broadcast %cst_78 : f32 to vector<1x1xf32>
    %238 = arith.cmpf ogt, %236, %237 : vector<1x1xf32>
    %239 = vector.broadcast %236 : vector<1x1xf32> to vector<8x4xf32>
    %240 = arith.cmpf oge, %232, %239 : vector<8x4xf32>
    %241 = arith.andi %218, %240 : vector<8x4xi1>
    %cst_79 = arith.constant 1.000000e+09 : f32
    %242 = vector.broadcast %cst_79 : f32 to vector<8x4xf32>
    %243 = arith.select %241, %135, %242 : vector<8x4xi1>, vector<8x4xf32>
    %cst_80 = arith.constant dense<0x7F800000> : vector<8xf32>
    %244 = vector.multi_reduction <minimumf>, %243, %cst_80 [1] : vector<8x4xf32> to vector<8xf32>
    %245 = vector.shape_cast %244 : vector<8xf32> to vector<8x1xf32>
    %cst_81 = arith.constant dense<0x7F800000> : vector<1xf32>
    %246 = vector.multi_reduction <minimumf>, %245, %cst_81 [0] : vector<8x1xf32> to vector<1xf32>
    %247 = vector.shape_cast %246 : vector<1xf32> to vector<1x1xf32>
    %248 = vector.broadcast %247 : vector<1x1xf32> to vector<8x4xf32>
    %249 = arith.cmpf oeq, %135, %248 : vector<8x4xf32>
    %250 = arith.andi %241, %249 : vector<8x4xi1>
    %251 = arith.extui %250 : vector<8x4xi1> to vector<8x4xi32>
    %252 = arith.sitofp %251 : vector<8x4xi32> to vector<8x4xf32>
    %253 = arith.mulf %252, %97 : vector<8x4xf32>
    %cst_82 = arith.constant dense<0.000000e+00> : vector<8xf32>
    %254 = vector.multi_reduction <add>, %253, %cst_82 [1] : vector<8x4xf32> to vector<8xf32>
    %255 = vector.shape_cast %254 : vector<8xf32> to vector<8x1xf32>
    %cst_83 = arith.constant dense<0.000000e+00> : vector<1xf32>
    %256 = vector.multi_reduction <add>, %255, %cst_83 [0] : vector<8x1xf32> to vector<1xf32>
    %257 = vector.shape_cast %256 : vector<1xf32> to vector<1x1xf32>
    %258 = arith.mulf %252, %104 : vector<8x4xf32>
    %cst_84 = arith.constant dense<0.000000e+00> : vector<8xf32>
    %259 = vector.multi_reduction <add>, %258, %cst_84 [1] : vector<8x4xf32> to vector<8xf32>
    %260 = vector.shape_cast %259 : vector<8xf32> to vector<8x1xf32>
    %cst_85 = arith.constant dense<0.000000e+00> : vector<1xf32>
    %261 = vector.multi_reduction <add>, %260, %cst_85 [0] : vector<8x1xf32> to vector<1xf32>
    %262 = vector.shape_cast %261 : vector<1xf32> to vector<1x1xf32>
    %263 = arith.mulf %252, %111 : vector<8x4xf32>
    %cst_86 = arith.constant dense<0.000000e+00> : vector<8xf32>
    %264 = vector.multi_reduction <add>, %263, %cst_86 [1] : vector<8x4xf32> to vector<8xf32>
    %265 = vector.shape_cast %264 : vector<8xf32> to vector<8x1xf32>
    %cst_87 = arith.constant dense<0.000000e+00> : vector<1xf32>
    %266 = vector.multi_reduction <add>, %265, %cst_87 [0] : vector<8x1xf32> to vector<1xf32>
    %267 = vector.shape_cast %266 : vector<1xf32> to vector<1x1xf32>
    %268 = arith.mulf %252, %118 : vector<8x4xf32>
    %cst_88 = arith.constant dense<0.000000e+00> : vector<8xf32>
    %269 = vector.multi_reduction <add>, %268, %cst_88 [1] : vector<8x4xf32> to vector<8xf32>
    %270 = vector.shape_cast %269 : vector<8xf32> to vector<8x1xf32>
    %cst_89 = arith.constant dense<0.000000e+00> : vector<1xf32>
    %271 = vector.multi_reduction <add>, %270, %cst_89 [0] : vector<8x1xf32> to vector<1xf32>
    %272 = vector.shape_cast %271 : vector<1xf32> to vector<1x1xf32>
    %273 = arith.mulf %252, %130 : vector<8x4xf32>
    %cst_90 = arith.constant dense<0.000000e+00> : vector<8xf32>
    %274 = vector.multi_reduction <add>, %273, %cst_90 [1] : vector<8x4xf32> to vector<8xf32>
    %275 = vector.shape_cast %274 : vector<8xf32> to vector<8x1xf32>
    %cst_91 = arith.constant dense<0.000000e+00> : vector<1xf32>
    %276 = vector.multi_reduction <add>, %275, %cst_91 [0] : vector<8x1xf32> to vector<1xf32>
    %277 = vector.shape_cast %276 : vector<1xf32> to vector<1x1xf32>
    %278 = vector.broadcast %257 : vector<1x1xf32> to vector<8x4xf32>
    %279 = arith.maximumf %97, %278 : vector<8x4xf32>
    %280 = vector.broadcast %262 : vector<1x1xf32> to vector<8x4xf32>
    %281 = arith.maximumf %104, %280 : vector<8x4xf32>
    %282 = vector.broadcast %267 : vector<1x1xf32> to vector<8x4xf32>
    %283 = arith.minimumf %111, %282 : vector<8x4xf32>
    %284 = vector.broadcast %272 : vector<1x1xf32> to vector<8x4xf32>
    %285 = arith.minimumf %118, %284 : vector<8x4xf32>
    %286 = arith.subf %283, %279 : vector<8x4xf32>
    %cst_92 = arith.constant 0.000000e+00 : f32
    %287 = vector.broadcast %cst_92 : f32 to vector<8x4xf32>
    %288 = arith.maximumf %286, %287 : vector<8x4xf32>
    %289 = arith.subf %285, %281 : vector<8x4xf32>
    %cst_93 = arith.constant 0.000000e+00 : f32
    %290 = vector.broadcast %cst_93 : f32 to vector<8x4xf32>
    %291 = arith.maximumf %289, %290 : vector<8x4xf32>
    %292 = arith.mulf %288, %291 : vector<8x4xf32>
    %293 = arith.subf %267, %257 : vector<1x1xf32>
    %294 = arith.subf %272, %262 : vector<1x1xf32>
    %295 = arith.mulf %293, %294 : vector<1x1xf32>
    %296 = vector.broadcast %295 : vector<1x1xf32> to vector<8x4xf32>
    %297 = arith.addf %136, %296 : vector<8x4xf32>
    %298 = arith.subf %297, %292 : vector<8x4xf32>
    %cst_94 = arith.constant 0.000000e+00 : f32
    %299 = vector.broadcast %cst_94 : f32 to vector<8x4xf32>
    %300 = arith.cmpf ogt, %298, %299 : vector<8x4xf32>
    %301 = arith.divf %292, %298 : vector<8x4xf32>
    %cst_95 = arith.constant 0.000000e+00 : f32
    %302 = vector.broadcast %cst_95 : f32 to vector<8x4xf32>
    %303 = arith.select %300, %301, %302 : vector<8x4xi1>, vector<8x4xf32>
    %304 = vector.broadcast %277 : vector<1x1xf32> to vector<8x4xf32>
    %305 = arith.cmpf oeq, %130, %304 : vector<8x4xf32>
    %306 = vector.broadcast %238 : vector<1x1xi1> to vector<8x4xi1>
    %307 = arith.andi %306, %305 : vector<8x4xi1>
    %cst_96 = arith.constant 5.000000e-01 : f32
    %308 = vector.broadcast %cst_96 : f32 to vector<8x4xf32>
    %309 = arith.cmpf ogt, %303, %308 : vector<8x4xf32>
    %310 = arith.andi %307, %309 : vector<8x4xi1>
    %cst_97 = arith.constant dense<true> : vector<8x4xi1>
    %311 = arith.xori %310, %cst_97 : vector<8x4xi1>
    %312 = arith.andi %218, %311 : vector<8x4xi1>
    %313 = arith.extui %238 : vector<1x1xi1> to vector<1x1xi32>
    %314 = arith.sitofp %313 : vector<1x1xi32> to vector<1x1xf32>
    %315 = arith.mulf %257, %314 : vector<1x1xf32>
    %316 = arith.mulf %262, %314 : vector<1x1xf32>
    %317 = arith.mulf %267, %314 : vector<1x1xf32>
    %318 = arith.mulf %272, %314 : vector<1x1xf32>
    %cst_98 = arith.constant 0.000000e+00 : f32
    %319 = vector.broadcast %cst_98 : f32 to vector<1x1xf32>
    %320 = arith.maximumf %236, %319 : vector<1x1xf32>
    %321 = arith.mulf %320, %314 : vector<1x1xf32>
    %cst_99 = arith.constant 1.000000e+00 : f32
    %322 = vector.broadcast %cst_99 : f32 to vector<1x1xf32>
    %323 = arith.addf %277, %322 : vector<1x1xf32>
    %324 = arith.mulf %323, %314 : vector<1x1xf32>
    %cst_100 = arith.constant -1.000000e+00 : f32
    %325 = vector.broadcast %cst_100 : f32 to vector<8x4xf32>
    %326 = arith.select %312, %40, %325 : vector<8x4xi1>, vector<8x4xf32>
    %cst_101 = arith.constant dense<0xFF800000> : vector<8xf32>
    %327 = vector.multi_reduction <maximumf>, %326, %cst_101 [1] : vector<8x4xf32> to vector<8xf32>
    %328 = vector.shape_cast %327 : vector<8xf32> to vector<8x1xf32>
    %cst_102 = arith.constant dense<0xFF800000> : vector<1xf32>
    %329 = vector.multi_reduction <maximumf>, %328, %cst_102 [0] : vector<8x1xf32> to vector<1xf32>
    %330 = vector.shape_cast %329 : vector<1xf32> to vector<1x1xf32>
    %cst_103 = arith.constant 0.000000e+00 : f32
    %331 = vector.broadcast %cst_103 : f32 to vector<1x1xf32>
    %332 = arith.cmpf ogt, %330, %331 : vector<1x1xf32>
    %333 = vector.broadcast %330 : vector<1x1xf32> to vector<8x4xf32>
    %334 = arith.cmpf oge, %326, %333 : vector<8x4xf32>
    %335 = arith.andi %312, %334 : vector<8x4xi1>
    %cst_104 = arith.constant 1.000000e+09 : f32
    %336 = vector.broadcast %cst_104 : f32 to vector<8x4xf32>
    %337 = arith.select %335, %135, %336 : vector<8x4xi1>, vector<8x4xf32>
    %cst_105 = arith.constant dense<0x7F800000> : vector<8xf32>
    %338 = vector.multi_reduction <minimumf>, %337, %cst_105 [1] : vector<8x4xf32> to vector<8xf32>
    %339 = vector.shape_cast %338 : vector<8xf32> to vector<8x1xf32>
    %cst_106 = arith.constant dense<0x7F800000> : vector<1xf32>
    %340 = vector.multi_reduction <minimumf>, %339, %cst_106 [0] : vector<8x1xf32> to vector<1xf32>
    %341 = vector.shape_cast %340 : vector<1xf32> to vector<1x1xf32>
    %342 = vector.broadcast %341 : vector<1x1xf32> to vector<8x4xf32>
    %343 = arith.cmpf oeq, %135, %342 : vector<8x4xf32>
    %344 = arith.andi %335, %343 : vector<8x4xi1>
    %345 = arith.extui %344 : vector<8x4xi1> to vector<8x4xi32>
    %346 = arith.sitofp %345 : vector<8x4xi32> to vector<8x4xf32>
    %347 = arith.mulf %346, %97 : vector<8x4xf32>
    %cst_107 = arith.constant dense<0.000000e+00> : vector<8xf32>
    %348 = vector.multi_reduction <add>, %347, %cst_107 [1] : vector<8x4xf32> to vector<8xf32>
    %349 = vector.shape_cast %348 : vector<8xf32> to vector<8x1xf32>
    %cst_108 = arith.constant dense<0.000000e+00> : vector<1xf32>
    %350 = vector.multi_reduction <add>, %349, %cst_108 [0] : vector<8x1xf32> to vector<1xf32>
    %351 = vector.shape_cast %350 : vector<1xf32> to vector<1x1xf32>
    %352 = arith.mulf %346, %104 : vector<8x4xf32>
    %cst_109 = arith.constant dense<0.000000e+00> : vector<8xf32>
    %353 = vector.multi_reduction <add>, %352, %cst_109 [1] : vector<8x4xf32> to vector<8xf32>
    %354 = vector.shape_cast %353 : vector<8xf32> to vector<8x1xf32>
    %cst_110 = arith.constant dense<0.000000e+00> : vector<1xf32>
    %355 = vector.multi_reduction <add>, %354, %cst_110 [0] : vector<8x1xf32> to vector<1xf32>
    %356 = vector.shape_cast %355 : vector<1xf32> to vector<1x1xf32>
    %357 = arith.mulf %346, %111 : vector<8x4xf32>
    %cst_111 = arith.constant dense<0.000000e+00> : vector<8xf32>
    %358 = vector.multi_reduction <add>, %357, %cst_111 [1] : vector<8x4xf32> to vector<8xf32>
    %359 = vector.shape_cast %358 : vector<8xf32> to vector<8x1xf32>
    %cst_112 = arith.constant dense<0.000000e+00> : vector<1xf32>
    %360 = vector.multi_reduction <add>, %359, %cst_112 [0] : vector<8x1xf32> to vector<1xf32>
    %361 = vector.shape_cast %360 : vector<1xf32> to vector<1x1xf32>
    %362 = arith.mulf %346, %118 : vector<8x4xf32>
    %cst_113 = arith.constant dense<0.000000e+00> : vector<8xf32>
    %363 = vector.multi_reduction <add>, %362, %cst_113 [1] : vector<8x4xf32> to vector<8xf32>
    %364 = vector.shape_cast %363 : vector<8xf32> to vector<8x1xf32>
    %cst_114 = arith.constant dense<0.000000e+00> : vector<1xf32>
    %365 = vector.multi_reduction <add>, %364, %cst_114 [0] : vector<8x1xf32> to vector<1xf32>
    %366 = vector.shape_cast %365 : vector<1xf32> to vector<1x1xf32>
    %367 = arith.mulf %346, %130 : vector<8x4xf32>
    %cst_115 = arith.constant dense<0.000000e+00> : vector<8xf32>
    %368 = vector.multi_reduction <add>, %367, %cst_115 [1] : vector<8x4xf32> to vector<8xf32>
    %369 = vector.shape_cast %368 : vector<8xf32> to vector<8x1xf32>
    %cst_116 = arith.constant dense<0.000000e+00> : vector<1xf32>
    %370 = vector.multi_reduction <add>, %369, %cst_116 [0] : vector<8x1xf32> to vector<1xf32>
    %371 = vector.shape_cast %370 : vector<1xf32> to vector<1x1xf32>
    %372 = vector.broadcast %351 : vector<1x1xf32> to vector<8x4xf32>
    %373 = arith.maximumf %97, %372 : vector<8x4xf32>
    %374 = vector.broadcast %356 : vector<1x1xf32> to vector<8x4xf32>
    %375 = arith.maximumf %104, %374 : vector<8x4xf32>
    %376 = vector.broadcast %361 : vector<1x1xf32> to vector<8x4xf32>
    %377 = arith.minimumf %111, %376 : vector<8x4xf32>
    %378 = vector.broadcast %366 : vector<1x1xf32> to vector<8x4xf32>
    %379 = arith.minimumf %118, %378 : vector<8x4xf32>
    %380 = arith.subf %377, %373 : vector<8x4xf32>
    %cst_117 = arith.constant 0.000000e+00 : f32
    %381 = vector.broadcast %cst_117 : f32 to vector<8x4xf32>
    %382 = arith.maximumf %380, %381 : vector<8x4xf32>
    %383 = arith.subf %379, %375 : vector<8x4xf32>
    %cst_118 = arith.constant 0.000000e+00 : f32
    %384 = vector.broadcast %cst_118 : f32 to vector<8x4xf32>
    %385 = arith.maximumf %383, %384 : vector<8x4xf32>
    %386 = arith.mulf %382, %385 : vector<8x4xf32>
    %387 = arith.subf %361, %351 : vector<1x1xf32>
    %388 = arith.subf %366, %356 : vector<1x1xf32>
    %389 = arith.mulf %387, %388 : vector<1x1xf32>
    %390 = vector.broadcast %389 : vector<1x1xf32> to vector<8x4xf32>
    %391 = arith.addf %136, %390 : vector<8x4xf32>
    %392 = arith.subf %391, %386 : vector<8x4xf32>
    %cst_119 = arith.constant 0.000000e+00 : f32
    %393 = vector.broadcast %cst_119 : f32 to vector<8x4xf32>
    %394 = arith.cmpf ogt, %392, %393 : vector<8x4xf32>
    %395 = arith.divf %386, %392 : vector<8x4xf32>
    %cst_120 = arith.constant 0.000000e+00 : f32
    %396 = vector.broadcast %cst_120 : f32 to vector<8x4xf32>
    %397 = arith.select %394, %395, %396 : vector<8x4xi1>, vector<8x4xf32>
    %398 = vector.broadcast %371 : vector<1x1xf32> to vector<8x4xf32>
    %399 = arith.cmpf oeq, %130, %398 : vector<8x4xf32>
    %400 = vector.broadcast %332 : vector<1x1xi1> to vector<8x4xi1>
    %401 = arith.andi %400, %399 : vector<8x4xi1>
    %cst_121 = arith.constant 5.000000e-01 : f32
    %402 = vector.broadcast %cst_121 : f32 to vector<8x4xf32>
    %403 = arith.cmpf ogt, %397, %402 : vector<8x4xf32>
    %404 = arith.andi %401, %403 : vector<8x4xi1>
    %cst_122 = arith.constant dense<true> : vector<8x4xi1>
    %405 = arith.xori %404, %cst_122 : vector<8x4xi1>
    %406 = arith.andi %312, %405 : vector<8x4xi1>
    %407 = arith.extui %332 : vector<1x1xi1> to vector<1x1xi32>
    %408 = arith.sitofp %407 : vector<1x1xi32> to vector<1x1xf32>
    %409 = arith.mulf %351, %408 : vector<1x1xf32>
    %410 = arith.mulf %356, %408 : vector<1x1xf32>
    %411 = arith.mulf %361, %408 : vector<1x1xf32>
    %412 = arith.mulf %366, %408 : vector<1x1xf32>
    %cst_123 = arith.constant 0.000000e+00 : f32
    %413 = vector.broadcast %cst_123 : f32 to vector<1x1xf32>
    %414 = arith.maximumf %330, %413 : vector<1x1xf32>
    %415 = arith.mulf %414, %408 : vector<1x1xf32>
    %cst_124 = arith.constant 1.000000e+00 : f32
    %416 = vector.broadcast %cst_124 : f32 to vector<1x1xf32>
    %417 = arith.addf %371, %416 : vector<1x1xf32>
    %418 = arith.mulf %417, %408 : vector<1x1xf32>
    %cst_125 = arith.constant -1.000000e+00 : f32
    %419 = vector.broadcast %cst_125 : f32 to vector<8x4xf32>
    %420 = arith.select %406, %40, %419 : vector<8x4xi1>, vector<8x4xf32>
    %cst_126 = arith.constant dense<0xFF800000> : vector<8xf32>
    %421 = vector.multi_reduction <maximumf>, %420, %cst_126 [1] : vector<8x4xf32> to vector<8xf32>
    %422 = vector.shape_cast %421 : vector<8xf32> to vector<8x1xf32>
    %cst_127 = arith.constant dense<0xFF800000> : vector<1xf32>
    %423 = vector.multi_reduction <maximumf>, %422, %cst_127 [0] : vector<8x1xf32> to vector<1xf32>
    %424 = vector.shape_cast %423 : vector<1xf32> to vector<1x1xf32>
    %cst_128 = arith.constant 0.000000e+00 : f32
    %425 = vector.broadcast %cst_128 : f32 to vector<1x1xf32>
    %426 = arith.cmpf ogt, %424, %425 : vector<1x1xf32>
    %427 = vector.broadcast %424 : vector<1x1xf32> to vector<8x4xf32>
    %428 = arith.cmpf oge, %420, %427 : vector<8x4xf32>
    %429 = arith.andi %406, %428 : vector<8x4xi1>
    %cst_129 = arith.constant 1.000000e+09 : f32
    %430 = vector.broadcast %cst_129 : f32 to vector<8x4xf32>
    %431 = arith.select %429, %135, %430 : vector<8x4xi1>, vector<8x4xf32>
    %cst_130 = arith.constant dense<0x7F800000> : vector<8xf32>
    %432 = vector.multi_reduction <minimumf>, %431, %cst_130 [1] : vector<8x4xf32> to vector<8xf32>
    %433 = vector.shape_cast %432 : vector<8xf32> to vector<8x1xf32>
    %cst_131 = arith.constant dense<0x7F800000> : vector<1xf32>
    %434 = vector.multi_reduction <minimumf>, %433, %cst_131 [0] : vector<8x1xf32> to vector<1xf32>
    %435 = vector.shape_cast %434 : vector<1xf32> to vector<1x1xf32>
    %436 = vector.broadcast %435 : vector<1x1xf32> to vector<8x4xf32>
    %437 = arith.cmpf oeq, %135, %436 : vector<8x4xf32>
    %438 = arith.andi %429, %437 : vector<8x4xi1>
    %439 = arith.extui %438 : vector<8x4xi1> to vector<8x4xi32>
    %440 = arith.sitofp %439 : vector<8x4xi32> to vector<8x4xf32>
    %441 = arith.mulf %440, %97 : vector<8x4xf32>
    %cst_132 = arith.constant dense<0.000000e+00> : vector<8xf32>
    %442 = vector.multi_reduction <add>, %441, %cst_132 [1] : vector<8x4xf32> to vector<8xf32>
    %443 = vector.shape_cast %442 : vector<8xf32> to vector<8x1xf32>
    %cst_133 = arith.constant dense<0.000000e+00> : vector<1xf32>
    %444 = vector.multi_reduction <add>, %443, %cst_133 [0] : vector<8x1xf32> to vector<1xf32>
    %445 = vector.shape_cast %444 : vector<1xf32> to vector<1x1xf32>
    %446 = arith.mulf %440, %104 : vector<8x4xf32>
    %cst_134 = arith.constant dense<0.000000e+00> : vector<8xf32>
    %447 = vector.multi_reduction <add>, %446, %cst_134 [1] : vector<8x4xf32> to vector<8xf32>
    %448 = vector.shape_cast %447 : vector<8xf32> to vector<8x1xf32>
    %cst_135 = arith.constant dense<0.000000e+00> : vector<1xf32>
    %449 = vector.multi_reduction <add>, %448, %cst_135 [0] : vector<8x1xf32> to vector<1xf32>
    %450 = vector.shape_cast %449 : vector<1xf32> to vector<1x1xf32>
    %451 = arith.mulf %440, %111 : vector<8x4xf32>
    %cst_136 = arith.constant dense<0.000000e+00> : vector<8xf32>
    %452 = vector.multi_reduction <add>, %451, %cst_136 [1] : vector<8x4xf32> to vector<8xf32>
    %453 = vector.shape_cast %452 : vector<8xf32> to vector<8x1xf32>
    %cst_137 = arith.constant dense<0.000000e+00> : vector<1xf32>
    %454 = vector.multi_reduction <add>, %453, %cst_137 [0] : vector<8x1xf32> to vector<1xf32>
    %455 = vector.shape_cast %454 : vector<1xf32> to vector<1x1xf32>
    %456 = arith.mulf %440, %118 : vector<8x4xf32>
    %cst_138 = arith.constant dense<0.000000e+00> : vector<8xf32>
    %457 = vector.multi_reduction <add>, %456, %cst_138 [1] : vector<8x4xf32> to vector<8xf32>
    %458 = vector.shape_cast %457 : vector<8xf32> to vector<8x1xf32>
    %cst_139 = arith.constant dense<0.000000e+00> : vector<1xf32>
    %459 = vector.multi_reduction <add>, %458, %cst_139 [0] : vector<8x1xf32> to vector<1xf32>
    %460 = vector.shape_cast %459 : vector<1xf32> to vector<1x1xf32>
    %461 = arith.mulf %440, %130 : vector<8x4xf32>
    %cst_140 = arith.constant dense<0.000000e+00> : vector<8xf32>
    %462 = vector.multi_reduction <add>, %461, %cst_140 [1] : vector<8x4xf32> to vector<8xf32>
    %463 = vector.shape_cast %462 : vector<8xf32> to vector<8x1xf32>
    %cst_141 = arith.constant dense<0.000000e+00> : vector<1xf32>
    %464 = vector.multi_reduction <add>, %463, %cst_141 [0] : vector<8x1xf32> to vector<1xf32>
    %465 = vector.shape_cast %464 : vector<1xf32> to vector<1x1xf32>
    %466 = arith.extui %426 : vector<1x1xi1> to vector<1x1xi32>
    %467 = arith.sitofp %466 : vector<1x1xi32> to vector<1x1xf32>
    %468 = arith.mulf %445, %467 : vector<1x1xf32>
    %469 = arith.mulf %450, %467 : vector<1x1xf32>
    %470 = arith.mulf %455, %467 : vector<1x1xf32>
    %471 = arith.mulf %460, %467 : vector<1x1xf32>
    %cst_142 = arith.constant 0.000000e+00 : f32
    %472 = vector.broadcast %cst_142 : f32 to vector<1x1xf32>
    %473 = arith.maximumf %424, %472 : vector<1x1xf32>
    %474 = arith.mulf %473, %467 : vector<1x1xf32>
    %cst_143 = arith.constant 1.000000e+00 : f32
    %475 = vector.broadcast %cst_143 : f32 to vector<1x1xf32>
    %476 = arith.addf %465, %475 : vector<1x1xf32>
    %477 = arith.mulf %476, %467 : vector<1x1xf32>
    %478 = tpu.iota {dimensions = array<i32: 1>} : vector<1x128xi32>
    %479 = tpu.iota {dimensions = array<i32: 0>} : vector<8x1xi32>
    %cst_144 = arith.constant 0.000000e+00 : f32
    %480 = vector.broadcast %cst_144 : f32 to vector<8x128xf32>
    %cst_145 = arith.constant 0.000000e+00 : f32
    %481 = vector.broadcast %cst_145 : f32 to vector<1x128xf32>
    %c0_i32 = arith.constant 0 : i32
    %482 = vector.broadcast %c0_i32 : i32 to vector<1x128xi32>
    %483 = arith.cmpi eq, %478, %482 : vector<1x128xi32>
    %484 = arith.extui %483 : vector<1x128xi1> to vector<1x128xi32>
    %485 = arith.sitofp %484 : vector<1x128xi32> to vector<1x128xf32>
    %486 = vector.broadcast %221 : vector<1x1xf32> to vector<1x128xf32>
    %487 = arith.mulf %485, %486 : vector<1x128xf32>
    %488 = arith.addf %481, %487 : vector<1x128xf32>
    %c1_i32 = arith.constant 1 : i32
    %489 = vector.broadcast %c1_i32 : i32 to vector<1x128xi32>
    %490 = arith.cmpi eq, %478, %489 : vector<1x128xi32>
    %491 = arith.extui %490 : vector<1x128xi1> to vector<1x128xi32>
    %492 = arith.sitofp %491 : vector<1x128xi32> to vector<1x128xf32>
    %493 = vector.broadcast %222 : vector<1x1xf32> to vector<1x128xf32>
    %494 = arith.mulf %492, %493 : vector<1x128xf32>
    %495 = arith.addf %488, %494 : vector<1x128xf32>
    %c2_i32 = arith.constant 2 : i32
    %496 = vector.broadcast %c2_i32 : i32 to vector<1x128xi32>
    %497 = arith.cmpi eq, %478, %496 : vector<1x128xi32>
    %498 = arith.extui %497 : vector<1x128xi1> to vector<1x128xi32>
    %499 = arith.sitofp %498 : vector<1x128xi32> to vector<1x128xf32>
    %500 = vector.broadcast %223 : vector<1x1xf32> to vector<1x128xf32>
    %501 = arith.mulf %499, %500 : vector<1x128xf32>
    %502 = arith.addf %495, %501 : vector<1x128xf32>
    %c3_i32 = arith.constant 3 : i32
    %503 = vector.broadcast %c3_i32 : i32 to vector<1x128xi32>
    %504 = arith.cmpi eq, %478, %503 : vector<1x128xi32>
    %505 = arith.extui %504 : vector<1x128xi1> to vector<1x128xi32>
    %506 = arith.sitofp %505 : vector<1x128xi32> to vector<1x128xf32>
    %507 = vector.broadcast %224 : vector<1x1xf32> to vector<1x128xf32>
    %508 = arith.mulf %506, %507 : vector<1x128xf32>
    %509 = arith.addf %502, %508 : vector<1x128xf32>
    %c4_i32 = arith.constant 4 : i32
    %510 = vector.broadcast %c4_i32 : i32 to vector<1x128xi32>
    %511 = arith.cmpi eq, %478, %510 : vector<1x128xi32>
    %512 = arith.extui %511 : vector<1x128xi1> to vector<1x128xi32>
    %513 = arith.sitofp %512 : vector<1x128xi32> to vector<1x128xf32>
    %514 = vector.broadcast %227 : vector<1x1xf32> to vector<1x128xf32>
    %515 = arith.mulf %513, %514 : vector<1x128xf32>
    %516 = arith.addf %509, %515 : vector<1x128xf32>
    %c5_i32 = arith.constant 5 : i32
    %517 = vector.broadcast %c5_i32 : i32 to vector<1x128xi32>
    %518 = arith.cmpi eq, %478, %517 : vector<1x128xi32>
    %519 = arith.extui %518 : vector<1x128xi1> to vector<1x128xi32>
    %520 = arith.sitofp %519 : vector<1x128xi32> to vector<1x128xf32>
    %521 = vector.broadcast %230 : vector<1x1xf32> to vector<1x128xf32>
    %522 = arith.mulf %520, %521 : vector<1x128xf32>
    %523 = arith.addf %516, %522 : vector<1x128xf32>
    %c6_i32 = arith.constant 6 : i32
    %524 = vector.broadcast %c6_i32 : i32 to vector<1x128xi32>
    %525 = arith.cmpi eq, %478, %524 : vector<1x128xi32>
    %526 = arith.extui %525 : vector<1x128xi1> to vector<1x128xi32>
    %527 = arith.sitofp %526 : vector<1x128xi32> to vector<1x128xf32>
    %528 = vector.broadcast %220 : vector<1x1xf32> to vector<1x128xf32>
    %529 = arith.mulf %527, %528 : vector<1x128xf32>
    %530 = arith.addf %523, %529 : vector<1x128xf32>
    %c0_i32_146 = arith.constant 0 : i32
    %531 = vector.broadcast %c0_i32_146 : i32 to vector<8x1xi32>
    %532 = arith.cmpi eq, %479, %531 : vector<8x1xi32>
    %533 = arith.extui %532 : vector<8x1xi1> to vector<8x1xi32>
    %534 = arith.sitofp %533 : vector<8x1xi32> to vector<8x1xf32>
    %535 = vector.broadcast %534 : vector<8x1xf32> to vector<8x128xf32>
    %536 = vector.broadcast %530 : vector<1x128xf32> to vector<8x128xf32>
    %537 = arith.mulf %535, %536 : vector<8x128xf32>
    %538 = arith.addf %480, %537 : vector<8x128xf32>
    %cst_147 = arith.constant 0.000000e+00 : f32
    %539 = vector.broadcast %cst_147 : f32 to vector<1x128xf32>
    %c0_i32_148 = arith.constant 0 : i32
    %540 = vector.broadcast %c0_i32_148 : i32 to vector<1x128xi32>
    %541 = arith.cmpi eq, %478, %540 : vector<1x128xi32>
    %542 = arith.extui %541 : vector<1x128xi1> to vector<1x128xi32>
    %543 = arith.sitofp %542 : vector<1x128xi32> to vector<1x128xf32>
    %544 = vector.broadcast %315 : vector<1x1xf32> to vector<1x128xf32>
    %545 = arith.mulf %543, %544 : vector<1x128xf32>
    %546 = arith.addf %539, %545 : vector<1x128xf32>
    %c1_i32_149 = arith.constant 1 : i32
    %547 = vector.broadcast %c1_i32_149 : i32 to vector<1x128xi32>
    %548 = arith.cmpi eq, %478, %547 : vector<1x128xi32>
    %549 = arith.extui %548 : vector<1x128xi1> to vector<1x128xi32>
    %550 = arith.sitofp %549 : vector<1x128xi32> to vector<1x128xf32>
    %551 = vector.broadcast %316 : vector<1x1xf32> to vector<1x128xf32>
    %552 = arith.mulf %550, %551 : vector<1x128xf32>
    %553 = arith.addf %546, %552 : vector<1x128xf32>
    %c2_i32_150 = arith.constant 2 : i32
    %554 = vector.broadcast %c2_i32_150 : i32 to vector<1x128xi32>
    %555 = arith.cmpi eq, %478, %554 : vector<1x128xi32>
    %556 = arith.extui %555 : vector<1x128xi1> to vector<1x128xi32>
    %557 = arith.sitofp %556 : vector<1x128xi32> to vector<1x128xf32>
    %558 = vector.broadcast %317 : vector<1x1xf32> to vector<1x128xf32>
    %559 = arith.mulf %557, %558 : vector<1x128xf32>
    %560 = arith.addf %553, %559 : vector<1x128xf32>
    %c3_i32_151 = arith.constant 3 : i32
    %561 = vector.broadcast %c3_i32_151 : i32 to vector<1x128xi32>
    %562 = arith.cmpi eq, %478, %561 : vector<1x128xi32>
    %563 = arith.extui %562 : vector<1x128xi1> to vector<1x128xi32>
    %564 = arith.sitofp %563 : vector<1x128xi32> to vector<1x128xf32>
    %565 = vector.broadcast %318 : vector<1x1xf32> to vector<1x128xf32>
    %566 = arith.mulf %564, %565 : vector<1x128xf32>
    %567 = arith.addf %560, %566 : vector<1x128xf32>
    %c4_i32_152 = arith.constant 4 : i32
    %568 = vector.broadcast %c4_i32_152 : i32 to vector<1x128xi32>
    %569 = arith.cmpi eq, %478, %568 : vector<1x128xi32>
    %570 = arith.extui %569 : vector<1x128xi1> to vector<1x128xi32>
    %571 = arith.sitofp %570 : vector<1x128xi32> to vector<1x128xf32>
    %572 = vector.broadcast %321 : vector<1x1xf32> to vector<1x128xf32>
    %573 = arith.mulf %571, %572 : vector<1x128xf32>
    %574 = arith.addf %567, %573 : vector<1x128xf32>
    %c5_i32_153 = arith.constant 5 : i32
    %575 = vector.broadcast %c5_i32_153 : i32 to vector<1x128xi32>
    %576 = arith.cmpi eq, %478, %575 : vector<1x128xi32>
    %577 = arith.extui %576 : vector<1x128xi1> to vector<1x128xi32>
    %578 = arith.sitofp %577 : vector<1x128xi32> to vector<1x128xf32>
    %579 = vector.broadcast %324 : vector<1x1xf32> to vector<1x128xf32>
    %580 = arith.mulf %578, %579 : vector<1x128xf32>
    %581 = arith.addf %574, %580 : vector<1x128xf32>
    %c6_i32_154 = arith.constant 6 : i32
    %582 = vector.broadcast %c6_i32_154 : i32 to vector<1x128xi32>
    %583 = arith.cmpi eq, %478, %582 : vector<1x128xi32>
    %584 = arith.extui %583 : vector<1x128xi1> to vector<1x128xi32>
    %585 = arith.sitofp %584 : vector<1x128xi32> to vector<1x128xf32>
    %586 = vector.broadcast %314 : vector<1x1xf32> to vector<1x128xf32>
    %587 = arith.mulf %585, %586 : vector<1x128xf32>
    %588 = arith.addf %581, %587 : vector<1x128xf32>
    %c1_i32_155 = arith.constant 1 : i32
    %589 = vector.broadcast %c1_i32_155 : i32 to vector<8x1xi32>
    %590 = arith.cmpi eq, %479, %589 : vector<8x1xi32>
    %591 = arith.extui %590 : vector<8x1xi1> to vector<8x1xi32>
    %592 = arith.sitofp %591 : vector<8x1xi32> to vector<8x1xf32>
    %593 = vector.broadcast %592 : vector<8x1xf32> to vector<8x128xf32>
    %594 = vector.broadcast %588 : vector<1x128xf32> to vector<8x128xf32>
    %595 = arith.mulf %593, %594 : vector<8x128xf32>
    %596 = arith.addf %538, %595 : vector<8x128xf32>
    %cst_156 = arith.constant 0.000000e+00 : f32
    %597 = vector.broadcast %cst_156 : f32 to vector<1x128xf32>
    %c0_i32_157 = arith.constant 0 : i32
    %598 = vector.broadcast %c0_i32_157 : i32 to vector<1x128xi32>
    %599 = arith.cmpi eq, %478, %598 : vector<1x128xi32>
    %600 = arith.extui %599 : vector<1x128xi1> to vector<1x128xi32>
    %601 = arith.sitofp %600 : vector<1x128xi32> to vector<1x128xf32>
    %602 = vector.broadcast %409 : vector<1x1xf32> to vector<1x128xf32>
    %603 = arith.mulf %601, %602 : vector<1x128xf32>
    %604 = arith.addf %597, %603 : vector<1x128xf32>
    %c1_i32_158 = arith.constant 1 : i32
    %605 = vector.broadcast %c1_i32_158 : i32 to vector<1x128xi32>
    %606 = arith.cmpi eq, %478, %605 : vector<1x128xi32>
    %607 = arith.extui %606 : vector<1x128xi1> to vector<1x128xi32>
    %608 = arith.sitofp %607 : vector<1x128xi32> to vector<1x128xf32>
    %609 = vector.broadcast %410 : vector<1x1xf32> to vector<1x128xf32>
    %610 = arith.mulf %608, %609 : vector<1x128xf32>
    %611 = arith.addf %604, %610 : vector<1x128xf32>
    %c2_i32_159 = arith.constant 2 : i32
    %612 = vector.broadcast %c2_i32_159 : i32 to vector<1x128xi32>
    %613 = arith.cmpi eq, %478, %612 : vector<1x128xi32>
    %614 = arith.extui %613 : vector<1x128xi1> to vector<1x128xi32>
    %615 = arith.sitofp %614 : vector<1x128xi32> to vector<1x128xf32>
    %616 = vector.broadcast %411 : vector<1x1xf32> to vector<1x128xf32>
    %617 = arith.mulf %615, %616 : vector<1x128xf32>
    %618 = arith.addf %611, %617 : vector<1x128xf32>
    %c3_i32_160 = arith.constant 3 : i32
    %619 = vector.broadcast %c3_i32_160 : i32 to vector<1x128xi32>
    %620 = arith.cmpi eq, %478, %619 : vector<1x128xi32>
    %621 = arith.extui %620 : vector<1x128xi1> to vector<1x128xi32>
    %622 = arith.sitofp %621 : vector<1x128xi32> to vector<1x128xf32>
    %623 = vector.broadcast %412 : vector<1x1xf32> to vector<1x128xf32>
    %624 = arith.mulf %622, %623 : vector<1x128xf32>
    %625 = arith.addf %618, %624 : vector<1x128xf32>
    %c4_i32_161 = arith.constant 4 : i32
    %626 = vector.broadcast %c4_i32_161 : i32 to vector<1x128xi32>
    %627 = arith.cmpi eq, %478, %626 : vector<1x128xi32>
    %628 = arith.extui %627 : vector<1x128xi1> to vector<1x128xi32>
    %629 = arith.sitofp %628 : vector<1x128xi32> to vector<1x128xf32>
    %630 = vector.broadcast %415 : vector<1x1xf32> to vector<1x128xf32>
    %631 = arith.mulf %629, %630 : vector<1x128xf32>
    %632 = arith.addf %625, %631 : vector<1x128xf32>
    %c5_i32_162 = arith.constant 5 : i32
    %633 = vector.broadcast %c5_i32_162 : i32 to vector<1x128xi32>
    %634 = arith.cmpi eq, %478, %633 : vector<1x128xi32>
    %635 = arith.extui %634 : vector<1x128xi1> to vector<1x128xi32>
    %636 = arith.sitofp %635 : vector<1x128xi32> to vector<1x128xf32>
    %637 = vector.broadcast %418 : vector<1x1xf32> to vector<1x128xf32>
    %638 = arith.mulf %636, %637 : vector<1x128xf32>
    %639 = arith.addf %632, %638 : vector<1x128xf32>
    %c6_i32_163 = arith.constant 6 : i32
    %640 = vector.broadcast %c6_i32_163 : i32 to vector<1x128xi32>
    %641 = arith.cmpi eq, %478, %640 : vector<1x128xi32>
    %642 = arith.extui %641 : vector<1x128xi1> to vector<1x128xi32>
    %643 = arith.sitofp %642 : vector<1x128xi32> to vector<1x128xf32>
    %644 = vector.broadcast %408 : vector<1x1xf32> to vector<1x128xf32>
    %645 = arith.mulf %643, %644 : vector<1x128xf32>
    %646 = arith.addf %639, %645 : vector<1x128xf32>
    %c2_i32_164 = arith.constant 2 : i32
    %647 = vector.broadcast %c2_i32_164 : i32 to vector<8x1xi32>
    %648 = arith.cmpi eq, %479, %647 : vector<8x1xi32>
    %649 = arith.extui %648 : vector<8x1xi1> to vector<8x1xi32>
    %650 = arith.sitofp %649 : vector<8x1xi32> to vector<8x1xf32>
    %651 = vector.broadcast %650 : vector<8x1xf32> to vector<8x128xf32>
    %652 = vector.broadcast %646 : vector<1x128xf32> to vector<8x128xf32>
    %653 = arith.mulf %651, %652 : vector<8x128xf32>
    %654 = arith.addf %596, %653 : vector<8x128xf32>
    %cst_165 = arith.constant 0.000000e+00 : f32
    %655 = vector.broadcast %cst_165 : f32 to vector<1x128xf32>
    %c0_i32_166 = arith.constant 0 : i32
    %656 = vector.broadcast %c0_i32_166 : i32 to vector<1x128xi32>
    %657 = arith.cmpi eq, %478, %656 : vector<1x128xi32>
    %658 = arith.extui %657 : vector<1x128xi1> to vector<1x128xi32>
    %659 = arith.sitofp %658 : vector<1x128xi32> to vector<1x128xf32>
    %660 = vector.broadcast %468 : vector<1x1xf32> to vector<1x128xf32>
    %661 = arith.mulf %659, %660 : vector<1x128xf32>
    %662 = arith.addf %655, %661 : vector<1x128xf32>
    %c1_i32_167 = arith.constant 1 : i32
    %663 = vector.broadcast %c1_i32_167 : i32 to vector<1x128xi32>
    %664 = arith.cmpi eq, %478, %663 : vector<1x128xi32>
    %665 = arith.extui %664 : vector<1x128xi1> to vector<1x128xi32>
    %666 = arith.sitofp %665 : vector<1x128xi32> to vector<1x128xf32>
    %667 = vector.broadcast %469 : vector<1x1xf32> to vector<1x128xf32>
    %668 = arith.mulf %666, %667 : vector<1x128xf32>
    %669 = arith.addf %662, %668 : vector<1x128xf32>
    %c2_i32_168 = arith.constant 2 : i32
    %670 = vector.broadcast %c2_i32_168 : i32 to vector<1x128xi32>
    %671 = arith.cmpi eq, %478, %670 : vector<1x128xi32>
    %672 = arith.extui %671 : vector<1x128xi1> to vector<1x128xi32>
    %673 = arith.sitofp %672 : vector<1x128xi32> to vector<1x128xf32>
    %674 = vector.broadcast %470 : vector<1x1xf32> to vector<1x128xf32>
    %675 = arith.mulf %673, %674 : vector<1x128xf32>
    %676 = arith.addf %669, %675 : vector<1x128xf32>
    %c3_i32_169 = arith.constant 3 : i32
    %677 = vector.broadcast %c3_i32_169 : i32 to vector<1x128xi32>
    %678 = arith.cmpi eq, %478, %677 : vector<1x128xi32>
    %679 = arith.extui %678 : vector<1x128xi1> to vector<1x128xi32>
    %680 = arith.sitofp %679 : vector<1x128xi32> to vector<1x128xf32>
    %681 = vector.broadcast %471 : vector<1x1xf32> to vector<1x128xf32>
    %682 = arith.mulf %680, %681 : vector<1x128xf32>
    %683 = arith.addf %676, %682 : vector<1x128xf32>
    %c4_i32_170 = arith.constant 4 : i32
    %684 = vector.broadcast %c4_i32_170 : i32 to vector<1x128xi32>
    %685 = arith.cmpi eq, %478, %684 : vector<1x128xi32>
    %686 = arith.extui %685 : vector<1x128xi1> to vector<1x128xi32>
    %687 = arith.sitofp %686 : vector<1x128xi32> to vector<1x128xf32>
    %688 = vector.broadcast %474 : vector<1x1xf32> to vector<1x128xf32>
    %689 = arith.mulf %687, %688 : vector<1x128xf32>
    %690 = arith.addf %683, %689 : vector<1x128xf32>
    %c5_i32_171 = arith.constant 5 : i32
    %691 = vector.broadcast %c5_i32_171 : i32 to vector<1x128xi32>
    %692 = arith.cmpi eq, %478, %691 : vector<1x128xi32>
    %693 = arith.extui %692 : vector<1x128xi1> to vector<1x128xi32>
    %694 = arith.sitofp %693 : vector<1x128xi32> to vector<1x128xf32>
    %695 = vector.broadcast %477 : vector<1x1xf32> to vector<1x128xf32>
    %696 = arith.mulf %694, %695 : vector<1x128xf32>
    %697 = arith.addf %690, %696 : vector<1x128xf32>
    %c6_i32_172 = arith.constant 6 : i32
    %698 = vector.broadcast %c6_i32_172 : i32 to vector<1x128xi32>
    %699 = arith.cmpi eq, %478, %698 : vector<1x128xi32>
    %700 = arith.extui %699 : vector<1x128xi1> to vector<1x128xi32>
    %701 = arith.sitofp %700 : vector<1x128xi32> to vector<1x128xf32>
    %702 = vector.broadcast %467 : vector<1x1xf32> to vector<1x128xf32>
    %703 = arith.mulf %701, %702 : vector<1x128xf32>
    %704 = arith.addf %697, %703 : vector<1x128xf32>
    %c3_i32_173 = arith.constant 3 : i32
    %705 = vector.broadcast %c3_i32_173 : i32 to vector<8x1xi32>
    %706 = arith.cmpi eq, %479, %705 : vector<8x1xi32>
    %707 = arith.extui %706 : vector<8x1xi1> to vector<8x1xi32>
    %708 = arith.sitofp %707 : vector<8x1xi32> to vector<8x1xf32>
    %709 = vector.broadcast %708 : vector<8x1xf32> to vector<8x128xf32>
    %710 = vector.broadcast %704 : vector<1x128xf32> to vector<8x128xf32>
    %711 = arith.mulf %709, %710 : vector<8x128xf32>
    %712 = arith.addf %654, %711 : vector<8x128xf32>
    %c0_174 = arith.constant 0 : index
    %c0_175 = arith.constant 0 : index
    %c0_176 = arith.constant 0 : index
    %713 = vector.load %arg11[%c0_174, %c0_175, %c0_176] : memref<1x8x128xf32, #tpu.memory_space<vmem>>, vector<1x8x128xf32>
    %714 = vector.shape_cast %713 : vector<1x8x128xf32> to vector<8x128xf32>
    %715 = vector.shape_cast %712 : vector<8x128xf32> to vector<1x8x128xf32>
    tpu.vector_store %arg11[%c0_174, %c0_175, %c0_176], %715 {strides = array<i32>} : memref<1x8x128xf32, #tpu.memory_space<vmem>>, vector<1x8x128xf32>,
    return
  }
  func.func @transform_0(%arg0: i32) -> (i32, i32, i32) {
    %c0_i32 = arith.constant 0 : i32
    %c0_i32_0 = arith.constant 0 : i32
    %c0_i32_1 = arith.constant 0 : i32
    return %arg0, %c0_i32, %c0_i32_0 : i32, i32, i32
  }
  func.func @transform_1(%arg0: i32) -> (i32, i32, i32) {
    %c0_i32 = arith.constant 0 : i32
    %c0_i32_0 = arith.constant 0 : i32
    %c0_i32_1 = arith.constant 0 : i32
    return %arg0, %c0_i32, %c0_i32_0 : i32, i32, i32
  }
  func.func @transform_2(%arg0: i32) -> (i32, i32, i32) {
    %c0_i32 = arith.constant 0 : i32
    %c0_i32_0 = arith.constant 0 : i32
    %c0_i32_1 = arith.constant 0 : i32
    %c0_i32_2 = arith.constant 0 : i32
    return %c0_i32, %c0_i32_0, %c0_i32_1 : i32, i32, i32
  }
  func.func @transform_3(%arg0: i32) -> (i32, i32) {
    %c0_i32 = arith.constant 0 : i32
    %c0_i32_0 = arith.constant 0 : i32
    %c0_i32_1 = arith.constant 0 : i32
    return %c0_i32, %c0_i32_0 : i32, i32
  }
  func.func @transform_4(%arg0: i32) -> (i32, i32) {
    %c0_i32 = arith.constant 0 : i32
    %c0_i32_0 = arith.constant 0 : i32
    %c0_i32_1 = arith.constant 0 : i32
    return %c0_i32, %c0_i32_0 : i32, i32
  }
  func.func @transform_5(%arg0: i32) -> (i32, i32) {
    %c0_i32 = arith.constant 0 : i32
    %c0_i32_0 = arith.constant 0 : i32
    %c0_i32_1 = arith.constant 0 : i32
    return %c0_i32, %c0_i32_0 : i32, i32
  }
  func.func @transform_6(%arg0: i32) -> (i32, i32) {
    %c0_i32 = arith.constant 0 : i32
    %c0_i32_0 = arith.constant 0 : i32
    %c0_i32_1 = arith.constant 0 : i32
    return %c0_i32, %c0_i32_0 : i32, i32
  }
  func.func @transform_7(%arg0: i32) -> (i32, i32) {
    %c0_i32 = arith.constant 0 : i32
    %c0_i32_0 = arith.constant 0 : i32
    %c0_i32_1 = arith.constant 0 : i32
    return %c0_i32, %c0_i32_0 : i32, i32
  }
  func.func @transform_8(%arg0: i32) -> (i32, i32, i32) {
    %c0_i32 = arith.constant 0 : i32
    %c0_i32_0 = arith.constant 0 : i32
    %c0_i32_1 = arith.constant 0 : i32
    return %arg0, %c0_i32, %c0_i32_0 : i32, i32, i32
  }
  func.func @transform_9(%arg0: i32) -> (i32, i32) {
    %c0_i32 = arith.constant 0 : i32
    %c0_i32_0 = arith.constant 0 : i32
    %c0_i32_1 = arith.constant 0 : i32
    return %c0_i32, %c0_i32_0 : i32, i32
  }
  func.func @transform_10(%arg0: i32) -> (i32, i32, i32) {
    %c0_i32 = arith.constant 0 : i32
    %c0_i32_0 = arith.constant 0 : i32
    %c0_i32_1 = arith.constant 0 : i32
    return %arg0, %c0_i32, %c0_i32_0 : i32, i32, i32
  }
}

</mosaic_0001>

<bundles_post_ra>
// kernel: _device_forward.1
= control target key start
LH: loop header
LB: loop body
LE: loop exit
PB: predicated region body
PF: predicated region fallthrough
CT: control target
= control target key end

     0   :  { %15 = vsyncpa [#allocation4], 0  ;;  %s6921_s0 = inlined_call_operand.vmem [shape: bf16[2,392,256], index: 0, kind: input, shape index: {}]   ;;  %s6922_s1 = inlined_call_operand.vmem [shape: bf16[2,256,16], index: 1, kind: input, shape index: {}]   ;;  %s6923_s2 = inlined_call_operand.vmem [shape: bf16[49,16,32], index: 2, kind: input, shape index: {}]   ;;  %s6924_s3 = inlined_call_operand.vmem [shape: f32[1,32], index: 3, kind: input, shape index: {}]   ;;  %s6925_s4 = inlined_call_operand.vmem [shape: bf16[32,32], index: 4, kind: input, shape index: {}]   ;;  %s6926_s5 = inlined_call_operand.vmem [shape: f32[1,32], index: 5, kind: input, shape index: {}]   ;;  %s6927_s6 = inlined_call_operand.vmem [shape: bf16[32,40], index: 6, kind: input, shape index: {}]   ;;  %s6928_s7 = inlined_call_operand.vmem [shape: f32[1,40], index: 7, kind: input, shape index: {}]   ;;  %s6929_s8 = inlined_call_operand.vmem [shape: f32[2,8,4], index: 8, kind: input, shape index: {}]   ;;  %s6930_s9 = inlined_call_operand.vmem [shape: f32[2,2], index: 9, kind: input, shape index: {}]   ;;  %s6931_s10 = inlined_call_operand.hbm [shape: f32[2,8,128], index: 10, kind: output, shape index: {}]  }
   0x1   :  { %16 = vsyncpa [#allocation3], 0 }
   0x2   :  { %18 = vsyncpa [#allocation3 + $0x1], 0  ;;  %s5758_s13 = smov 0   ;;  %s5760_s14 = smov 0  }
   0x3   :  { %s5762_s15 = smov 0   ;;  %s5764_s16 = smov 0  }
   0x4 LB: > { %s5779_s17 = sadd.s32 4294967295, %s5684_s16   ;;  %s4754_s18 = sadd.s32 4294967294, %s5684_s16   ;;  %s5684_s16 = sphi %s5764_s16, %s6952_s16   ;;  %s5680_s15 = sphi %s5762_s15, %s6951_s15   ;;  %s5676_s14 = sphi %s5760_s14, %s6950_s14   ;;  %s5672_s13 = sphi %s5758_s13, %s6949_s13  }
   0x5   : > { %s5783_s19 = sadd.s32 1, %s5684_s16   ;;  %s256_s20 = sadd.s32 1, %s5680_s15 }
   0x6   : > { %s253_s21 = ssub.s32 %s5684_s16, %s5783_s19  ;;  %p266_p0 = scmp.ne.s32.totalorder %s5680_s15, %s5676_s14 }
   0x7   : > { %p254_p1 = scmp.eq.s32.totalorder %s253_s21, 0  ;;  %p267_p2 = scmp.eq.s32.totalorder %s5779_s17, 1 }
   0x8   : > { %p272_p3 = scmp.ne.s32.totalorder %s5676_s14, %s5672_s13  ;;  %p273_p4 = scmp.eq.s32.totalorder %s4754_s18, 1 }
   0x9   : > { %s5794_s22 = scalar_select %p254_p1, %s5680_s15, %s256_s20  }
   0xa   : > { %p5796_p5 = por %p267_p2, %p266_p0  ;;  %p5800_p6 = por %p273_p4, %p272_p3 }
   0xb   : > { %p4755_p7 = scmp.ge.s32.totalorder %s5684_s16, 1  ;;  %p280_p8 = scmp.lt.s32.totalorder %s5684_s16, 3 }
   0xc   : > { %p5392_p9 = scmp.eq.s32.totalorder %s5779_s17, 0  ;;  %s311_s28 = sshll.u32 %s6930_s9, 4  ;;  %s312_s28 = int_to_ptr.vmem [resolvable:$true] %s311_s28 }
   0xd   : > { %p5807_p10 = pnand %p4755_p7, %p280_p8  ;;  %s5603_s29 = scalar_lea.vmem %s312_s28, 32 }
   0xe   : > { %p5604_p13 = scmp.ne.s32.totalorder %s312_s28, %s5603_s29  ;;  %p5611_p3 = scmp.lt.s32.totalorder %s312_s28, %s312_s28 }
   0xf   : > { %p5384_p11 = pneg %p5807_p10  ;;  %p5612_p4 = scmp.lt.s32.totalorder %s5603_s29, %s5603_s29 }
  0x11   : > { %p5385_p12 = pnand %p5392_p9, %p5384_p11  ;;  %p5613_p7 = por %p5612_p4, %p5611_p3 }
  0x13   : > { %p5605_p0 = pneg %p5385_p12 }
  0x15   : > { %p5606_p1 = pnand %p5605_p0, %p5604_p13 }
  0x17   : > { %p5607_p2 = pneg %p5606_p1 }
  0x19   : > { %p5614_p8 = pnand %p5613_p7, %p5607_p2 }
  0x1b   : > { %5617 = shalt.err (!%p5614_p8)
}
  0x1c   : > { %s5686_s30 = smov [#allocation2]   ;;  %347 = sbr.rel (%p5807_p10) target bundleno = 5760 (0x1680), region = 60 }
  0x1d   : > { %5387 = dma.vmem_to_smem (!%p5385_p12), %s312_s28, 32, %s5686_s30, [#allocation4]  }
  0x23   : > { %5663 = dma.done.wait (%p5392_p9), [#allocation4], 32  }
  0x24   : > { %5665 = vsyncadd (%p5392_p9), [#allocation4], 4294967264 }
  0x25   : > { %353 = sfence }
  0x26   : > { %p395_p11 = scmp.lt.s32.totalorder %s5779_s17, 1  ;;  %v5687_v0 = vmov 0   ;;  %v5506_v14 = vld [vmem:[%s6923_s2] sm:$0xff]   ;;  %v5688_v15 = vmov 0.0   ;;  %vm5689_vm0 = vmmov 0   ;;  %v5533_v58 = vld [vmem:[%s6923_s2 + $0x108] sm:$0xff]  }
  0x27   : > { %834 = vmatprep.subr.bf16.mxu0 %v5687_v0  ;;  %5067 = vmatprep.subr.bf16.mxu1 %v5688_v15  ;;  %vm1219_vm1 = vcmask 130048   ;;  %vm3615_vm2 = vcmask 261120   ;;  %s5690_s27 = smov 2   ;;  %s5691_s29 = smov 126   ;;  %vm3857_vm3 = vcmask 64512   ;;  %vm3967_vm10 = vcmask 39944  }
  0x28   : > { %s5827_s11 = scalar_select %p395_p11, %s5779_s17, 1  ;;  %5068 = vmatpush3.bf16.msra.mxu1 %v5506_v14  ;;  %5069 = vmatprep.mubr.msk.bf16.mxu1 %vm5689_vm0, %v5688_v15  ;;  %v5511_v14 = vld [vmem:[%s6923_s2 + $0x10] sm:$0xff]  }
  0x29   : > { %5073 = vmatprep.subr.bf16.mxu1 %v5688_v15  ;;  %s5697_s30 = smov 113   ;;  %s5699_s18 = smov 127  }
  0x2a   : > { %s4962_s12 = sshll.u32 %s5827_s11, 7  ;;  %s5377_s25 = smul.u32 392, %s5827_s11 }
  0x2b   : > { %s5833_s21 = scalar_lea.vmem %s6922_s1, %s4962_s12  ;;  %s4764_s12 = sshll.u32 %s5827_s11, 3 }
  0x2c   : > { %v5448_v1 = vld [vmem:[%s5833_s21] sm:$0xff]   ;;  %v5449_v2 = vld [vmem:[%s5833_s21 + $0x8] sm:$0xff]   ;;  %v5450_v3 = vld [vmem:[%s5833_s21 + $0x10] sm:$0xff]   ;;  %s5846_s28 = scalar_lea.vmem %s6921_s0, %s5377_s25  ;;  %s408_s26 = scalar_lea.vmem %s6929_s8, %s4764_s12 }
  0x2d   : > { %835 = vmatpush1.bf16.msra.mxu0 %v5448_v1  ;;  %v5451_v4 = vld [vmem:[%s5833_s21 + $0x18] sm:$0xff]   ;;  %v5452_v5 = vld [vmem:[%s5833_s21 + $0x20] sm:$0xff]   ;;  %v5453_v7 = vld [vmem:[%s5833_s21 + $0x28] sm:$0xff]   ;;  %s5698_s12 = smov 1   ;;  %s5700_s20 = smov 120  }
  0x2e   : > { %836 = vmatprep.subr.bf16.mxu0 %v5687_v0  ;;  %v5466_v6 = vld [vmem:[%s5846_s28 + $0x4] ss:$8 sps:$4 sm:$0xff]   ;;  %v5454_v8 = vld [vmem:[%s5833_s21 + $0x30] sm:$0xff]   ;;  %v5455_v9 = vld [vmem:[%s5833_s21 + $0x38] sm:$0xff]  }
  0x2f   : > { %866 = vmatprep.mubr.bf16.mxu0 %v5466_v6  ;;  %v5456_v10 = vld [vmem:[%s5833_s21 + $0x40] sm:$0xff]   ;;  %v5457_v11 = vld [vmem:[%s5833_s21 + $0x48] sm:$0xff]   ;;  %v5458_v12 = vld [vmem:[%s5833_s21 + $0x50] sm:$0xff]  }
  0x30   : > { %v5459_v13 = vld [vmem:[%s5833_s21 + $0x58] sm:$0xff]   ;;  %v5460_v16 = vld [vmem:[%s5833_s21 + $0x60] sm:$0xff]   ;;  %v5461_v17 = vld [vmem:[%s5833_s21 + $0x68] sm:$0xff]  }
  0x31   : > { %837 = vmatpush1.bf16.msra.mxu0 %v5449_v2  ;;  %v5462_v18 = vld [vmem:[%s5833_s21 + $0x70] sm:$0xff]   ;;  %v5463_v19 = vld [vmem:[%s5833_s21 + $0x78] sm:$0xff]   ;;  %v5464_v20 = vld [vmem:[%s5846_s28] ss:$8 sps:$4 sm:$0xff]   ;;  %s392_s21 = sand.u32 1, %s5676_s14  }
  0x32   : > { %838 = vmatprep.subr.bf16.mxu0 %v5687_v0  ;;  %v5467_v21 = vld [vmem:[%s5846_s28 + $0x14] ss:$8 sps:$4 sm:$0xff]   ;;  %v5469_v22 = vld [vmem:[%s5846_s28 + $0x10] ss:$8 sps:$4 sm:$0xff]   ;;  %v5470_v23 = vld [vmem:[%s5846_s28 + $0x24] ss:$8 sps:$4 sm:$0xff]  }
  0x33   : > { %v5472_v24 = vld [vmem:[%s5846_s28 + $0x20] ss:$8 sps:$4 sm:$0xff]   ;;  %v5473_v25 = vld [vmem:[%s5846_s28 + $0x34] ss:$8 sps:$4 sm:$0xff]   ;;  %v5475_v26 = vld [vmem:[%s5846_s28 + $0x30] ss:$8 sps:$4 sm:$0xff]  }
  0x34   : > { %v5476_v27 = vld [vmem:[%s5846_s28 + $0x44] ss:$8 sps:$4 sm:$0xff]   ;;  %v5478_v28 = vld [vmem:[%s5846_s28 + $0x40] ss:$8 sps:$4 sm:$0xff]   ;;  %v5479_v29 = vld [vmem:[%s5846_s28 + $0x54] ss:$8 sps:$4 sm:$0xff]  }
  0x35   : > { %839 = vmatpush1.bf16.msra.mxu0 %v5450_v3  ;;  %v5481_v30 = vld [vmem:[%s5846_s28 + $0x50] ss:$8 sps:$4 sm:$0xff]   ;;  %v5482_v31 = vld [vmem:[%s5846_s28 + $0x64] ss:$8 sps:$4 sm:$0xff]   ;;  %v5484_v32 = vld [vmem:[%s5846_s28 + $0x60] ss:$8 sps:$4 sm:$0xff]  }
  0x36   : > { %840 = vmatprep.subr.bf16.mxu0 %v5687_v0  ;;  %v5485_v33 = vld [vmem:[%s5846_s28 + $0x74] ss:$8 sps:$4 sm:$0xff]   ;;  %v5487_v34 = vld [vmem:[%s5846_s28 + $0x70] ss:$8 sps:$4 sm:$0xff]   ;;  %v5488_v35 = vld [vmem:[%s5846_s28 + $0x84] ss:$8 sps:$4 sm:$0xff]  }
  0x37   : > { %v5490_v36 = vld [vmem:[%s5846_s28 + $0x80] ss:$8 sps:$4 sm:$0xff]   ;;  %v5491_v37 = vld [vmem:[%s5846_s28 + $0x94] ss:$8 sps:$4 sm:$0xff]   ;;  %v5493_v38 = vld [vmem:[%s5846_s28 + $0x90] ss:$8 sps:$4 sm:$0xff]  }
  0x38   : > { %v5494_v39 = vld [vmem:[%s5846_s28 + $0xa4] ss:$8 sps:$4 sm:$0xff]   ;;  %v5496_v40 = vld [vmem:[%s5846_s28 + $0xa0] ss:$8 sps:$4 sm:$0xff]   ;;  %v5497_v41 = vld [vmem:[%s5846_s28 + $0xb4] ss:$8 sps:$4 sm:$0xff]  }
  0x39   : > { %841 = vmatpush1.bf16.msra.mxu0 %v5451_v4  ;;  %v5499_v42 = vld [vmem:[%s5846_s28 + $0xb0] ss:$8 sps:$4 sm:$0xff]   ;;  %v5500_v43 = vld [vmem:[%s5846_s28 + $0xc4] ss:$8 sps:$4 sm:$0xff]   ;;  %v5502_v44 = vld [vmem:[%s5846_s28 + $0xc0] ss:$8 sps:$4 sm:$0xff]  }
  0x3a   : > { %842 = vmatprep.subr.bf16.mxu0 %v5687_v0  ;;  %v5503_v45 = vld [vmem:[%s5846_s28 + $0xd4] ss:$8 sps:$4 sm:$0xff]   ;;  %v5505_v46 = vld [vmem:[%s5846_s28 + $0xd0] ss:$8 sps:$4 sm:$0xff]   ;;  %v5508_v47 = vld [vmem:[%s5846_s28 + $0xe4] ss:$8 sps:$4 sm:$0xff]  }
  0x3b   : > { %v5510_v48 = vld [vmem:[%s5846_s28 + $0xe0] ss:$8 sps:$4 sm:$0xff]   ;;  %v5513_v49 = vld [vmem:[%s5846_s28 + $0xf4] ss:$8 sps:$4 sm:$0xff]   ;;  %v5515_v50 = vld [vmem:[%s5846_s28 + $0xf0] ss:$8 sps:$4 sm:$0xff]  }
  0x3c   : > { %v5518_v51 = vld [vmem:[%s5846_s28 + $0x104] ss:$8 sps:$4 sm:$0xff]   ;;  %v5520_v52 = vld [vmem:[%s5846_s28 + $0x100] ss:$8 sps:$4 sm:$0xff]   ;;  %v5522_v53 = vld [vmem:[%s5846_s28 + $0x114] ss:$8 sps:$4 sm:$0xff]  }
  0x3d   : > { %843 = vmatpush1.bf16.msra.mxu0 %v5452_v5  ;;  %v5524_v54 = vld [vmem:[%s5846_s28 + $0x110] ss:$8 sps:$4 sm:$0xff]   ;;  %v5526_v55 = vld [vmem:[%s5846_s28 + $0x124] ss:$8 sps:$4 sm:$0xff]   ;;  %v5528_v56 = vld [vmem:[%s5846_s28 + $0x120] ss:$8 sps:$4 sm:$0xff]  }
  0x3e   : > { %844 = vmatprep.subr.bf16.mxu0 %v5687_v0  ;;  %v5530_v57 = vld [vmem:[%s5846_s28 + $0x134] ss:$8 sps:$4 sm:$0xff]   ;;  %v5532_v59 = vld [vmem:[%s5846_s28 + $0x130] ss:$8 sps:$4 sm:$0xff]   ;;  %v5535_v60 = vld [vmem:[%s5846_s28 + $0x144] ss:$8 sps:$4 sm:$0xff]  }
  0x3f   : > { %v5537_v61 = vld [vmem:[%s5846_s28 + $0x140] ss:$8 sps:$4 sm:$0xff]   ;;  %v5539_v62 = vld [vmem:[%s5846_s28 + $0x154] ss:$8 sps:$4 sm:$0xff]   ;;  %v5541_v63 = vld [vmem:[%s5846_s28 + $0x150] ss:$8 sps:$4 sm:$0xff]  }
  0x40   : > { %v5543_v1 = vld [vmem:[%s5846_s28 + $0x164] ss:$8 sps:$4 sm:$0xff]   ;;  %v5545_v2 = vld [vmem:[%s5846_s28 + $0x160] ss:$8 sps:$4 sm:$0xff]   ;;  %v5547_v3 = vld [vmem:[%s5846_s28 + $0x174] ss:$8 sps:$4 sm:$0xff]  }
  0x41   : > { %845 = vmatpush1.bf16.msra.mxu0 %v5453_v7  ;;  %v5549_v4 = vld [vmem:[%s5846_s28 + $0x170] ss:$8 sps:$4 sm:$0xff]   ;;  %v458_v5 = vld [vmem:[%s5846_s28 + $0x180] sm:$0xff]  ;;  %s4760_s25 = sshll.u32 %s392_s21, 3 }
  0x42   : > { %846 = vmatprep.subr.bf16.mxu0 %v5687_v0  ;;  %v4814_v6 = vcombine.high %v458_v5, %v458_v5  ;;  %v4813_v7 = vcombine.low %v458_v5, %v458_v5 }
  0x45   : > { %847 = vmatpush1.bf16.msra.mxu0 %v5454_v8 }
  0x46   : > { %848 = vmatprep.subr.bf16.mxu0 %v5687_v0 }
  0x49   : > { %849 = vmatpush1.bf16.msra.mxu0 %v5455_v9  ;;  %v5507_v9 = vld [vmem:[%s6923_s2 + $0x8] sm:$0xff]  }
  0x4a   : > { %850 = vmatprep.subr.bf16.mxu0 %v5687_v0 }
  0x4d   : > { %851 = vmatpush1.bf16.msra.mxu0 %v5456_v10 }
  0x4e   : > { %852 = vmatprep.subr.bf16.mxu0 %v5687_v0 }
  0x51   : > { %853 = vmatpush1.bf16.msra.mxu0 %v5457_v11 }
  0x52   : > { %854 = vmatprep.subr.bf16.mxu0 %v5687_v0 }
  0x55   : > { %855 = vmatpush1.bf16.msra.mxu0 %v5458_v12 }
  0x56   : > { %856 = vmatprep.subr.bf16.mxu0 %v5687_v0 }
  0x59   : > { %857 = vmatpush1.bf16.msra.mxu0 %v5459_v13 }
  0x5a   : > { %858 = vmatprep.subr.bf16.mxu0 %v5687_v0 }
  0x5d   : > { %859 = vmatpush1.bf16.msra.mxu0 %v5460_v16 }
  0x5e   : > { %860 = vmatprep.subr.bf16.mxu0 %v5687_v0 }
  0x61   : > { %861 = vmatpush1.bf16.msra.mxu0 %v5461_v17 }
  0x62   : > { %862 = vmatprep.subr.bf16.mxu0 %v5687_v0 }
  0x65   : > { %863 = vmatpush1.bf16.msra.mxu0 %v5462_v18 }
  0x66   : > { %864 = vmatprep.subr.bf16.mxu0 %v5687_v0 }
  0x69   : > { %865 = vmatpush1.bf16.msra.mxu0 %v5463_v19 }
  0x6a   : > { %5265 = vmatprep.subr.bf16.mxu0 %v5688_v15 }
  0x6c   : > { %867 = vmatmul.mubr.bf16.vlgmr.msra.gmra.mrb[0].mxu0 %v5464_v20 }
  0x6d   : > { %874 = vmatprep.mubr.bf16.mxu0 %v5467_v21  ;;  %5266 = vmatpush3.bf16.msra.mxu0 %v5533_v58  ;;  %v5534_v58 = vld [vmem:[%s6923_s2 + $0x48] sm:$0xff]  }
  0x6e   : > { %5277 = vmatprep.subr.bf16.mxu0 %v5688_v15 }
  0x74   : > { %875 = vmatmul.mubr.bf16.gmra.mrb[4].mxu0 %v5469_v22  ;;  %v5512_v22 = vld [vmem:[%s6923_s2 + $0x18] sm:$0xff]  }
  0x75   : > { %882 = vmatprep.mubr.bf16.mxu0 %v5470_v23 }
  0x7c   : > { %883 = vmatmul.mubr.bf16.gmra.mrb[8].mxu0 %v5472_v24 }
  0x7d   : > { %890 = vmatprep.mubr.bf16.mxu0 %v5473_v25 }
  0x84   : > { %891 = vmatmul.mubr.bf16.gmra.mrb[12].mxu0 %v5475_v26 }
  0x85   : > { %898 = vmatprep.mubr.bf16.mxu0 %v5476_v27  ;;  %v5516_v27 = vld [vmem:[%s6923_s2 + $0x20] sm:$0xff]  }
  0x8c   : > { %899 = vmatmul.mubr.bf16.gmra.mrb[16].mxu0 %v5478_v28 }
  0x8d   : > { %906 = vmatprep.mubr.bf16.mxu0 %v5479_v29 }
  0x94   : > { %907 = vmatmul.mubr.bf16.gmra.mrb[20].mxu0 %v5481_v30 }
  0x95   : > { %914 = vmatprep.mubr.bf16.mxu0 %v5482_v31 }
  0x9c   : > { %915 = vmatmul.mubr.bf16.gmra.mrb[24].mxu0 %v5484_v32 }
  0x9d   : > { %922 = vmatprep.mubr.bf16.mxu0 %v5485_v33 }
  0xa4   : > { %923 = vmatmul.mubr.bf16.gmra.mrb[28].mxu0 %v5487_v34  ;;  %v5517_v34 = vld [vmem:[%s6923_s2 + $0x28] sm:$0xff]  }
  0xa5   : > { %930 = vmatprep.mubr.bf16.mxu0 %v5488_v35 }
  0xac   : > { %931 = vmatmul.mubr.bf16.gmra.mrb[32].mxu0 %v5490_v36 }
  0xad   : > { %938 = vmatprep.mubr.bf16.mxu0 %v5491_v37 }
  0xb4   : > { %939 = vmatmul.mubr.bf16.gmra.mrb[36].mxu0 %v5493_v38 }
  0xb5   : > { %946 = vmatprep.mubr.bf16.mxu0 %v5494_v39  ;;  %v5521_v39 = vld [vmem:[%s6923_s2 + $0x30] sm:$0xff]  }
  0xbc   : > { %947 = vmatmul.mubr.bf16.gmra.mrb[40].mxu0 %v5496_v40 }
  0xbd   : > { %954 = vmatprep.mubr.bf16.mxu0 %v5497_v41 }
  0xc4   : > { %955 = vmatmul.mubr.bf16.gmra.mrb[44].mxu0 %v5499_v42 }
  0xc5   : > { %962 = vmatprep.mubr.bf16.mxu0 %v5500_v43 }
  0xcc   : > { %963 = vmatmul.mubr.bf16.gmra.mrb[48].mxu0 %v5502_v44 }
  0xcd   : > { %970 = vmatprep.mubr.bf16.mxu0 %v5503_v45 }
  0xd4   : > { %971 = vmatmul.mubr.bf16.gmra.mrb[52].mxu0 %v5505_v46  ;;  %v5525_v46 = vld [vmem:[%s6923_s2 + $0x38] sm:$0xff]  }
  0xd5   : > { %978 = vmatprep.mubr.bf16.mxu0 %v5508_v47 }
  0xdc   : > { %979 = vmatmul.mubr.bf16.gmra.mrb[56].mxu0 %v5510_v48 }
  0xdd   : > { %986 = vmatprep.mubr.bf16.mxu0 %v5513_v49 }
  0xe4   : > { %987 = vmatmul.mubr.bf16.gmra.mrb[60].mxu0 %v5515_v50 }
  0xe5   : > { %994 = vmatprep.mubr.bf16.mxu0 %v5518_v51  ;;  %v5529_v51 = vld [vmem:[%s6923_s2 + $0x40] sm:$0xff]  }
  0xec   : > { %995 = vmatmul.mubr.bf16.gmra.mrb[64].mxu0 %v5520_v52 }
  0xed   : > { %1002 = vmatprep.mubr.bf16.mxu0 %v5522_v53 }
  0xf4   : > { %1003 = vmatmul.mubr.bf16.gmra.mrb[68].mxu0 %v5524_v54 }
  0xf5   : > { %1010 = vmatprep.mubr.bf16.mxu0 %v5526_v55 }
  0xfc   : > { %1011 = vmatmul.mubr.bf16.gmra.mrb[72].mxu0 %v5528_v56 }
  0xfd   : > { %1018 = vmatprep.mubr.bf16.mxu0 %v5530_v57 }
 0x104   : > { %1019 = vmatmul.mubr.bf16.gmra.mrb[76].mxu0 %v5532_v59 }
 0x105   : > { %1026 = vmatprep.mubr.bf16.mxu0 %v5535_v60 }
 0x10c   : > { %1027 = vmatmul.mubr.bf16.gmra.mrb[80].mxu0 %v5537_v61 }
 0x10d   : > { %1034 = vmatprep.mubr.bf16.mxu0 %v5539_v62 }
 0x114   : > { %1035 = vmatmul.mubr.bf16.gmra.mrb[84].mxu0 %v5541_v63  ;;  %v5538_v63 = vld [vmem:[%s6923_s2 + $0x50] sm:$0xff]  }
 0x115   : > { %1042 = vmatprep.mubr.bf16.mxu0 %v5543_v1 }
 0x11c   : > { %1043 = vmatmul.mubr.bf16.gmra.mrb[88].mxu0 %v5545_v2 }
 0x11d   : > { %1050 = vmatprep.mubr.bf16.mxu0 %v5547_v3 }
 0x124   : > { %1051 = vmatmul.mubr.bf16.gmra.mrb[92].mxu0 %v5549_v4 }
 0x125   : > { %1058 = vmatprep.mubr.bf16.mxu0 %v4814_v6 }
 0x12c   : > { %1059 = vmatmul.mubr.bf16.gmra.mrb[96].mxu0 %v4813_v7  ;;  %v5542_v7 = vld [vmem:[%s6923_s2 + $0x58] sm:$0xff]  }
 0x12d   : > { %5267 = vmatprep.mubr.msk.bf16.mxu0 %vm5689_vm0, %v5688_v15 }
 0x13f   : > { %v868_v8 = vpop.f32.mrb[0].mxu0 }
 0x140   : > { %v1066_v10 = vpack.c.bf16 %v868_v8, %v868_v8  ;;  %v870_v11 = vpop.f32.mrb[1].mxu0 }
 0x141   : > { %v871_v12 = vpop.f32.mrb[2].mxu0 }
 0x142   : > { %v873_v13 = vpop.f32.mrb[3].mxu0  ;;  %5070 = vmatmul.mubr.msk.bf16.vlgmr.msra.gmra.mrb[0].mxu1 %vm1219_vm1, %v1066_v10  ;;  %v1067_v17 = vpack.c.bf16 %v871_v12, %v871_v12  ;;  %v5546_v12 = vld [vmem:[%s6923_s2 + $0x60] sm:$0xff]  }
 0x143   : > { %5074 = vmatpush3.bf16.msra.mxu1 %v5507_v9  ;;  %5075 = vmatprep.mubr.msk.bf16.mxu1 %vm5689_vm0, %v5688_v15 }
 0x144   : > { %5079 = vmatprep.subr.bf16.mxu1 %v5688_v15 }
 0x147   : > { %v876_v16 = vpop.f32.mrb[4].mxu0 }
 0x148   : > { %v878_v18 = vpop.f32.mrb[5].mxu0  ;;  %v1068_v21 = vpack.c.bf16 %v876_v16, %v876_v16 }
 0x149   : > { %v879_v19 = vpop.f32.mrb[6].mxu0 }
 0x14a   : > { %5076 = vmatmul.mubr.msk.bf16.vlgmr.msra.gmra.mrb[4].mxu1 %vm1219_vm1, %v1067_v17  ;;  %v881_v20 = vpop.f32.mrb[7].mxu0  ;;  %v1069_v29 = vpack.c.bf16 %v879_v19, %v879_v19 }
 0x14b   : > { %5080 = vmatpush3.bf16.msra.mxu1 %v5511_v14  ;;  %5081 = vmatprep.mubr.msk.bf16.mxu1 %vm5689_vm0, %v5688_v15  ;;  %v5550_v20 = vld [vmem:[%s6923_s2 + $0x68] sm:$0xff]  }
 0x14c   : > { %5085 = vmatprep.subr.bf16.mxu1 %v5688_v15 }
 0x14f   : > { %v884_v23 = vpop.f32.mrb[8].mxu0 }
 0x150   : > { %v886_v24 = vpop.f32.mrb[9].mxu0  ;;  %v1070_v33 = vpack.c.bf16 %v884_v23, %v884_v23 }
 0x151   : > { %v887_v25 = vpop.f32.mrb[10].mxu0 }
 0x152   : > { %5082 = vmatmul.mubr.msk.bf16.vlgmr.msra.gmra.mrb[8].mxu1 %vm1219_vm1, %v1068_v21  ;;  %v889_v26 = vpop.f32.mrb[11].mxu0  ;;  %v1071_v41 = vpack.c.bf16 %v887_v25, %v887_v25  ;;  %v5553_v25 = vld [vmem:[%s6923_s2 + $0x70] sm:$0xff]  }
 0x153   : > { %5086 = vmatpush3.bf16.msra.mxu1 %v5512_v22  ;;  %5087 = vmatprep.mubr.msk.bf16.mxu1 %vm5689_vm0, %v5688_v15 }
 0x154   : > { %5091 = vmatprep.subr.bf16.mxu1 %v5688_v15 }
 0x157   : > { %v892_v28 = vpop.f32.mrb[12].mxu0 }
 0x158   : > { %v894_v30 = vpop.f32.mrb[13].mxu0  ;;  %v1072_v45 = vpack.c.bf16 %v892_v28, %v892_v28 }
 0x159   : > { %v895_v31 = vpop.f32.mrb[14].mxu0 }
 0x15a   : > { %5088 = vmatmul.mubr.msk.bf16.vlgmr.msra.gmra.mrb[12].mxu1 %vm1219_vm1, %v1069_v29  ;;  %v897_v32 = vpop.f32.mrb[15].mxu0  ;;  %v1073_v53 = vpack.c.bf16 %v895_v31, %v895_v31 }
 0x15b   : > { %5092 = vmatpush3.bf16.msra.mxu1 %v5516_v27  ;;  %5093 = vmatprep.mubr.msk.bf16.mxu1 %vm5689_vm0, %v5688_v15  ;;  %v5554_v32 = vld [vmem:[%s6923_s2 + $0x78] sm:$0xff]  }
 0x15c   : > { %5097 = vmatprep.subr.bf16.mxu1 %v5688_v15 }
 0x15f   : > { %v900_v35 = vpop.f32.mrb[16].mxu0 }
 0x160   : > { %v902_v36 = vpop.f32.mrb[17].mxu0  ;;  %v1074_v57 = vpack.c.bf16 %v900_v35, %v900_v35 }
 0x161   : > { %v903_v37 = vpop.f32.mrb[18].mxu0 }
 0x162   : > { %5094 = vmatmul.mubr.msk.bf16.vlgmr.msra.gmra.mrb[16].mxu1 %vm1219_vm1, %v1070_v33  ;;  %v905_v38 = vpop.f32.mrb[19].mxu0  ;;  %v1075_v2 = vpack.c.bf16 %v903_v37, %v903_v37  ;;  %v5555_v37 = vld [vmem:[%s6923_s2 + $0x80] sm:$0xff]  }
 0x163   : > { %5098 = vmatpush3.bf16.msra.mxu1 %v5517_v34  ;;  %5099 = vmatprep.mubr.msk.bf16.mxu1 %vm5689_vm0, %v5688_v15 }
 0x164   : > { %5103 = vmatprep.subr.bf16.mxu1 %v5688_v15 }
 0x167   : > { %v908_v40 = vpop.f32.mrb[20].mxu0 }
 0x168   : > { %v910_v42 = vpop.f32.mrb[21].mxu0  ;;  %v1076_v6 = vpack.c.bf16 %v908_v40, %v908_v40 }
 0x169   : > { %v911_v43 = vpop.f32.mrb[22].mxu0 }
 0x16a   : > { %5100 = vmatmul.mubr.msk.bf16.vlgmr.msra.gmra.mrb[20].mxu1 %vm1219_vm1, %v1071_v41  ;;  %v913_v44 = vpop.f32.mrb[23].mxu0  ;;  %v1077_v14 = vpack.c.bf16 %v911_v43, %v911_v43 }
 0x16b   : > { %5104 = vmatpush3.bf16.msra.mxu1 %v5521_v39  ;;  %5105 = vmatprep.mubr.msk.bf16.mxu1 %vm5689_vm0, %v5688_v15  ;;  %v5556_v44 = vld [vmem:[%s6923_s2 + $0x88] sm:$0xff]  }
 0x16c   : > { %5109 = vmatprep.subr.bf16.mxu1 %v5688_v15 }
 0x16f   : > { %v5980_v47 = vpop.f32.mrb[24].mxu0 }
 0x170   : > { %v918_v48 = vpop.f32.mrb[25].mxu0  ;;  %v1078_v19 = vpack.c.bf16 %v5980_v47, %v5980_v47 }
 0x171   : > { %v5982_v49 = vpop.f32.mrb[26].mxu0 }
 0x172   : > { %5106 = vmatmul.mubr.msk.bf16.vlgmr.msra.gmra.mrb[24].mxu1 %vm1219_vm1, %v1072_v45  ;;  %v921_v50 = vpop.f32.mrb[27].mxu0  ;;  %v1079_v27 = vpack.c.bf16 %v5982_v49, %v5982_v49 }
 0x173   : > { %5110 = vmatpush3.bf16.msra.mxu1 %v5525_v46  ;;  %5111 = vmatprep.mubr.msk.bf16.mxu1 %vm5689_vm0, %v5688_v15  ;;  %v5573_v50 = vld [vmem:[%s6923_s2 + $0x118] sm:$0xff]  }
 0x174   : > { %5115 = vmatprep.subr.bf16.mxu1 %v5688_v15 }
 0x177   : > { %v5991_v52 = vpop.f32.mrb[28].mxu0 }
 0x178   : > { %v926_v54 = vpop.f32.mrb[29].mxu0  ;;  %v1080_v31 = vpack.c.bf16 %v5991_v52, %v5991_v52 }
 0x179   : > { %v5993_v55 = vpop.f32.mrb[30].mxu0 }
 0x17a   : > { %5112 = vmatmul.mubr.msk.bf16.vlgmr.msra.gmra.mrb[28].mxu1 %vm1219_vm1, %v1073_v53  ;;  %v929_v56 = vpop.f32.mrb[31].mxu0  ;;  %v1081_v39 = vpack.c.bf16 %v5993_v55, %v5993_v55 }
 0x17b   : > { %5116 = vmatpush3.bf16.msra.mxu1 %v5529_v51  ;;  %5117 = vmatprep.mubr.msk.bf16.mxu1 %vm5689_vm0, %v5688_v15  ;;  %v5557_v51 = vld [vmem:[%s6923_s2 + $0x90] sm:$0xff]  }
 0x17c   : > { %5121 = vmatprep.subr.bf16.mxu1 %v5688_v15 }
 0x17f   : > { %v6002_v59 = vpop.f32.mrb[32].mxu0 }
 0x180   : > { %v934_v60 = vpop.f32.mrb[33].mxu0  ;;  %v1082_v43 = vpack.c.bf16 %v6002_v59, %v6002_v59 }
 0x181   : > { %v6004_v61 = vpop.f32.mrb[34].mxu0  ;;  %v5558_v60 = vld [vmem:[%s6923_s2 + $0x98] sm:$0xff]  }
 0x182   : > { %5118 = vmatmul.mubr.msk.bf16.vlgmr.msra.gmra.mrb[32].mxu1 %vm1219_vm1, %v1074_v57  ;;  %v937_v62 = vpop.f32.mrb[35].mxu0  ;;  %v1083_v53 = vpack.c.bf16 %v6004_v61, %v6004_v61 }
 0x183   : > { %5122 = vmatpush3.bf16.msra.mxu1 %v5534_v58  ;;  %5123 = vmatprep.mubr.msk.bf16.mxu1 %vm5689_vm0, %v5688_v15  ;;  %v5575_v58 = vld [vmem:[%s6923_s2 + $0x128] sm:$0xff]  }
 0x184   : > { %5127 = vmatprep.subr.bf16.mxu1 %v5688_v15 }
 0x187   : > { %v6013_v1 = vpop.f32.mrb[36].mxu0 }
 0x188   : > { %v942_v3 = vpop.f32.mrb[37].mxu0  ;;  %v1084_v59 = vpack.c.bf16 %v6013_v1, %v6013_v1  ;;  %v5559_v1 = vld [vmem:[%s6923_s2 + $0xa0] sm:$0xff]  }
 0x189   : > { %v6015_v4 = vpop.f32.mrb[38].mxu0 }
 0x18a   : > { %5124 = vmatmul.mubr.msk.bf16.vlgmr.msra.gmra.mrb[36].mxu1 %vm1219_vm1, %v1075_v2  ;;  %v945_v5 = vpop.f32.mrb[39].mxu0 }
 0x18b   : > { %5128 = vmatpush3.bf16.msra.mxu1 %v5538_v63  ;;  %5129 = vmatprep.mubr.msk.bf16.mxu1 %vm5689_vm0, %v5688_v15  ;;  %v5577_v5 = vld [vmem:[%s6923_s2 + $0x138] sm:$0xff]  }
 0x18c   : > { %5133 = vmatprep.subr.bf16.mxu1 %v5688_v15 }
 0x18f   : > { %v6024_v8 = vpop.f32.mrb[40].mxu0 }
 0x190   : > { %v950_v9 = vpop.f32.mrb[41].mxu0 }
 0x191   : > { %v6026_v10 = vpop.f32.mrb[42].mxu0 }
 0x192   : > { %5130 = vmatmul.mubr.msk.bf16.vlgmr.msra.gmra.mrb[40].mxu1 %vm1219_vm1, %v1076_v6  ;;  %v953_v11 = vpop.f32.mrb[43].mxu0 }
 0x193   : > { %5134 = vmatpush3.bf16.msra.mxu1 %v5542_v7  ;;  %5135 = vmatprep.mubr.msk.bf16.mxu1 %vm5689_vm0, %v5688_v15  ;;  %v1085_v7 = vpack.c.bf16 %v6015_v4, %v6015_v4  ;;  %v1086_v4 = vpack.c.bf16 %v6024_v8, %v6024_v8  ;;  %v5561_v8 = vld [vmem:[%s6923_s2 + $0xb0] sm:$0xff]  }
 0x194   : > { %5139 = vmatprep.subr.bf16.mxu1 %v5688_v15 }
 0x197   : > { %v6035_v13 = vpop.f32.mrb[44].mxu0 }
 0x198   : > { %v958_v16 = vpop.f32.mrb[45].mxu0 }
 0x199   : > { %v6037_v17 = vpop.f32.mrb[46].mxu0  ;;  %v5579_v16 = vld [vmem:[%s6923_s2 + $0x148] sm:$0xff]  }
 0x19a   : > { %5136 = vmatmul.mubr.msk.bf16.vlgmr.msra.gmra.mrb[44].mxu1 %vm1219_vm1, %v1077_v14  ;;  %v961_v18 = vpop.f32.mrb[47].mxu0 }
 0x19b   : > { %5140 = vmatpush3.bf16.msra.mxu1 %v5546_v12  ;;  %5141 = vmatprep.mubr.msk.bf16.mxu1 %vm5689_vm0, %v5688_v15  ;;  %v5560_v18 = vld [vmem:[%s6923_s2 + $0xa8] sm:$0xff]  }
 0x19c   : > { %5145 = vmatprep.subr.bf16.mxu1 %v5688_v15 }
 0x19f   : > { %v6048_v21 = vpop.f32.mrb[48].mxu0 }
 0x1a0   : > { %v966_v22 = vpop.f32.mrb[49].mxu0 }
 0x1a1   : > { %v6050_v23 = vpop.f32.mrb[50].mxu0 }
 0x1a2   : > { %5142 = vmatmul.mubr.msk.bf16.vlgmr.msra.gmra.mrb[48].mxu1 %vm1219_vm1, %v1078_v19  ;;  %v969_v24 = vpop.f32.mrb[51].mxu0 }
 0x1a3   : > { %5146 = vmatpush3.bf16.msra.mxu1 %v5550_v20  ;;  %5147 = vmatprep.mubr.msk.bf16.mxu1 %vm5689_vm0, %v5688_v15 }
 0x1a4   : > { %5151 = vmatprep.subr.bf16.mxu1 %v5688_v15 }
 0x1a7   : > { %v6059_v26 = vpop.f32.mrb[52].mxu0 }
 0x1a8   : > { %v974_v28 = vpop.f32.mrb[53].mxu0 }
 0x1a9   : > { %v6063_v29 = vpop.f32.mrb[54].mxu0 }
 0x1aa   : > { %5148 = vmatmul.mubr.msk.bf16.vlgmr.msra.gmra.mrb[52].mxu1 %vm1219_vm1, %v1079_v27  ;;  %v977_v30 = vpop.f32.mrb[55].mxu0  ;;  %v5581_v27 = vld [vmem:[%s6923_s2 + $0x158] sm:$0xff]  }
 0x1ab   : > { %5152 = vmatpush3.bf16.msra.mxu1 %v5553_v25  ;;  %5153 = vmatprep.mubr.msk.bf16.mxu1 %vm5689_vm0, %v5688_v15  ;;  %v1087_v30 = vpack.c.bf16 %v6026_v10, %v6026_v10  ;;  %v1088_v10 = vpack.c.bf16 %v6035_v13, %v6035_v13  ;;  %v5563_v13 = vld [vmem:[%s6923_s2 + $0xc0] sm:$0xff]  }
 0x1ac   : > { %5157 = vmatprep.subr.bf16.mxu1 %v5688_v15 }
 0x1af   : > { %v6074_v33 = vpop.f32.mrb[56].mxu0 }
 0x1b0   : > { %v982_v34 = vpop.f32.mrb[57].mxu0 }
 0x1b1   : > { %v6076_v35 = vpop.f32.mrb[58].mxu0 }
 0x1b2   : > { %5154 = vmatmul.mubr.msk.bf16.vlgmr.msra.gmra.mrb[56].mxu1 %vm1219_vm1, %v1080_v31  ;;  %v985_v36 = vpop.f32.mrb[59].mxu0 }
 0x1b3   : > { %5158 = vmatpush3.bf16.msra.mxu1 %v5554_v32  ;;  %5159 = vmatprep.mubr.msk.bf16.mxu1 %vm5689_vm0, %v5688_v15 }
 0x1b4   : > { %5163 = vmatprep.subr.bf16.mxu1 %v5688_v15 }
 0x1b7   : > { %v6085_v38 = vpop.f32.mrb[60].mxu0 }
 0x1b8   : > { %v990_v40 = vpop.f32.mrb[61].mxu0 }
 0x1b9   : > { %v6089_v41 = vpop.f32.mrb[62].mxu0 }
 0x1ba   : > { %5160 = vmatmul.mubr.msk.bf16.vlgmr.msra.gmra.mrb[60].mxu1 %vm1219_vm1, %v1081_v39  ;;  %v993_v42 = vpop.f32.mrb[63].mxu0  ;;  %v5562_v39 = vld [vmem:[%s6923_s2 + $0xb8] sm:$0xff]  }
 0x1bb   : > { %5164 = vmatpush3.bf16.msra.mxu1 %v5555_v37  ;;  %5165 = vmatprep.mubr.msk.bf16.mxu1 %vm5689_vm0, %v5688_v15  ;;  %v5583_v37 = vld [vmem:[%s6923_s2 + $0x168] sm:$0xff]  }
 0x1bc   : > { %5169 = vmatprep.subr.bf16.mxu1 %v5688_v15 }
 0x1bf   : > { %v6100_v45 = vpop.f32.mrb[64].mxu0 }
 0x1c0   : > { %v998_v46 = vpop.f32.mrb[65].mxu0 }
 0x1c1   : > { %v999_v47 = vpop.f32.mrb[66].mxu0 }
 0x1c2   : > { %5166 = vmatmul.mubr.msk.bf16.vlgmr.msra.gmra.mrb[64].mxu1 %vm1219_vm1, %v1082_v43  ;;  %v1099_v48 = vpack.c.bf16 %v999_v47, %v999_v47  ;;  %v1001_v49 = vpop.f32.mrb[67].mxu0  ;;  %v5585_v47 = vld [vmem:[%s6923_s2 + $0x178] sm:$0xff]  }
 0x1c3   : > { %5170 = vmatpush3.bf16.msra.mxu1 %v5556_v44  ;;  %5171 = vmatprep.mubr.msk.bf16.mxu1 %vm5689_vm0, %v5688_v15  ;;  %v1089_v49 = vpack.c.bf16 %v6037_v17, %v6037_v17  ;;  %v1090_v17 = vpack.c.bf16 %v6048_v21, %v6048_v21  ;;  %v5565_v21 = vld [vmem:[%s6923_s2 + $0xd0] sm:$0xff]  }
 0x1c4   : > { %5175 = vmatprep.subr.bf16.mxu1 %v5688_v15  ;;  %5268 = vmatmul.mubr.msk.bf16.vlgmr.msra.gmra.mrb[100].mxu0 %vm1219_vm1, %v1099_v48 }
 0x1c5   : > { %5278 = vmatpush3.bf16.msra.mxu0 %v5573_v50  ;;  %5279 = vmatprep.mubr.msk.bf16.mxu0 %vm5689_vm0, %v5688_v15 }
 0x1c6   : > { %5289 = vmatprep.subr.bf16.mxu0 %v5688_v15 }
 0x1c7   : > { %v6116_v52 = vpop.f32.mrb[68].mxu0 }
 0x1c8   : > { %v1006_v54 = vpop.f32.mrb[69].mxu0 }
 0x1c9   : > { %v1007_v55 = vpop.f32.mrb[70].mxu0 }
 0x1ca   : > { %5172 = vmatmul.mubr.msk.bf16.vlgmr.msra.gmra.mrb[68].mxu1 %vm1219_vm1, %v1083_v53  ;;  %v1101_v56 = vpack.c.bf16 %v1007_v55, %v1007_v55  ;;  %v1009_v57 = vpop.f32.mrb[71].mxu0  ;;  %v5564_v55 = vld [vmem:[%s6923_s2 + $0xc8] sm:$0xff]  }
 0x1cb   : > { %5176 = vmatpush3.bf16.msra.mxu1 %v5557_v51  ;;  %5177 = vmatprep.mubr.msk.bf16.mxu1 %vm5689_vm0, %v5688_v15 }
 0x1cc   : > { %5181 = vmatprep.subr.bf16.mxu1 %v5688_v15  ;;  %5280 = vmatmul.mubr.msk.bf16.vlgmr.msra.gmra.mrb[104].mxu0 %vm1219_vm1, %v1101_v56 }
 0x1cd   : > { %5290 = vmatpush3.bf16.msra.mxu0 %v5575_v58  ;;  %5291 = vmatprep.mubr.msk.bf16.mxu0 %vm5689_vm0, %v5688_v15 }
 0x1ce   : > { %5301 = vmatprep.subr.bf16.mxu0 %v5688_v15 }
 0x1cf   : > { %v6136_v61 = vpop.f32.mrb[72].mxu0 }
 0x1d0   : > { %v1014_v62 = vpop.f32.mrb[73].mxu0 }
 0x1d1   : > { %v1015_v63 = vpop.f32.mrb[74].mxu0  ;;  %v1092_v62 = vpack.c.bf16 %v6059_v26, %v6059_v26  ;;  %v1093_v26 = vpack.c.bf16 %v6063_v29, %v6063_v29 }
 0x1d2   : > { %5178 = vmatmul.mubr.msk.bf16.vlgmr.msra.gmra.mrb[72].mxu1 %vm1219_vm1, %v1084_v59  ;;  %v1103_v2 = vpack.c.bf16 %v1015_v63, %v1015_v63  ;;  %v1017_v3 = vpop.f32.mrb[75].mxu0  ;;  %v5566_v63 = vld [vmem:[%s6923_s2 + $0xd8] sm:$0xff]  }
 0x1d3   : > { %5182 = vmatpush3.bf16.msra.mxu1 %v5558_v60  ;;  %5183 = vmatprep.mubr.msk.bf16.mxu1 %vm5689_vm0, %v5688_v15  ;;  %v1091_v60 = vpack.c.bf16 %v6050_v23, %v6050_v23 }
 0x1d4   : > { %5187 = vmatprep.subr.bf16.mxu1 %v5688_v15  ;;  %5292 = vmatmul.mubr.msk.bf16.vlgmr.msra.gmra.mrb[108].mxu0 %vm1219_vm1, %v1103_v2 }
 0x1d5   : > { %5302 = vmatpush3.bf16.msra.mxu0 %v5577_v5  ;;  %5303 = vmatprep.mubr.msk.bf16.mxu0 %vm5689_vm0, %v5688_v15  ;;  %v5567_v5 = vld [vmem:[%s6923_s2 + $0xe0] sm:$0xff]  }
 0x1d6   : > { %5313 = vmatprep.subr.bf16.mxu0 %v5688_v15 }
 0x1d7   : > { %v6152_v6 = vpop.f32.mrb[76].mxu0 }
 0x1d8   : > { %v1022_v9 = vpop.f32.mrb[77].mxu0 }
 0x1d9   : > { %v1023_v11 = vpop.f32.mrb[78].mxu0 }
 0x1da   : > { %5184 = vmatmul.mubr.msk.bf16.vlgmr.msra.gmra.mrb[76].mxu1 %vm1219_vm1, %v1085_v7  ;;  %v1105_v12 = vpack.c.bf16 %v1023_v11, %v1023_v11  ;;  %v1025_v14 = vpop.f32.mrb[79].mxu0  ;;  %v1094_v11 = vpack.c.bf16 %v6074_v33, %v6074_v33 }
 0x1db   : > { %5188 = vmatpush3.bf16.msra.mxu1 %v5559_v1  ;;  %5189 = vmatprep.mubr.msk.bf16.mxu1 %vm5689_vm0, %v5688_v15 }
 0x1dc   : > { %5193 = vmatprep.subr.bf16.mxu1 %v5688_v15  ;;  %5304 = vmatmul.mubr.msk.bf16.vlgmr.msra.gmra.mrb[112].mxu0 %vm1219_vm1, %v1105_v12 }
 0x1dd   : > { %5314 = vmatpush3.bf16.msra.mxu0 %v5579_v16  ;;  %5315 = vmatprep.mubr.msk.bf16.mxu0 %vm5689_vm0, %v5688_v15 }
 0x1de   : > { %5325 = vmatprep.subr.bf16.mxu0 %v5688_v15 }
 0x1df   : > { %v6172_v19 = vpop.f32.mrb[80].mxu0 }
 0x1e0   : > { %v1030_v20 = vpop.f32.mrb[81].mxu0 }
 0x1e1   : > { %v1031_v22 = vpop.f32.mrb[82].mxu0 }
 0x1e2   : > { %5190 = vmatmul.mubr.msk.bf16.vlgmr.msra.gmra.mrb[80].mxu1 %vm1219_vm1, %v1086_v4  ;;  %v1107_v24 = vpack.c.bf16 %v1031_v22, %v1031_v22  ;;  %v1033_v25 = vpop.f32.mrb[83].mxu0  ;;  %v5568_v4 = vld [vmem:[%s6923_s2 + $0xe8] sm:$0xff]  }
 0x1e3   : > { %5194 = vmatpush3.bf16.msra.mxu1 %v5560_v18  ;;  %5195 = vmatprep.mubr.msk.bf16.mxu1 %vm5689_vm0, %v5688_v15 }
 0x1e4   : > { %5199 = vmatprep.subr.bf16.mxu1 %v5688_v15  ;;  %5316 = vmatmul.mubr.msk.bf16.vlgmr.msra.gmra.mrb[116].mxu0 %vm1219_vm1, %v1107_v24 }
 0x1e5   : > { %5326 = vmatpush3.bf16.msra.mxu0 %v5581_v27  ;;  %5327 = vmatprep.mubr.msk.bf16.mxu0 %vm5689_vm0, %v5688_v15  ;;  %v5569_v27 = vld [vmem:[%s6923_s2 + $0xf0] sm:$0xff]  }
 0x1e6   : > { %5337 = vmatprep.subr.bf16.mxu0 %v5688_v15 }
 0x1e7   : > { %v6188_v28 = vpop.f32.mrb[84].mxu0 }
 0x1e8   : > { %v1038_v31 = vpop.f32.mrb[85].mxu0 }
 0x1e9   : > { %v1039_v32 = vpop.f32.mrb[86].mxu0 }
 0x1ea   : > { %5196 = vmatmul.mubr.msk.bf16.vlgmr.msra.gmra.mrb[84].mxu1 %vm1219_vm1, %v1087_v30  ;;  %v1109_v34 = vpack.c.bf16 %v1039_v32, %v1039_v32  ;;  %v1041_v36 = vpop.f32.mrb[87].mxu0  ;;  %v1096_v32 = vpack.c.bf16 %v6085_v38, %v6085_v38 }
 0x1eb   : > { %5200 = vmatpush3.bf16.msra.mxu1 %v5561_v8  ;;  %5201 = vmatprep.mubr.msk.bf16.mxu1 %vm5689_vm0, %v5688_v15  ;;  %v1095_v8 = vpack.c.bf16 %v6076_v35, %v6076_v35  ;;  %v5570_v35 = vld [vmem:[%s6923_s2 + $0xf8] sm:$0xff]  }
 0x1ec   : > { %5205 = vmatprep.subr.bf16.mxu1 %v5688_v15  ;;  %5328 = vmatmul.mubr.msk.bf16.vlgmr.msra.gmra.mrb[120].mxu0 %vm1219_vm1, %v1109_v34 }
 0x1ed   : > { %5338 = vmatpush3.bf16.msra.mxu0 %v5583_v37  ;;  %5339 = vmatprep.mubr.msk.bf16.mxu0 %vm5689_vm0, %v5688_v15 }
 0x1ee   : > { %5349 = vmatprep.subr.bf16.mxu0 %v5688_v15 }
 0x1ef   : > { %v6208_v40 = vpop.f32.mrb[88].mxu0 }
 0x1f0   : > { %v1046_v42 = vpop.f32.mrb[89].mxu0 }
 0x1f1   : > { %v1047_v43 = vpop.f32.mrb[90].mxu0 }
 0x1f2   : > { %5202 = vmatmul.mubr.msk.bf16.vlgmr.msra.gmra.mrb[88].mxu1 %vm1219_vm1, %v1088_v10  ;;  %v1111_v44 = vpack.c.bf16 %v1047_v43, %v1047_v43  ;;  %v1049_v46 = vpop.f32.mrb[91].mxu0 }
 0x1f3   : > { %5206 = vmatpush3.bf16.msra.mxu1 %v5562_v39  ;;  %5207 = vmatprep.mubr.msk.bf16.mxu1 %vm5689_vm0, %v5688_v15 }
 0x1f4   : > { %5211 = vmatprep.subr.bf16.mxu1 %v5688_v15  ;;  %5340 = vmatmul.mubr.msk.bf16.vlgmr.msra.gmra.mrb[124].mxu0 %vm1219_vm1, %v1111_v44 }
 0x1f5   : > { %5350 = vmatpush3.bf16.msra.mxu0 %v5585_v47  ;;  %5351 = vmatprep.mubr.msk.bf16.mxu0 %vm5689_vm0, %v5688_v15  ;;  %v5571_v47 = vld [vmem:[%s6923_s2 + $0x100] sm:$0xff]  }
 0x1f6   : > { %5361 = vmatprep.subr.bf16.mxu0 %v5688_v15 }
 0x1f7   : > { %v6224_v48 = vpop.f32.mrb[92].mxu0 }
 0x1f8   : > { %v1054_v50 = vpop.f32.mrb[93].mxu0 }
 0x1f9   : > { %v1055_v51 = vpop.f32.mrb[94].mxu0 }
 0x1fa   : > { %5208 = vmatmul.mubr.msk.bf16.vlgmr.msra.gmra.mrb[92].mxu1 %vm1219_vm1, %v1089_v49  ;;  %v1113_v53 = vpack.c.bf16 %v1055_v51, %v1055_v51  ;;  %v1057_v54 = vpop.f32.mrb[95].mxu0  ;;  %v1098_v51 = vpack.c.bf16 %v6100_v45, %v6100_v45  ;;  %v1100_v45 = vpack.c.bf16 %v6116_v52, %v6116_v52  ;;  %v1102_v52 = vpack.c.bf16 %v6136_v61, %v6136_v61 }
 0x1fb   : > { %5212 = vmatpush3.bf16.msra.mxu1 %v5563_v13  ;;  %5213 = vmatprep.mubr.msk.bf16.mxu1 %vm5689_vm0, %v5688_v15  ;;  %v1097_v13 = vpack.c.bf16 %v6089_v41, %v6089_v41  ;;  %v5572_v41 = vld [vmem:[%s6923_s2 + $0x110] sm:$0xff]   ;;  %v1104_v61 = vpack.c.bf16 %v6152_v6, %v6152_v6  ;;  %v1106_v6 = vpack.c.bf16 %v6172_v19, %v6172_v19 }
 0x1fc   : > { %5217 = vmatprep.subr.bf16.mxu1 %v5688_v15  ;;  %5352 = vmatmul.mubr.msk.bf16.vlgmr.msra.gmra.mrb[128].mxu0 %vm1219_vm1, %v1113_v53  ;;  %v1108_v19 = vpack.c.bf16 %v6188_v28, %v6188_v28  ;;  %v1110_v28 = vpack.c.bf16 %v6208_v40, %v6208_v40  ;;  %v1112_v40 = vpack.c.bf16 %v6224_v48, %v6224_v48 }
 0x1fd   : > { %5365 = vmatprep.mubr.msk.bf16.mxu0 %vm5689_vm0, %v5688_v15 }
 0x1ff   : > { %v6240_v56 = vpop.f32.mrb[96].mxu0 }
 0x200   : > { %v1062_v57 = vpop.f32.mrb[97].mxu0  ;;  %v1114_v48 = vpack.c.bf16 %v6240_v56, %v6240_v56 }
 0x201   : > { %v1063_v58 = vpop.f32.mrb[98].mxu0 }
 0x202   : > { %5214 = vmatmul.mubr.msk.bf16.vlgmr.msra.gmra.mrb[96].mxu1 %vm1219_vm1, %v1090_v17  ;;  %v1064_v59 = vpop.f32.mrb[99].mxu0 }
 0x203   : > { %5218 = vmatpush3.bf16.msra.mxu1 %v5564_v55  ;;  %5219 = vmatprep.mubr.msk.bf16.mxu1 %vm5689_vm0, %v5688_v15 }
 0x204   : > { %5223 = vmatprep.subr.bf16.mxu1 %v5688_v15 }
 0x20a   : > { %5220 = vmatmul.mubr.msk.bf16.vlgmr.msra.gmra.mrb[100].mxu1 %vm1219_vm1, %v1091_v60 }
 0x20b   : > { %5224 = vmatpush3.bf16.msra.mxu1 %v5565_v21  ;;  %5225 = vmatprep.mubr.msk.bf16.mxu1 %vm5689_vm0, %v5688_v15 }
 0x20c   : > { %5229 = vmatprep.subr.bf16.mxu1 %v5688_v15 }
 0x212   : > { %5226 = vmatmul.mubr.msk.bf16.vlgmr.msra.gmra.mrb[104].mxu1 %vm1219_vm1, %v1092_v62 }
 0x213   : > { %5230 = vmatpush3.bf16.msra.mxu1 %v5566_v63  ;;  %5231 = vmatprep.mubr.msk.bf16.mxu1 %vm5689_vm0, %v5688_v15  ;;  %v5574_v63 = vld [vmem:[%s6923_s2 + $0x120] sm:$0xff]  }
 0x214   : > { %5235 = vmatprep.subr.bf16.mxu1 %v5688_v15 }
 0x215   : > { %v1257_v23 = vpop.f32.mrb[0].mxu1 }
 0x216   : > { %v5071_v2 = vpop.f32.mrb[1].mxu1  ;;  %v3616_v9 = vsel %vm3615_vm2, %v1257_v23, 0.0 }
 0x217   : > { %v1260_v3 = vpop.f32.mrb[2].mxu1 }
 0x218   : > { %v5072_v1 = vpop.f32.mrb[3].mxu1 }
 0x21a   : > { %5232 = vmatmul.mubr.msk.bf16.vlgmr.msra.gmra.mrb[108].mxu1 %vm1219_vm1, %v1093_v26 }
 0x21b   : > { %5236 = vmatpush3.bf16.msra.mxu1 %v5567_v5  ;;  %5237 = vmatprep.mubr.msk.bf16.mxu1 %vm5689_vm0, %v5688_v15 }
 0x21c   : > { %5241 = vmatprep.subr.bf16.mxu1 %v5688_v15 }
 0x21d   : > { %v1306_v7 = vpop.f32.mrb[4].mxu1 }
 0x21e   : > { %v3617_v12 = vsel %vm3615_vm2, %v1306_v7, 0.0  ;;  %v5077_v14 = vpop.f32.mrb[5].mxu1  ;;  %v5576_v7 = vld [vmem:[%s6923_s2 + $0x130] sm:$0xff]  }
 0x21f   : > { %v3618_v29 = vadd.f32 %v3617_v12, %v3616_v9  ;;  %v1309_v16 = vpop.f32.mrb[6].mxu1 }
 0x220   : > { %v5078_v18 = vpop.f32.mrb[7].mxu1 }
 0x222   : > { %5238 = vmatmul.mubr.msk.bf16.vlgmr.msra.gmra.mrb[112].mxu1 %vm1219_vm1, %v1094_v11 }
 0x223   : > { %5242 = vmatpush3.bf16.msra.mxu1 %v5568_v4  ;;  %5243 = vmatprep.mubr.msk.bf16.mxu1 %vm5689_vm0, %v5688_v15  ;;  %v5578_v4 = vld [vmem:[%s6923_s2 + $0x140] sm:$0xff]  }
 0x224   : > { %5247 = vmatprep.subr.bf16.mxu1 %v5688_v15 }
 0x225   : > { %v1355_v20 = vpop.f32.mrb[8].mxu1 }
 0x226   : > { %v3619_v33 = vsel %vm3615_vm2, %v1355_v20, 0.0  ;;  %v5083_v22 = vpop.f32.mrb[9].mxu1 }
 0x227   : > { %v3620_v24 = vadd.f32 %v3619_v33, %v3618_v29  ;;  %v1358_v25 = vpop.f32.mrb[10].mxu1 }
 0x228   : > { %v5084_v30 = vpop.f32.mrb[11].mxu1 }
 0x22a   : > { %5244 = vmatmul.mubr.msk.bf16.vlgmr.msra.gmra.mrb[116].mxu1 %vm1219_vm1, %v1095_v8 }
 0x22b   : > { %5248 = vmatpush3.bf16.msra.mxu1 %v5569_v27  ;;  %5249 = vmatprep.mubr.msk.bf16.mxu1 %vm5689_vm0, %v5688_v15  ;;  %v5580_v27 = vld [vmem:[%s6923_s2 + $0x150] sm:$0xff]  }
 0x22c   : > { %5253 = vmatprep.subr.bf16.mxu1 %v5688_v15 }
 0x22d   : > { %v1404_v31 = vpop.f32.mrb[12].mxu1 }
 0x22e   : > { %v3621_v34 = vsel %vm3615_vm2, %v1404_v31, 0.0  ;;  %v5089_v36 = vpop.f32.mrb[13].mxu1 }
 0x22f   : > { %v3622_v37 = vadd.f32 %v3621_v34, %v3620_v24  ;;  %v1407_v10 = vpop.f32.mrb[14].mxu1 }
 0x230   : > { %v5090_v39 = vpop.f32.mrb[15].mxu1 }
 0x232   : > { %5250 = vmatmul.mubr.msk.bf16.vlgmr.msra.gmra.mrb[120].mxu1 %vm1219_vm1, %v1096_v32 }
 0x233   : > { %5254 = vmatpush3.bf16.msra.mxu1 %v5570_v35  ;;  %5255 = vmatprep.mubr.msk.bf16.mxu1 %vm5689_vm0, %v5688_v15 }
 0x234   : > { %5259 = vmatprep.subr.bf16.mxu1 %v5688_v15 }
 0x235   : > { %v1453_v42 = vpop.f32.mrb[16].mxu1 }
 0x236   : > { %v3623_v38 = vsel %vm3615_vm2, %v1453_v42, 0.0  ;;  %v5095_v43 = vpop.f32.mrb[17].mxu1 }
 0x237   : > { %v3624_v44 = vadd.f32 %v3623_v38, %v3622_v37  ;;  %v1456_v46 = vpop.f32.mrb[18].mxu1  ;;  %v5582_v37 = vld [vmem:[%s6923_s2 + $0x160] sm:$0xff]  }
 0x238   : > { %v5096_v49 = vpop.f32.mrb[19].mxu1 }
 0x23a   : > { %5256 = vmatmul.mubr.msk.bf16.vlgmr.msra.gmra.mrb[124].mxu1 %vm1219_vm1, %v1097_v13 }
 0x23b   : > { %5260 = vmatpush3.bf16.msra.mxu1 %v5571_v47  ;;  %5261 = vmatprep.mubr.msk.bf16.mxu1 %vm5689_vm0, %v5688_v15 }
 0x23c   : > { %5271 = vmatprep.subr.bf16.mxu1 %v5688_v15 }
 0x23d   : > { %v1502_v50 = vpop.f32.mrb[20].mxu1 }
 0x23e   : > { %v3625_v53 = vsel %vm3615_vm2, %v1502_v50, 0.0  ;;  %v5101_v54 = vpop.f32.mrb[21].mxu1 }
 0x23f   : > { %v3626_v17 = vadd.f32 %v3625_v53, %v3624_v44  ;;  %v1505_v55 = vpop.f32.mrb[22].mxu1  ;;  %v5584_v44 = vld [vmem:[%s6923_s2 + $0x170] sm:$0xff]   ;;  %v5586_v53 = vld [vmem:[%s6923_s2 + $0x180] sm:$0xff]  }
 0x240   : > { %v5102_v57 = vpop.f32.mrb[23].mxu1 }
 0x242   : > { %5262 = vmatmul.mubr.msk.bf16.vlgmr.msra.gmra.mrb[128].mxu1 %vm1219_vm1, %v1098_v51 }
 0x243   : > { %5272 = vmatpush3.bf16.msra.mxu1 %v5572_v41  ;;  %5273 = vmatprep.mubr.msk.bf16.mxu1 %vm5689_vm0, %v5688_v15 }
 0x244   : > { %5283 = vmatprep.subr.bf16.mxu1 %v5688_v15 }
 0x245   : > { %v1551_v58 = vpop.f32.mrb[24].mxu1 }
 0x246   : > { %v3627_v59 = vsel %vm3615_vm2, %v1551_v58, 0.0  ;;  %v5107_v21 = vpop.f32.mrb[25].mxu1 }
 0x247   : > { %v3628_v60 = vadd.f32 %v3627_v59, %v3626_v17  ;;  %v1554_v62 = vpop.f32.mrb[26].mxu1 }
 0x248   : > { %v5108_v23 = vpop.f32.mrb[27].mxu1 }
 0x24a   : > { %5274 = vmatmul.mubr.msk.bf16.vlgmr.msra.gmra.mrb[132].mxu1 %vm1219_vm1, %v1100_v45 }
 0x24b   : > { %5284 = vmatpush3.bf16.msra.mxu1 %v5574_v63  ;;  %5285 = vmatprep.mubr.msk.bf16.mxu1 %vm5689_vm0, %v5688_v15 }
 0x24c   : > { %5295 = vmatprep.subr.bf16.mxu1 %v5688_v15 }
 0x24d   : > { %v1600_v2 = vpop.f32.mrb[28].mxu1 }
 0x24e   : > { %v3629_v3 = vsel %vm3615_vm2, %v1600_v2, 0.0  ;;  %v5113_v5 = vpop.f32.mrb[29].mxu1 }
 0x24f   : > { %v3630_v26 = vadd.f32 %v3629_v3, %v3628_v60  ;;  %v1603_v1 = vpop.f32.mrb[30].mxu1 }
 0x250   : > { %v5114_v9 = vpop.f32.mrb[31].mxu1 }
 0x252   : > { %5286 = vmatmul.mubr.msk.bf16.vlgmr.msra.gmra.mrb[136].mxu1 %vm1219_vm1, %v1102_v52 }
 0x253   : > { %5296 = vmatpush3.bf16.msra.mxu1 %v5576_v7  ;;  %5297 = vmatprep.mubr.msk.bf16.mxu1 %vm5689_vm0, %v5688_v15 }
 0x254   : > { %5307 = vmatprep.subr.bf16.mxu1 %v5688_v15 }
 0x255   : > { %v1649_v11 = vpop.f32.mrb[32].mxu1 }
 0x256   : > { %v3631_v12 = vsel %vm3615_vm2, %v1649_v11, 0.0  ;;  %v5119_v14 = vpop.f32.mrb[33].mxu1 }
 0x257   : > { %v3632_v29 = vadd.f32 %v3631_v12, %v3630_v26  ;;  %v1652_v16 = vpop.f32.mrb[34].mxu1 }
 0x258   : > { %v5120_v18 = vpop.f32.mrb[35].mxu1 }
 0x25a   : > { %5298 = vmatmul.mubr.msk.bf16.vlgmr.msra.gmra.mrb[140].mxu1 %vm1219_vm1, %v1104_v61 }
 0x25b   : > { %5308 = vmatpush3.bf16.msra.mxu1 %v5578_v4  ;;  %5309 = vmatprep.mubr.msk.bf16.mxu1 %vm5689_vm0, %v5688_v15 }
 0x25c   : > { %5319 = vmatprep.subr.bf16.mxu1 %v5688_v15 }
 0x25d   : > { %v1698_v20 = vpop.f32.mrb[36].mxu1 }
 0x25e   : > { %v3633_v33 = vsel %vm3615_vm2, %v1698_v20, 0.0  ;;  %v5125_v22 = vpop.f32.mrb[37].mxu1 }
 0x25f   : > { %v3634_v24 = vadd.f32 %v3633_v33, %v3632_v29  ;;  %v1701_v25 = vpop.f32.mrb[38].mxu1 }
 0x260   : > { %v5126_v8 = vpop.f32.mrb[39].mxu1 }
 0x262   : > { %5310 = vmatmul.mubr.msk.bf16.vlgmr.msra.gmra.mrb[144].mxu1 %vm1219_vm1, %v1106_v6 }
 0x263   : > { %5320 = vmatpush3.bf16.msra.mxu1 %v5580_v27  ;;  %5321 = vmatprep.mubr.msk.bf16.mxu1 %vm5689_vm0, %v5688_v15 }
 0x264   : > { %5331 = vmatprep.subr.bf16.mxu1 %v5688_v15 }
 0x265   : > { %v1747_v30 = vpop.f32.mrb[40].mxu1 }
 0x266   : > { %v3635_v31 = vsel %vm3615_vm2, %v1747_v30, 0.0  ;;  %v5131_v32 = vpop.f32.mrb[41].mxu1 }
 0x267   : > { %v3636_v34 = vadd.f32 %v3635_v31, %v3634_v24  ;;  %v1750_v36 = vpop.f32.mrb[42].mxu1 }
 0x268   : > { %v5132_v10 = vpop.f32.mrb[43].mxu1 }
 0x26a   : > { %5322 = vmatmul.mubr.msk.bf16.vlgmr.msra.gmra.mrb[148].mxu1 %vm1219_vm1, %v1108_v19 }
 0x26b   : > { %5332 = vmatpush3.bf16.msra.mxu1 %v5582_v37  ;;  %5333 = vmatprep.mubr.msk.bf16.mxu1 %vm5689_vm0, %v5688_v15 }
 0x26c   : > { %5343 = vmatprep.subr.bf16.mxu1 %v5688_v15 }
 0x26d   : > { %v1796_v35 = vpop.f32.mrb[44].mxu1 }
 0x26e   : > { %v3637_v39 = vsel %vm3615_vm2, %v1796_v35, 0.0  ;;  %v5137_v42 = vpop.f32.mrb[45].mxu1 }
 0x26f   : > { %v3638_v38 = vadd.f32 %v3637_v39, %v3636_v34  ;;  %v1799_v43 = vpop.f32.mrb[46].mxu1 }
 0x270   : > { %v5138_v46 = vpop.f32.mrb[47].mxu1 }
 0x272   : > { %5334 = vmatmul.mubr.msk.bf16.vlgmr.msra.gmra.mrb[152].mxu1 %vm1219_vm1, %v1110_v28 }
 0x273   : > { %5344 = vmatpush3.bf16.msra.mxu1 %v5584_v44  ;;  %5345 = vmatprep.mubr.msk.bf16.mxu1 %vm5689_vm0, %v5688_v15 }
 0x274   : > { %5355 = vmatprep.subr.bf16.mxu1 %v5688_v15 }
 0x275   : > { %v1845_v47 = vpop.f32.mrb[48].mxu1 }
 0x276   : > { %v3639_v13 = vsel %vm3615_vm2, %v1845_v47, 0.0  ;;  %v5143_v49 = vpop.f32.mrb[49].mxu1 }
 0x277   : > { %v3640_v50 = vadd.f32 %v3639_v13, %v3638_v38  ;;  %v1848_v51 = vpop.f32.mrb[50].mxu1 }
 0x278   : > { %v5144_v54 = vpop.f32.mrb[51].mxu1 }
 0x27a   : > { %5346 = vmatmul.mubr.msk.bf16.vlgmr.msra.gmra.mrb[156].mxu1 %vm1219_vm1, %v1112_v40 }
 0x27b   : > { %5356 = vmatpush3.bf16.msra.mxu1 %v5586_v53  ;;  %5357 = vmatprep.mubr.msk.bf16.mxu1 %vm5689_vm0, %v5688_v15 }
 0x27c   : > { %5369 = vmatprep.subr.bf16.mxu1 %v5688_v15 }
 0x27d   : > { %v1894_v17 = vpop.f32.mrb[52].mxu1 }
 0x27e   : > { %v3641_v55 = vsel %vm3615_vm2, %v1894_v17, 0.0  ;;  %v5149_v41 = vpop.f32.mrb[53].mxu1 }
 0x27f   : > { %v3642_v57 = vadd.f32 %v3641_v55, %v3640_v50  ;;  %v1897_v58 = vpop.f32.mrb[54].mxu1 }
 0x280   : > { %v5150_v45 = vpop.f32.mrb[55].mxu1 }
 0x282   : > { %5358 = vmatmul.mubr.msk.bf16.vlgmr.msra.gmra.mrb[160].mxu1 %vm1219_vm1, %v1114_v48  ;;  %vm4011_vm1 = vcmask 31744  }
 0x283   : > { %5373 = vmatprep.mubr.msk.bf16.mxu1 %vm5689_vm0, %v5688_v15 }
 0x285   : > { %v1943_v59 = vpop.f32.mrb[56].mxu1 }
 0x286   : > { %v3643_v21 = vsel %vm3615_vm2, %v1943_v59, 0.0  ;;  %v5155_v60 = vpop.f32.mrb[57].mxu1 }
 0x287   : > { %v3644_v62 = vadd.f32 %v3643_v21, %v3642_v57  ;;  %v1946_v63 = vpop.f32.mrb[58].mxu1 }
 0x288   : > { %v5156_v23 = vpop.f32.mrb[59].mxu1 }
 0x28d   : > { %v1992_v2 = vpop.f32.mrb[60].mxu1 }
 0x28e   : > { %v3645_v56 = vsel %vm3615_vm2, %v1992_v2, 0.0  ;;  %v5161_v52 = vpop.f32.mrb[61].mxu1 }
 0x28f   : > { %v3646_v3 = vadd.f32 %v3645_v56, %v3644_v62  ;;  %v1995_v5 = vpop.f32.mrb[62].mxu1 }
 0x290   : > { %v5162_v26 = vpop.f32.mrb[63].mxu1 }
 0x295   : > { %v2041_v1 = vpop.f32.mrb[64].mxu1 }
 0x296   : > { %v3647_v7 = vsel %vm3615_vm2, %v2041_v1, 0.0  ;;  %v5167_v9 = vpop.f32.mrb[65].mxu1 }
 0x297   : > { %v3648_v11 = vadd.f32 %v3647_v7, %v3646_v3  ;;  %v2044_v61 = vpop.f32.mrb[66].mxu1  ;;  %v6403_v12 = vpop.f32.mrb[100].mxu0 }
 0x298   : > { %v5168_v14 = vpop.f32.mrb[67].mxu1  ;;  %v5269_v29 = vpop.f32.mrb[101].mxu0 }
 0x299   : > { %v2877_v16 = vpop.f32.mrb[102].mxu0 }
 0x29a   : > { %v5270_v4 = vpop.f32.mrb[103].mxu0 }
 0x29d   : > { %v2090_v18 = vpop.f32.mrb[68].mxu1 }
 0x29e   : > { %v3649_v20 = vsel %vm3615_vm2, %v2090_v18, 0.0  ;;  %v5173_v6 = vpop.f32.mrb[69].mxu1 }
 0x29f   : > { %v3650_v33 = vadd.f32 %v3649_v20, %v3648_v11  ;;  %v2093_v22 = vpop.f32.mrb[70].mxu1  ;;  %v6406_v24 = vpop.f32.mrb[104].mxu0 }
 0x2a0   : > { %v5174_v25 = vpop.f32.mrb[71].mxu1  ;;  %v5281_v27 = vpop.f32.mrb[105].mxu0 }
 0x2a1   : > { %v2975_v8 = vpop.f32.mrb[106].mxu0 }
 0x2a2   : > { %v5282_v30 = vpop.f32.mrb[107].mxu0 }
 0x2a5   : > { %v2139_v19 = vpop.f32.mrb[72].mxu1 }
 0x2a6   : > { %v3651_v31 = vsel %vm3615_vm2, %v2139_v19, 0.0  ;;  %v5179_v32 = vpop.f32.mrb[73].mxu1 }
 0x2a7   : > { %v3652_v34 = vadd.f32 %v3651_v31, %v3650_v33  ;;  %v2142_v36 = vpop.f32.mrb[74].mxu1  ;;  %v6409_v37 = vpop.f32.mrb[108].mxu0 }
 0x2a8   : > { %v5180_v10 = vpop.f32.mrb[75].mxu1  ;;  %v5293_v35 = vpop.f32.mrb[109].mxu0 }
 0x2a9   : > { %v3073_v28 = vpop.f32.mrb[110].mxu0 }
 0x2aa   : > { %v5294_v39 = vpop.f32.mrb[111].mxu0  ;;  %v5588_v28 = vld [vmem:[%s6925_s4 + $0x8] sm:$0xff]  }
 0x2ad   : > { %v2188_v42 = vpop.f32.mrb[76].mxu1 }
 0x2ae   : > { %v3653_v38 = vsel %vm3615_vm2, %v2188_v42, 0.0  ;;  %v5185_v43 = vpop.f32.mrb[77].mxu1 }
 0x2af   : > { %v3654_v44 = vadd.f32 %v3653_v38, %v3652_v34  ;;  %v2191_v46 = vpop.f32.mrb[78].mxu1  ;;  %v6412_v47 = vpop.f32.mrb[112].mxu0  ;;  %v5587_v34 = vld [vmem:[%s6925_s4] sm:$0xff]  }
 0x2b0   : > { %v5186_v40 = vpop.f32.mrb[79].mxu1  ;;  %v5305_v13 = vpop.f32.mrb[113].mxu0  ;;  %5362 = vmatpush3.bf16.msra.mxu0 %v5587_v34  ;;  %v5589_v46 = vld [vmem:[%s6927_s6] sm:$0xff]   ;;  %v3681_v34 = vsel %vm3615_vm2, %v6403_v12, 0.0  ;;  %v3689_v12 = vsel %vm3615_vm2, %v6409_v37, 0.0 }
 0x2b1   : > { %v3171_v49 = vpop.f32.mrb[114].mxu0  ;;  %5363 = vmatprep.subr.bf16.mxu0 %v5688_v15  ;;  %v6442_v13 = vld [vmem:[%s408_s26] sm:$0xff]  ;;  %5370 = vmatpush3.bf16.msra.mxu1 %v5589_v46  ;;  %s5695_s26 = smov 112  }
 0x2b2   : > { %v5306_v50 = vpop.f32.mrb[115].mxu0  ;;  %3874 = vrot.lane.b32.xlu0 %v6442_v13, %s5690_s27  ;;  %5371 = vmatprep.subr.bf16.mxu1 %v5688_v15  ;;  %s6496_s27 = sshll.u32 %s5779_s17, 7  ;;  %s5696_s17 = smov 121  }
 0x2b3   : > { %s3911_s11 = sld [smem:[#allocation2 + %s6496_s27]]  ;;  %s3912_s28 = sadd.s32 1, %s6496_s27 }
 0x2b4   : > { %5364 = vmatpush3.bf16.msra.mxu0 %v5588_v28 }
 0x2b5   : > { %v2237_v51 = vpop.f32.mrb[80].mxu1 }
 0x2b6   : > { %v3655_v53 = vsel %vm3615_vm2, %v2237_v51, 0.0  ;;  %v5191_v54 = vpop.f32.mrb[81].mxu1 }
 0x2b7   : > { %v3656_v17 = vadd.f32 %v3655_v53, %v3654_v44  ;;  %v2240_v48 = vpop.f32.mrb[82].mxu1  ;;  %v6415_v55 = vpop.f32.mrb[116].mxu0 }
 0x2b8   : > { %v5192_v41 = vpop.f32.mrb[83].mxu1  ;;  %v5317_v57 = vpop.f32.mrb[117].mxu0  ;;  %v3697_v37 = vsel %vm3615_vm2, %v6415_v55, 0.0 }
 0x2b9   : > { %v3269_v58 = vpop.f32.mrb[118].mxu0 }
 0x2ba   : > { %v5318_v45 = vpop.f32.mrb[119].mxu0 }
 0x2bd   : > { %v2286_v59 = vpop.f32.mrb[84].mxu1 }
 0x2be   : > { %v3657_v21 = vsel %vm3615_vm2, %v2286_v59, 0.0  ;;  %v5197_v60 = vpop.f32.mrb[85].mxu1 }
 0x2bf   : > { %v3658_v62 = vadd.f32 %v3657_v21, %v3656_v17  ;;  %v2289_v63 = vpop.f32.mrb[86].mxu1  ;;  %v6418_v23 = vpop.f32.mrb[120].mxu0 }
 0x2c0   : > { %v5198_v2 = vpop.f32.mrb[87].mxu1  ;;  %v5329_v56 = vpop.f32.mrb[121].mxu0 }
 0x2c1   : > { %v3367_v52 = vpop.f32.mrb[122].mxu0 }
 0x2c2   : > { %v5330_v3 = vpop.f32.mrb[123].mxu0 }
 0x2c5   : > { %v2335_v5 = vpop.f32.mrb[88].mxu1 }
 0x2c6   : > { %v3659_v26 = vsel %vm3615_vm2, %v2335_v5, 0.0  ;;  %v5203_v1 = vpop.f32.mrb[89].mxu1 }
 0x2c7   : > { %v3660_v7 = vadd.f32 %v3659_v26, %v3658_v62  ;;  %v2338_v9 = vpop.f32.mrb[90].mxu1  ;;  %v6421_v11 = vpop.f32.mrb[124].mxu0 }
 0x2c8   : > { %v5204_v61 = vpop.f32.mrb[91].mxu1  ;;  %v5341_v14 = vpop.f32.mrb[125].mxu0  ;;  %v3705_v55 = vsel %vm3615_vm2, %v6421_v11, 0.0  ;;  %v4929_v11 = vld [vmem:[%s6924_s3] ss:$0 sm:$0xff] }
 0x2c9   : > { %v3465_v29 = vpop.f32.mrb[126].mxu0 }
 0x2ca   : > { %v5342_v16 = vpop.f32.mrb[127].mxu0 }
 0x2cd   : > { %v2384_v4 = vpop.f32.mrb[92].mxu1 }
 0x2ce   : > { %v3661_v18 = vsel %vm3615_vm2, %v2384_v4, 0.0  ;;  %v5209_v20 = vpop.f32.mrb[93].mxu1 }
 0x2cf   : > { %v3662_v6 = vadd.f32 %v3661_v18, %v3660_v7  ;;  %v2387_v33 = vpop.f32.mrb[94].mxu1  ;;  %v6424_v22 = vpop.f32.mrb[128].mxu0 }
 0x2d0   : > { %v5210_v25 = vpop.f32.mrb[95].mxu1  ;;  %v5353_v27 = vpop.f32.mrb[129].mxu0 }
 0x2d1   : > { %v3563_v8 = vpop.f32.mrb[130].mxu0 }
 0x2d2   : > { %v5354_v30 = vpop.f32.mrb[131].mxu0 }
 0x2d5   : > { %v2433_v19 = vpop.f32.mrb[96].mxu1 }
 0x2d6   : > { %v3663_v31 = vsel %vm3615_vm2, %v2433_v19, 0.0  ;;  %v5215_v32 = vpop.f32.mrb[97].mxu1 }
 0x2d7   : > { %v3664_v36 = vadd.f32 %v3663_v31, %v3662_v6  ;;  %v2436_v10 = vpop.f32.mrb[98].mxu1 }
 0x2d8   : > { %v5216_v35 = vpop.f32.mrb[99].mxu1 }
 0x2dd   : > { %v2482_v39 = vpop.f32.mrb[100].mxu1 }
 0x2de   : > { %v3665_v42 = vsel %vm3615_vm2, %v2482_v39, 0.0  ;;  %v5221_v38 = vpop.f32.mrb[101].mxu1 }
 0x2df   : > { %v3666_v43 = vadd.f32 %v3665_v42, %v3664_v36  ;;  %v2485_v44 = vpop.f32.mrb[102].mxu1 }
 0x2e0   : > { %v5222_v40 = vpop.f32.mrb[103].mxu1 }
 0x2e5   : > { %v2531_v49 = vpop.f32.mrb[104].mxu1 }
 0x2e6   : > { %v3667_v50 = vsel %vm3615_vm2, %v2531_v49, 0.0  ;;  %v5227_v51 = vpop.f32.mrb[105].mxu1 }
 0x2e7   : > { %v3668_v53 = vadd.f32 %v3667_v50, %v3666_v43  ;;  %v2534_v54 = vpop.f32.mrb[106].mxu1  ;;  %v3685_v43 = vsel %vm3615_vm2, %v6406_v24, 0.0  ;;  %v3693_v24 = vsel %vm3615_vm2, %v6412_v47, 0.0  ;;  %v3701_v47 = vsel %vm3615_vm2, %v6418_v23, 0.0 }
 0x2e8   : > { %v5228_v17 = vpop.f32.mrb[107].mxu1  ;;  %v3709_v23 = vsel %vm3615_vm2, %v6424_v22, 0.0 }
 0x2ed   : > { %v2580_v48 = vpop.f32.mrb[108].mxu1 }
 0x2ee   : > { %v3669_v41 = vsel %vm3615_vm2, %v2580_v48, 0.0  ;;  %v5233_v57 = vpop.f32.mrb[109].mxu1 }
 0x2ef   : > { %v3670_v58 = vadd.f32 %v3669_v41, %v3668_v53  ;;  %v2583_v45 = vpop.f32.mrb[110].mxu1 }
 0x2f0   : > { %v5234_v59 = vpop.f32.mrb[111].mxu1 }
 0x2f5   : > { %v2629_v21 = vpop.f32.mrb[112].mxu1 }
 0x2f6   : > { %v3671_v60 = vsel %vm3615_vm2, %v2629_v21, 0.0  ;;  %v5239_v62 = vpop.f32.mrb[113].mxu1 }
 0x2f7   : > { %v3672_v63 = vadd.f32 %v3671_v60, %v3670_v58  ;;  %v2632_v2 = vpop.f32.mrb[114].mxu1 }
 0x2f8   : > { %v5240_v56 = vpop.f32.mrb[115].mxu1 }
 0x2fd   : > { %v2678_v52 = vpop.f32.mrb[116].mxu1 }
 0x2fe   : > { %v3673_v3 = vsel %vm3615_vm2, %v2678_v52, 0.0  ;;  %v5245_v5 = vpop.f32.mrb[117].mxu1 }
 0x2ff   : > { %v3674_v26 = vadd.f32 %v3673_v3, %v3672_v63  ;;  %v2681_v1 = vpop.f32.mrb[118].mxu1 }
 0x300   : > { %v5246_v7 = vpop.f32.mrb[119].mxu1 }
 0x305   : > { %v2727_v9 = vpop.f32.mrb[120].mxu1 }
 0x306   : > { %v3675_v61 = vsel %vm3615_vm2, %v2727_v9, 0.0  ;;  %v5251_v14 = vpop.f32.mrb[121].mxu1 }
 0x307   : > { %v3676_v29 = vadd.f32 %v3675_v61, %v3674_v26  ;;  %v2730_v16 = vpop.f32.mrb[122].mxu1 }
 0x308   : > { %v5252_v4 = vpop.f32.mrb[123].mxu1 }
 0x30d   : > { %v2776_v18 = vpop.f32.mrb[124].mxu1 }
 0x30e   : > { %v3677_v20 = vsel %vm3615_vm2, %v2776_v18, 0.0  ;;  %v5257_v6 = vpop.f32.mrb[125].mxu1 }
 0x30f   : > { %v3678_v33 = vadd.f32 %v3677_v20, %v3676_v29  ;;  %v2779_v25 = vpop.f32.mrb[126].mxu1 }
 0x310   : > { %v5258_v27 = vpop.f32.mrb[127].mxu1 }
 0x315   : > { %v2825_v8 = vpop.f32.mrb[128].mxu1 }
 0x316   : > { %v3679_v30 = vsel %vm3615_vm2, %v2825_v8, 0.0  ;;  %v5263_v19 = vpop.f32.mrb[129].mxu1 }
 0x317   : > { %v3680_v31 = vadd.f32 %v3679_v30, %v3678_v33  ;;  %v2828_v32 = vpop.f32.mrb[130].mxu1 }
 0x318   : > { %v5264_v36 = vpop.f32.mrb[131].mxu1 }
 0x319   : > { %v3682_v10 = vadd.f32 %v3681_v34, %v3680_v31 }
 0x31d   : > { %v2923_v35 = vpop.f32.mrb[132].mxu1 }
 0x31e   : > { %v3683_v28 = vsel %vm3615_vm2, %v2923_v35, 0.0  ;;  %v5275_v39 = vpop.f32.mrb[133].mxu1 }
 0x31f   : > { %v3684_v42 = vadd.f32 %v3683_v28, %v3682_v10  ;;  %v2926_v38 = vpop.f32.mrb[134].mxu1 }
 0x320   : > { %v5276_v44 = vpop.f32.mrb[135].mxu1 }
 0x321   : > { %v3686_v46 = vadd.f32 %v3685_v43, %v3684_v42 }
 0x324   : > { %v3875_v34 = vpop.permute.xlu0 %3874 }
 0x325   : > { %v3021_v40 = vpop.f32.mrb[136].mxu1  ;;  %v3877_v10 = vsub.f32 %v6442_v13, %v3875_v34 }
 0x326   : > { %v3687_v49 = vsel %vm3615_vm2, %v3021_v40, 0.0  ;;  %v5287_v50 = vpop.f32.mrb[137].mxu1  ;;  %v5590_v40 = vld [vmem:[%s6927_s6 + $0x8] sm:$0xff]  }
 0x327   : > { %v3688_v51 = vadd.f32 %v3687_v49, %v3686_v46  ;;  %v3024_v53 = vpop.f32.mrb[138].mxu1  ;;  %v3878_v38 = vmul.f32 0.5, %v3877_v10  ;;  %5372 = vmatpush3.bf16.msra.mxu1 %v5590_v40  ;;  %v5692_v49 = vmov 2   ;;  %v5693_v50 = vmov 1  }
 0x328   : > { %v5288_v54 = vpop.f32.mrb[139].mxu1  ;;  %5443 = vset.pattern.permute.xlu1 %v5692_v49  ;;  %5447 = vset.pattern.permute.xlu0 %v5693_v50  ;;  %v3953_v49 = vlaneseq }
 0x329   : > { %v3690_v17 = vadd.f32 %v3689_v12, %v3688_v51  ;;  %3880 = vrot.lane.b32.xlu0 %v3878_v38, %s5691_s29  ;;  %3886 = vperm.xlu1 %5443, %v3877_v10   ;;  %v5694_v51 = vmov 3   ;;  %v4930_v54 = vld [vmem:[%s6926_s5] ss:$0 sm:$0xff]  ;;  %s3913_s29 = sld [smem:[#allocation2 + %s3912_s28]] }
 0x32d   : > { %v3119_v48 = vpop.f32.mrb[140].mxu1  ;;  %5444 = vset.pattern.permute.xlu1 %v5694_v51  ;;  %v6525_v51 = vshrl.u32 %v3953_v49, 7 }
 0x32e   : > { %v3691_v41 = vsel %vm3615_vm2, %v3119_v48, 0.0  ;;  %v5299_v57 = vpop.f32.mrb[141].mxu1  ;;  %3897 = vperm.xlu1 %5444, %v3877_v10  }
 0x32f   : > { %v3692_v58 = vadd.f32 %v3691_v41, %v3690_v17  ;;  %v3122_v45 = vpop.f32.mrb[142].mxu1 }
 0x330   : > { %v5300_v59 = vpop.f32.mrb[143].mxu1 }
 0x331   : > { %v3694_v21 = vadd.f32 %v3693_v24, %v3692_v58 }
 0x332   : > { %5445 = vset.pattern.permute.xlu1 %v5687_v0 }
 0x335   : > { %v3217_v60 = vpop.f32.mrb[144].mxu1 }
 0x336   : > { %v3695_v62 = vsel %vm3615_vm2, %v3217_v60, 0.0  ;;  %v5311_v63 = vpop.f32.mrb[145].mxu1 }
 0x337   : > { %v3696_v2 = vadd.f32 %v3695_v62, %v3694_v21  ;;  %v3220_v56 = vpop.f32.mrb[146].mxu1 }
 0x338   : > { %v5312_v52 = vpop.f32.mrb[147].mxu1 }
 0x339   : > { %v3698_v3 = vadd.f32 %v3697_v37, %v3696_v2 }
 0x33d   : > { %v3315_v5 = vpop.f32.mrb[148].mxu1 }
 0x33e   : > { %v3699_v26 = vsel %vm3615_vm2, %v3315_v5, 0.0  ;;  %v5323_v1 = vpop.f32.mrb[149].mxu1 }
 0x33f   : > { %v3700_v7 = vadd.f32 %v3699_v26, %v3698_v3  ;;  %v3318_v9 = vpop.f32.mrb[150].mxu1 }
 0x340   : > { %v5324_v61 = vpop.f32.mrb[151].mxu1 }
 0x341   : > { %v3702_v14 = vadd.f32 %v3701_v47, %v3700_v7 }
 0x345   : > { %v3413_v29 = vpop.f32.mrb[152].mxu1 }
 0x346   : > { %v3703_v16 = vsel %vm3615_vm2, %v3413_v29, 0.0  ;;  %v5335_v4 = vpop.f32.mrb[153].mxu1 }
 0x347   : > { %v3704_v18 = vadd.f32 %v3703_v16, %v3702_v14  ;;  %v3416_v20 = vpop.f32.mrb[154].mxu1 }
 0x348   : > { %v5336_v6 = vpop.f32.mrb[155].mxu1 }
 0x349   : > { %v3706_v33 = vadd.f32 %v3705_v55, %v3704_v18  ;;  %v3921_v6 = vstv %s3911_s11 }
 0x34d   : > { %v3511_v25 = vpop.f32.mrb[156].mxu1 }
 0x34e   : > { %v3707_v27 = vsel %vm3615_vm2, %v3511_v25, 0.0  ;;  %v5347_v8 = vpop.f32.mrb[157].mxu1 }
 0x34f   : > { %v3708_v30 = vadd.f32 %v3707_v27, %v3706_v33  ;;  %v3514_v19 = vpop.f32.mrb[158].mxu1 }
 0x350   : > { %v5348_v31 = vpop.f32.mrb[159].mxu1 }
 0x351   : > { %v3710_v32 = vadd.f32 %v3709_v23, %v3708_v30 }
 0x355   : > { %v3609_v36 = vpop.f32.mrb[160].mxu1 }
 0x356   : > { %v3711_v35 = vsel %vm3615_vm2, %v3609_v36, 0.0  ;;  %v5359_v28 = vpop.f32.mrb[161].mxu1 }
 0x357   : > { %v3712_v39 = vadd.f32 %v3711_v35, %v3710_v32  ;;  %v3612_v42 = vpop.f32.mrb[162].mxu1 }
 0x358   : > { %v5360_v43 = vpop.f32.mrb[163].mxu1 }
 0x359   : > { %v3720_v44 = vadd.f32 %v4929_v11, %v3712_v39  ;;  %v3930_v43 = vstv %s3913_s29  ;;  %s6879_s29 = scalar_lea.hbm %s6931_s10, %s6496_s27 }
 0x35b   : > { %v3721_v22 = vmax.f32 %v3720_v44, 0.0 }
 0x35d   : > { %v3722_v46 = vpack.c.bf16 %v3721_v22, %v3721_v22 }
 0x35f   : > { %5366 = vmatmul.mubr.msk.bf16.vlgmr.msra.gmra.mrb[132].mxu0 %vm3615_vm2, %v3722_v46 }
 0x39b   : > { %v3881_v53 = vpop.permute.xlu0 %3880 }
 0x39c   : > { %v3883_v12 = vadd.f32 %v3881_v53, %v6442_v13  ;;  %v4934_v13 = vld [vmem:[%s6928_s7] ss:$0 sm:$0xff] }
 0x39e   : > { %3892 = vperm.xlu1 %5445, %v3883_v12  }
 0x3a2   : > { %5446 = vset.pattern.permute.xlu1 %v5693_v50  ;;  %v6523_v50 = vand.u32 127, %v3953_v49 }
 0x3a3   : > { %3902 = vperm.xlu1 %5446, %v3883_v12   ;;  %v3958_v12 = vcvt.s32.f32 %v6525_v51 }
 0x3a4   : > { %v6528_v53 = vcvt.s32.f32 %v6523_v50 }
 0x3a8   : > { %v3887_v3 = vpop.permute.xlu1 %3886 }
 0x3ad   : > { %v3898_v1 = vpop.permute.xlu1 %3897 }
 0x41d   : > { %v3893_v61 = vpop.permute.xlu1 %3892 }
 0x422   : > { %v3903_v16 = vpop.permute.xlu1 %3902 }
 0x432   : > { %v3783_v17 = vpop.f32.mrb[132].mxu0 }
 0x433   : > { %v3784_v48 = vadd.f32 %v4930_v54, %v3783_v17  ;;  %v5367_v41 = vpop.f32.mrb[133].mxu0  ;;  %v3959_v54 = vmul.f32 4.0, %v3958_v12 }
 0x434   : > { %v3786_v57 = vpop.f32.mrb[134].mxu0 }
 0x435   : > { %v3789_v58 = vmax.f32 %v3784_v48, 0.0  ;;  %v5368_v45 = vpop.f32.mrb[135].mxu0  ;;  %v6532_v17 = vadd.f32 %v3959_v54, %v6528_v53 }
 0x437   : > { %v3790_v24 = vpack.c.bf16 %v3789_v58, %v3789_v58 }
 0x439   : > { %5374 = vmatmul.mubr.msk.bf16.vlgmr.msra.gmra.mrb[164].mxu1 %vm3615_vm2, %v3790_v24 }
 0x50c   : > { %v3851_v59 = vpop.f32.mrb[164].mxu1 }
 0x50d   : > { %v3852_v21 = vadd.f32 %v4934_v13, %v3851_v59  ;;  %v5375_v60 = vpop.f32.mrb[165].mxu1 }
 0x50e   : > { %v3854_v62 = vpop.f32.mrb[166].mxu1 }
 0x50f   : > { %v3870_v63 = vmul.f32 0.2, %v3852_v21  ;;  %v5376_v2 = vpop.f32.mrb[167].mxu1  ;;  %v3858_v56 = vsel %vm3857_vm3, %v3852_v21, -inf  ;;  %v3869_v14 = vmul.f32 0.1, %v3852_v21 }
 0x510   : > { %3859 = vmax.xlane.f32.xlu0 %v3858_v56 }
 0x511   : > { %v3871_v37 = vmin.f32 %v3870_v63, 4.1351666  ;;  %v3889_v29 = vmul.f32 %v3887_v3, %v3869_v14  ;;  %v3900_v34 = vmul.f32 %v3898_v1, %v3869_v14 }
 0x513   : > { %v3906_v52 = vmul.f32 1.442695, %v3871_v37  ;;  %v3895_v4 = vadd.f32 %v3893_v61, %v3889_v29  ;;  %v3905_v10 = vadd.f32 %v3903_v16, %v3900_v34 }
 0x515   : > { %5591 = vpow2.f32 %v3906_v52 }
 0x51f   : > { %v5592_v5 = vpop.eup %5591 }
 0x520   : > { %v3908_v26 = vmul.f32 %v5592_v5, %v3887_v3  ;;  %v3909_v9 = vmul.f32 %v5592_v5, %v3898_v1 }
 0x522   : > { %v3914_v7 = vmul.f32 0.5, %v3908_v26  ;;  %v3923_v47 = vmul.f32 0.5, %v3909_v9 }
 0x524   : > { %3916 = vrot.lane.b32.xlu1 %v3914_v7, %s5695_s26 }
 0x528   : > { %3925 = vrot.lane.b32.xlu1 %v3923_v47, %s5695_s26  ;;  %s394_s26 = scalar_lea.vmem [#allocation5], %s4760_s25 }
 0x529   : > { %s4659_s11 = sshll.u32 %s394_s26, 4  ;;  %s6881_s11 = int_to_ptr.vmem [resolvable:$true] %s4659_s11 }
 0x596   : > { %v3917_v18 = vpop.permute.xlu1 %3916 }
 0x597   : > { %v3919_v20 = vsub.f32 %v3895_v4, %v3917_v18  ;;  %v3932_v55 = vadd.f32 %v3917_v18, %v3895_v4 }
 0x599   : > { %v3920_v33 = vmax.f32 %v3919_v20, 0.0  ;;  %v3933_v25 = vmax.f32 %v3932_v55, 0.0 }
 0x59a   : > { %v3926_v36 = vpop.permute.xlu1 %3925 }
 0x59b   : > { %v6499_v27 = vmin.f32 %v3921_v6, %v3920_v33  ;;  %v6501_v8 = vmin.f32 %v3921_v6, %v3933_v25  ;;  %v3928_v35 = vsub.f32 %v3905_v10, %v3926_v36  ;;  %v3935_v11 = vadd.f32 %v3926_v36, %v3905_v10 }
 0x59d   : > { %v3860_v30 = vpop.xlane.xlu0 %3859  ;;  %v6505_v19 = vsub.f32 %v6501_v8, %v6499_v27  ;;  %v3929_v42 = vmax.f32 %v3928_v35, 0.0  ;;  %v3936_v38 = vmax.f32 %v3935_v11, 0.0 }
 0x59e   : > { %v3861_v23 = vsub.f32 %v3852_v21, %v3860_v30 }
 0x59f   : > { %vm3941_vm4 = vcmp.ge.f32.partialorder %v6505_v19, 0.01  ;;  %v6512_v44 = vmin.f32 %v3930_v43, %v3929_v42  ;;  %v6514_v22 = vmin.f32 %v3930_v43, %v3936_v38 }
 0x5a0   : > { %v3862_v31 = vmul.f32 1.442695, %v3861_v23  ;;  %v3942_v32 = vsel %vm3941_vm4, 1, %v5687_v0  ;;  %vm4552_vm4 = vcmp.eq.s32.totalorder %v6523_v50, 1 }
 0x5a1   : > { %3943 = vrot.lane.b32.xlu0 %v3942_v32, %s5696_s17  ;;  %v6518_v46 = vsub.f32 %v6514_v22, %v6512_v44 }
 0x5a2   : > { %5593 = vpow2.f32 %v3862_v31 }
 0x5a3   : > { %vm3947_vm5 = vcmp.ge.f32.partialorder %v6518_v46, 0.01 }
 0x5a4   : > { %v3948_v40 = vsel %vm3947_vm5, 1, %v5687_v0  ;;  %vm4557_vm5 = vcmp.eq.s32.totalorder %v6523_v50, 2 }
 0x5ac   : > { %v5594_v28 = vpop.eup %5593 }
 0x5ad   : > { %v3864_v39 = vsel %vm3857_vm3, %v5594_v28, 0.0  ;;  %vm4547_vm3 = vcmp.eq.s32.totalorder %v6523_v50, 0 }
 0x5ae   : > { %3865 = vadd.xlane.f32.xlu1 %v3864_v39 }
 0x5bf   : > { %3949 = vrot.lane.b32.xlu1 %v3948_v40, %s5697_s30 }
 0x5c3   : > { %3981 = vrot.lane.b32.xlu1 %v6532_v17, %s5698_s12 }
 0x613   : > { %v3944_v57 = vpop.permute.xlu0 %3943 }
 0x614   : > { %vm3945_vm6 = vcmp.ne.s32.totalorder %v3944_v57, 0 }
 0x63b   : > { %v3866_v48 = vpop.xlane.xlu1 %3865 }
 0x63c   : > { %5595 = vrcp.f32 %v3866_v48 }
 0x63f   : > { %v3950_v45 = vpop.permute.xlu1 %3949 }
 0x640   : > { %vm3951_vm9 = vcmp.ne.s32.totalorder %v3950_v45, 0 }
 0x643   : > { %v6549_v52 = vpop.permute.xlu1 %3981 }
 0x646   : > { %v5596_v41 = vpop.eup %5595 }
 0x647   : > { %v6536_v58 = vmul.f32 %v5596_v41, %v5594_v28 }
 0x649   : > { %vm3940_vm7 = vcmp.gt.f32.partialorder %v6536_v58, 0.05 }
 0x64a   : > { %vm3946_vm8 = vmand %vm3940_vm7, %vm3945_vm6  ;;  %vm4562_vm6 = vcmp.eq.s32.totalorder %v6523_v50, 3  ;;  %vm4567_vm7 = vcmp.eq.s32.totalorder %v6523_v50, 4 }
 0x64b   : > { %vm6539_vm11 = vmand %vm3946_vm8, %vm3951_vm9 }
 0x64c   : > { %v3966_v13 = vsel %vm6539_vm11, %v6536_v58, -1.0 }
 0x64d   : > { %v3968_v59 = vsel %vm3967_vm10, %v3966_v13, -inf }
 0x64e   : > { %3969 = vmax.xlane.f32.xlu0 %v3968_v59 }
 0x6db   : > { %v3970_v21 = vpop.xlane.xlu0 %3969 }
 0x6dc   : > { %v3971_v60 = vrot.slane %v3970_v21, 4 }
 0x6de   : > { %v3972_v62 = vmax.f32 %v3970_v21, %v3971_v60 }
 0x6e0   : > { %v3973_v63 = vrot.slane %v3972_v62, 2 }
 0x6e2   : > { %v3974_v2 = vmax.f32 %v3972_v62, %v3973_v63 }
 0x6e4   : > { %v3975_v56 = vrot.slane %v3974_v2, 1 }
 0x6e6   : > { %v6547_v37 = vmax.f32 %v3974_v2, %v3975_v56 }
 0x6e8   : > { %vm3978_vm12 = vcmp.ge.f32.partialorder %v3966_v13, %v6547_v37  ;;  %vm3977_vm2 = vcmp.gt.f32.partialorder %v6547_v37, 0.0 }
 0x6e9   : > { %vm6554_vm13 = vmand %vm6539_vm11, %vm3978_vm12  ;;  %vm4572_vm12 = vcmp.eq.s32.totalorder %v6523_v50, 5 }
 0x6ea   : > { %v3984_v5 = vsel %vm6554_vm13, %v6549_v52, 1e+09 }
 0x6eb   : > { %v3985_v26 = vsel %vm3967_vm10, %v3984_v5, inf }
 0x6ec   : > { %3986 = vmin.xlane.f32.xlu1 %v3985_v26 }
 0x6fd   : > { %4058 = vrot.lane.b32.xlu1 %v6514_v22, %s5697_s30 }
 0x779   : > { %v3987_v1 = vpop.xlane.xlu1 %3986 }
 0x77a   : > { %v3988_v7 = vrot.slane %v3987_v1, 4 }
 0x77c   : > { %v3989_v9 = vmin.f32 %v3987_v1, %v3988_v7 }
 0x77d   : > { %v6580_v6 = vpop.permute.xlu1 %4058 }
 0x77e   : > { %v3990_v47 = vrot.slane %v3989_v9, 2 }
 0x780   : > { %v3991_v61 = vmin.f32 %v3989_v9, %v3990_v47 }
 0x782   : > { %v3992_v14 = vrot.slane %v3991_v61, 1 }
 0x784   : > { %v3993_v29 = vmin.f32 %v3991_v61, %v3992_v14 }
 0x786   : > { %vm3994_vm14 = vcmp.eq.f32.partialorder %v6532_v17, %v3993_v29  ;;  %v6612_v29 = vsel %vm3977_vm2, 1.0, %v5688_v15 }
 0x787   : > { %v3995_v16 = vsel %vm3994_vm14, 1, %v5687_v0 }
 0x788   : > { %3996 = vrot.lane.b32.xlu0 %v3995_v16, %s5698_s12 }
 0x78c   : > { %4022 = vrot.lane.b32.xlu0 %v6512_v44, %s5697_s30  ;;  %s4646_s30 = scalar_lea.sflag [#allocation3], %s392_s21 }
 0x790   : > { %4003 = vrot.lane.b32.xlu0 %v6499_v27, %s5696_s17 }
 0x794   : > { %4040 = vrot.lane.b32.xlu0 %v6501_v8, %s5696_s17 }
 0x7fa   : > { %v3997_v4 = vpop.permute.xlu0 %3996 }
 0x7fb   : > { %vm3998_vm15 = vcmp.ne.s32.totalorder %v3997_v4, 0 }
 0x7fc   : > { %vm3999_vm0 = vmand %vm6554_vm13, %vm3998_vm15 }
 0x7fd   : > { %v4939_v18 = vsel %vm3999_vm0, 1.0, %v5688_v15 }
 0x7fe   : > { %v6576_v20 = vpop.permute.xlu0 %4022  ;;  %v4061_v25 = vmul.f32 %v4939_v18, %v6580_v6 }
 0x7ff   : > { %v4025_v55 = vmul.f32 %v4939_v18, %v6576_v20 }
 0x801   : > { %4027 = vrot.lane.b32.xlu0 %v4025_v55, %s5699_s18 }
 0x802   : > { %v6582_v33 = vpop.permute.xlu0 %4003 }
 0x803   : > { %v4006_v31 = vmul.f32 %v4939_v18, %v6582_v33 }
 0x805   : > { %4063 = vrot.lane.b32.xlu0 %v4061_v25, %s5699_s18  ;;  %v6616_v25 = vsel %vm4547_vm3, 1.0, %v5688_v15  ;;  %vm5701_vm3 = vmmov 1  }
 0x806   : > { %v6586_v30 = vpop.permute.xlu0 %4040 }
 0x807   : > { %v4043_v23 = vmul.f32 %v4939_v18, %v6586_v30 }
 0x809   : > { %4045 = vrot.lane.b32.xlu1 %v4043_v23, %s5699_s18  ;;  %4008 = vrot.lane.b32.xlu0 %v4006_v31, %s5699_s18  ;;  %v6619_v23 = vsel %vm4552_vm4, 1.0, %v5688_v15 }
 0x873   : > { %v4028_v32 = vpop.permute.xlu0 %4027 }
 0x874   : > { %v4030_v34 = vsel %vm4011_vm1, %v4028_v32, 0.0 }
 0x875   : > { %4031 = vadd.xlane.f32.xlu0 %v4030_v34 }
 0x877   : > { %v4064_v36 = vpop.permute.xlu0 %4063 }
 0x878   : > { %v4066_v10 = vsel %vm4011_vm1, %v4064_v36, 0.0  ;;  %v4136_v36 = vmax.f32 %v6547_v37, 0.0 }
 0x879   : > { %4067 = vadd.xlane.f32.xlu1 %v4066_v10 }
 0x87b   : > { %v4009_v35 = vpop.permute.xlu0 %4008  ;;  %v4046_v28 = vpop.permute.xlu1 %4045 }
 0x87c   : > { %v4012_v11 = vsel %vm4011_vm1, %v4009_v35, 0.0  ;;  %v4048_v39 = vsel %vm4011_vm1, %v4046_v28, 0.0  ;;  %v6629_v28 = vsel %vm4557_vm5, 1.0, %v5688_v15 }
 0x87d   : > { %4013 = vadd.xlane.f32.xlu1 %v4012_v11 }
 0x881   : > { %4049 = vadd.xlane.f32.xlu1 %v4048_v39 }
 0x88b   : > { %4076 = vrot.lane.b32.xlu0 %v6528_v53, %s5698_s12 }
 0x88f   : > { %3962 = vrot.lane.b32.xlu0 %v6518_v46, %s5700_s20 }
 0x902   : > { %v4032_v42 = vpop.xlane.xlu0 %4031 }
 0x903   : > { %v4033_v38 = vrot.slane %v4032_v42, 4 }
 0x905   : > { %v4034_v43 = vadd.f32 %v4033_v38, %v4032_v42 }
 0x906   : > { %v6600_v40 = vpop.permute.xlu0 %4076  ;;  %v4068_v49 = vpop.xlane.xlu1 %4067 }
 0x907   : > { %v4035_v12 = vrot.slane %v4034_v43, 2  ;;  %v4069_v54 = vrot.slane %v4068_v49, 4  ;;  %v4079_v48 = vmul.f32 %v4939_v18, %v6600_v40 }
 0x909   : > { %v4036_v41 = vadd.f32 %v4035_v12, %v4034_v43  ;;  %v4070_v57 = vadd.f32 %v4069_v54, %v4068_v49  ;;  %4081 = vrot.lane.b32.xlu1 %v4079_v48, %s5699_s18  ;;  %v6635_v43 = vsel %vm4562_vm6, 1.0, %v5688_v15  ;;  %v4137_v49 = vmul.f32 %v6612_v29, %v4136_v36 }
 0x90a   : > { %v4014_v45 = vpop.xlane.xlu1 %4013  ;;  %v6640_v54 = vsel %vm4567_vm7, 1.0, %v5688_v15 }
 0x90b   : > { %v4037_v13 = vrot.slane %v4036_v41, 1  ;;  %v4071_v59 = vrot.slane %v4070_v57, 2  ;;  %v4015_v21 = vrot.slane %v4014_v45, 4 }
 0x90d   : > { %v4072_v60 = vadd.f32 %v4071_v59, %v4070_v57  ;;  %v4016_v46 = vadd.f32 %v4015_v21, %v4014_v45  ;;  %v4038_v62 = vadd.f32 %v4037_v13, %v4036_v41  ;;  %v4570_v45 = vmul.f32 %v6640_v54, %v4137_v49 }
 0x90e   : > { %v4050_v63 = vpop.xlane.xlu1 %4049 }
 0x90f   : > { %v4073_v2 = vrot.slane %v4072_v60, 1  ;;  %v4017_v56 = vrot.slane %v4016_v46, 2  ;;  %v4051_v3 = vrot.slane %v4050_v63, 4  ;;  %v4094_v7 = vmax.f32 %v6512_v44, %v4038_v62 }
 0x910   : > { %v4133_v55 = vmul.f32 %v6612_v29, %v4038_v62 }
 0x911   : > { %v4074_v5 = vadd.f32 %v4073_v2, %v4072_v60  ;;  %v4018_v26 = vadd.f32 %v4017_v56, %v4016_v46  ;;  %v4052_v1 = vadd.f32 %v4051_v3, %v4050_v63  ;;  %v3963_v2 = vpop.permute.xlu0 %3962 }
 0x912   : > { %v4555_v11 = vmul.f32 %v6619_v23, %v4133_v55  ;;  %v6648_v3 = vmul.f32 %v3963_v2, %v6505_v19 }
 0x913   : > { %v4019_v9 = vrot.slane %v4018_v26, 1  ;;  %v4053_v47 = vrot.slane %v4052_v1, 2  ;;  %v4096_v61 = vmin.f32 %v6514_v22, %v4074_v5  ;;  %v4107_v14 = vsub.f32 %v4074_v5, %v4038_v62 }
 0x914   : > { %v4135_v42 = vmul.f32 %v6612_v29, %v4074_v5 }
 0x915   : > { %v4020_v16 = vadd.f32 %v4019_v9, %v4018_v26  ;;  %v4054_v4 = vadd.f32 %v4053_v47, %v4052_v1  ;;  %v4099_v18 = vsub.f32 %v4096_v61, %v4094_v7 }
 0x916   : > { %v4565_v41 = vmul.f32 %v6635_v43, %v4135_v42 }
 0x917   : > { %v4055_v31 = vrot.slane %v4054_v4, 1  ;;  %v4100_v32 = vmax.f32 %v4099_v18, 0.0  ;;  %v4132_v34 = vmul.f32 %v6612_v29, %v4020_v16  ;;  %v4093_v46 = vmax.f32 %v6499_v27, %v4020_v16 }
 0x919   : > { %v4056_v10 = vadd.f32 %v4055_v31, %v4054_v4  ;;  %4102 = vrot.lane.b32.xlu0 %v4100_v32, %s5700_s20  ;;  %v4550_v35 = vmul.f32 %v6616_v25, %v4132_v34 }
 0x91b   : > { %v4134_v39 = vmul.f32 %v6612_v29, %v4056_v10  ;;  %v4556_v38 = vadd.f32 %v4555_v11, %v4550_v35  ;;  %v4095_v60 = vmin.f32 %v6501_v8, %v4056_v10  ;;  %v4106_v62 = vsub.f32 %v4056_v10, %v4020_v16 }
 0x91c   : > { %v6656_v35 = vsel %vm4572_vm12, 1.0, %v5688_v15 }
 0x91d   : > { %v4560_v12 = vmul.f32 %v6629_v28, %v4134_v39  ;;  %v4097_v63 = vsub.f32 %v4095_v60, %v4093_v46  ;;  %v4108_v56 = vmul.f32 %v4107_v14, %v4106_v62 }
 0x91f   : > { %v4561_v48 = vadd.f32 %v4560_v12, %v4556_v38  ;;  %v4098_v5 = vmax.f32 %v4097_v63, 0.0  ;;  %v4109_v7 = vadd.f32 %v4108_v56, %v6648_v3 }
 0x921   : > { %v4566_v57 = vadd.f32 %v4565_v41, %v4561_v48 }
 0x923   : > { %v4571_v13 = vadd.f32 %v4570_v45, %v4566_v57 }
 0x97b   : > { %v4082_v59 = vpop.permute.xlu1 %4081 }
 0x97c   : > { %v4084_v21 = vsel %vm4011_vm1, %v4082_v59, 0.0 }
 0x97d   : > { %4085 = vadd.xlane.f32.xlu0 %v4084_v21 }
 0x98b   : > { %v4103_v26 = vpop.permute.xlu0 %4102 }
 0x98c   : > { %v4105_v1 = vmul.f32 %v4103_v26, %v4098_v5 }
 0x98e   : > { %v4110_v9 = vsub.f32 %v4109_v7, %v4105_v1 }
 0x990   : > { %5597 = vrcp.f32 %v4110_v9  ;;  %vm4111_vm8 = vcmp.gt.f32.partialorder %v4110_v9, 0.0 }
 0x99a   : > { %v5598_v47 = vpop.eup %5597 }
 0x99b   : > { %v4113_v61 = vmul.f32 %v5598_v47, %v4105_v1 }
 0x99d   : > { %v4114_v4 = vsel %vm4111_vm8, %v4113_v61, 0.0 }
 0x99e   : > { %vm4119_vm9 = vcmp.gt.f32.partialorder %v4114_v4, 0.5 }
 0x99f   : > { %v4120_v16 = vsel %vm4119_vm9, 1, %v5687_v0 }
 0x9a0   : > { %4121 = vrot.lane.b32.xlu1 %v4120_v16, %s5700_s20 }
 0xa0a   : > { %v4086_v14 = vpop.xlane.xlu0 %4085 }
 0xa0b   : > { %v4087_v18 = vrot.slane %v4086_v14, 4 }
 0xa0d   : > { %v4088_v19 = vadd.f32 %v4087_v18, %v4086_v14 }
 0xa0f   : > { %v4089_v55 = vrot.slane %v4088_v19, 2 }
 0xa11   : > { %v4090_v31 = vadd.f32 %v4089_v55, %v4088_v19 }
 0xa12   : > { %v4122_v36 = vpop.permute.xlu1 %4121 }
 0xa13   : > { %v4091_v32 = vrot.slane %v4090_v31, 1  ;;  %vm4123_vm15 = vcmp.ne.s32.totalorder %v4122_v36, 0 }
 0xa15   : > { %v4092_v34 = vadd.f32 %v4091_v32, %v4090_v31 }
 0xa17   : > { %vm4115_vm13 = vcmp.eq.f32.partialorder %v6528_v53, %v4092_v34  ;;  %v4138_v10 = vadd.f32 1.0, %v4092_v34 }
 0xa18   : > { %vm4118_vm14 = vmand %vm3977_vm2, %vm4115_vm13 }
 0xa19   : > { %vm4124_vm0 = vmand %vm4118_vm14, %vm4123_vm15  ;;  %v4139_v11 = vmul.f32 %v6612_v29, %v4138_v10  ;;  %vm4577_vm15 = vcmp.eq.s32.totalorder %v6523_v50, 6 }
 0xa1a   : > { %vm4125_vm4 = vmxor %vm4124_vm0, %vm5701_vm3  ;;  %vm4582_vm0 = vcmp.eq.s32.totalorder %v6525_v51, 0 }
 0xa1b   : > { %v4575_v39 = vmul.f32 %v6656_v35, %v4139_v11  ;;  %v4126_v42 = vsel %vm4125_vm4, 1, %v5687_v0  ;;  %vm4601_vm4 = vcmp.eq.s32.totalorder %v6525_v51, 1  ;;  %v4954_v50 = vsel %vm4582_vm0, 1.0, %v5688_v15 }
 0xa1c   : > { %4127 = vrot.lane.b32.xlu1 %v4126_v42, %s5698_s12 }
 0xa1d   : > { %v6665_v38 = vadd.f32 %v4575_v39, %v4571_v13 }
 0xa8e   : > { %v4128_v49 = vpop.permute.xlu1 %4127 }
 0xa8f   : > { %vm4129_vm5 = vcmp.ne.s32.totalorder %v4128_v49, 0 }
 0xa90   : > { %vm6669_vm2 = vmand %vm6539_vm11, %vm4129_vm5 }
 0xa91   : > { %v4140_v12 = vsel %vm6669_vm2, %v6536_v58, -1.0 }
 0xa92   : > { %v4141_v48 = vsel %vm3967_vm10, %v4140_v12, -inf }
 0xa93   : > { %4142 = vmax.xlane.f32.xlu1 %v4141_v48 }
 0xb20   : > { %v4143_v41 = vpop.xlane.xlu1 %4142 }
 0xb21   : > { %v4144_v57 = vrot.slane %v4143_v41, 4 }
 0xb23   : > { %v4145_v45 = vmax.f32 %v4143_v41, %v4144_v57 }
 0xb25   : > { %v4146_v13 = vrot.slane %v4145_v45, 2 }
 0xb27   : > { %v4147_v59 = vmax.f32 %v4145_v45, %v4146_v13 }
 0xb29   : > { %v4148_v21 = vrot.slane %v4147_v59, 1 }
 0xb2b   : > { %v6677_v60 = vmax.f32 %v4147_v59, %v4148_v21 }
 0xb2d   : > { %vm4151_vm11 = vcmp.ge.f32.partialorder %v4140_v12, %v6677_v60  ;;  %vm4150_vm12 = vcmp.gt.f32.partialorder %v6677_v60, 0.0 }
 0xb2e   : > { %vm6682_vm6 = vmand %vm6669_vm2, %vm4151_vm11 }
 0xb2f   : > { %v4153_v46 = vsel %vm6682_vm6, %v6549_v52, 1e+09 }
 0xb30   : > { %v4154_v62 = vsel %vm3967_vm10, %v4153_v46, inf }
 0xb31   : > { %4155 = vmin.xlane.f32.xlu0 %v4154_v62 }
 0xbbe   : > { %v4156_v63 = vpop.xlane.xlu0 %4155 }
 0xbbf   : > { %v4157_v2 = vrot.slane %v4156_v63, 4 }
 0xbc1   : > { %v4158_v56 = vmin.f32 %v4156_v63, %v4157_v2 }
 0xbc3   : > { %v4159_v5 = vrot.slane %v4158_v56, 2 }
 0xbc5   : > { %v4160_v26 = vmin.f32 %v4158_v56, %v4159_v5 }
 0xbc7   : > { %v4161_v1 = vrot.slane %v4160_v26, 1 }
 0xbc9   : > { %v4162_v7 = vmin.f32 %v4160_v26, %v4161_v1 }
 0xbcb   : > { %vm4163_vm7 = vcmp.eq.f32.partialorder %v6532_v17, %v4162_v7 }
 0xbcc   : > { %v4164_v9 = vsel %vm4163_vm7, 1, %v5687_v0 }
 0xbcd   : > { %4165 = vrot.lane.b32.xlu0 %v4164_v9, %s5698_s12 }
 0xc3f   : > { %v4166_v47 = vpop.permute.xlu0 %4165 }
 0xc40   : > { %vm4167_vm8 = vcmp.ne.s32.totalorder %v4166_v47, 0 }
 0xc41   : > { %vm4168_vm9 = vmand %vm6682_vm6, %vm4167_vm8 }
 0xc42   : > { %v4941_v61 = vsel %vm4168_vm9, 1.0, %v5688_v15 }
 0xc43   : > { %v4213_v4 = vmul.f32 %v4941_v61, %v6580_v6  ;;  %v4185_v16 = vmul.f32 %v4941_v61, %v6576_v20  ;;  %v4199_v14 = vmul.f32 %v4941_v61, %v6586_v30  ;;  %v4171_v18 = vmul.f32 %v4941_v61, %v6582_v33 }
 0xc44   : > { %v4227_v39 = vmul.f32 %v4941_v61, %v6600_v40 }
 0xc45   : > { %4215 = vrot.lane.b32.xlu0 %v4213_v4, %s5699_s18  ;;  %4187 = vrot.lane.b32.xlu1 %v4185_v16, %s5699_s18 }
 0xc49   : > { %4201 = vrot.lane.b32.xlu1 %v4199_v14, %s5699_s18  ;;  %4173 = vrot.lane.b32.xlu0 %v4171_v18, %s5699_s18 }
 0xcb7   : > { %v4216_v19 = vpop.permute.xlu0 %4215  ;;  %v4188_v55 = vpop.permute.xlu1 %4187 }
 0xcb8   : > { %v4218_v31 = vsel %vm4011_vm1, %v4216_v19, 0.0  ;;  %v4190_v32 = vsel %vm4011_vm1, %v4188_v55, 0.0 }
 0xcb9   : > { %4219 = vadd.xlane.f32.xlu1 %v4218_v31  ;;  %4191 = vadd.xlane.f32.xlu0 %v4190_v32  ;;  %v4942_v31 = vsel %vm4150_vm12, 1.0, %v5688_v15 }
 0xcbb   : > { %v4174_v34 = vpop.permute.xlu0 %4173  ;;  %v4202_v10 = vpop.permute.xlu1 %4201 }
 0xcbc   : > { %v4176_v36 = vsel %vm4011_vm1, %v4174_v34, 0.0  ;;  %v4204_v11 = vsel %vm4011_vm1, %v4202_v10, 0.0 }
 0xcbd   : > { %4177 = vadd.xlane.f32.xlu0 %v4176_v36 }
 0xcc1   : > { %4205 = vadd.xlane.f32.xlu0 %v4204_v11 }
 0xcca   : > { %4229 = vrot.lane.b32.xlu1 %v4227_v39, %s5699_s18 }
 0xd46   : > { %v4220_v42 = vpop.xlane.xlu1 %4219  ;;  %v4192_v49 = vpop.xlane.xlu0 %4191 }
 0xd47   : > { %v4221_v12 = vrot.slane %v4220_v42, 4  ;;  %v4193_v48 = vrot.slane %v4192_v49, 4 }
 0xd49   : > { %v4222_v41 = vadd.f32 %v4221_v12, %v4220_v42  ;;  %v4194_v57 = vadd.f32 %v4193_v48, %v4192_v49  ;;  %v4284_v49 = vmax.f32 %v6677_v60, 0.0 }
 0xd4a   : > { %v4230_v45 = vpop.permute.xlu1 %4229  ;;  %v4178_v13 = vpop.xlane.xlu0 %4177 }
 0xd4b   : > { %v4223_v59 = vrot.slane %v4222_v41, 2  ;;  %v4195_v21 = vrot.slane %v4194_v57, 2  ;;  %v4179_v24 = vrot.slane %v4178_v13, 4  ;;  %v4232_v46 = vsel %vm4011_vm1, %v4230_v45, 0.0 }
 0xd4c   : > { %4233 = vadd.xlane.f32.xlu1 %v4232_v46 }
 0xd4d   : > { %v4224_v62 = vadd.f32 %v4223_v59, %v4222_v41  ;;  %v4196_v63 = vadd.f32 %v4195_v21, %v4194_v57  ;;  %v4180_v2 = vadd.f32 %v4179_v24, %v4178_v13  ;;  %v4285_v59 = vmul.f32 %v4942_v31, %v4284_v49 }
 0xd4e   : > { %v4206_v56 = vpop.xlane.xlu0 %4205 }
 0xd4f   : > { %v4225_v5 = vrot.slane %v4224_v62, 1  ;;  %v4197_v26 = vrot.slane %v4196_v63, 1  ;;  %v4181_v1 = vrot.slane %v4180_v2, 2  ;;  %v4207_v7 = vrot.slane %v4206_v56, 4 }
 0xd51   : > { %v4226_v9 = vadd.f32 %v4225_v5, %v4224_v62  ;;  %v4198_v47 = vadd.f32 %v4197_v26, %v4196_v63  ;;  %v4182_v61 = vadd.f32 %v4181_v1, %v4180_v2  ;;  %v4208_v4 = vadd.f32 %v4207_v7, %v4206_v56 }
 0xd52   : > { %v4595_v63 = vmul.f32 %v6640_v54, %v4285_v59 }
 0xd53   : > { %v4183_v16 = vrot.slane %v4182_v61, 1  ;;  %v4209_v14 = vrot.slane %v4208_v4, 2  ;;  %v4242_v18 = vmax.f32 %v6512_v44, %v4198_v47  ;;  %v4244_v19 = vmin.f32 %v6514_v22, %v4226_v9 }
 0xd54   : > { %v4255_v55 = vsub.f32 %v4226_v9, %v4198_v47  ;;  %v4281_v10 = vmul.f32 %v4942_v31, %v4198_v47  ;;  %v4283_v45 = vmul.f32 %v4942_v31, %v4226_v9 }
 0xd55   : > { %v4184_v32 = vadd.f32 %v4183_v16, %v4182_v61  ;;  %v4210_v34 = vadd.f32 %v4209_v14, %v4208_v4  ;;  %v4247_v36 = vsub.f32 %v4244_v19, %v4242_v18 }
 0xd56   : > { %v4589_v41 = vmul.f32 %v6619_v23, %v4281_v10  ;;  %v4593_v46 = vmul.f32 %v6635_v43, %v4283_v45 }
 0xd57   : > { %v4211_v11 = vrot.slane %v4210_v34, 1  ;;  %v4248_v39 = vmax.f32 %v4247_v36, 0.0  ;;  %v4280_v42 = vmul.f32 %v4942_v31, %v4184_v32  ;;  %v4241_v5 = vmax.f32 %v6499_v27, %v4184_v32 }
 0xd59   : > { %v4212_v12 = vadd.f32 %v4211_v11, %v4210_v34  ;;  %4250 = vrot.lane.b32.xlu0 %v4248_v39, %s5700_s20  ;;  %v4587_v48 = vmul.f32 %v6616_v25, %v4280_v42 }
 0xd5b   : > { %v4282_v57 = vmul.f32 %v4942_v31, %v4212_v12  ;;  %v4590_v13 = vadd.f32 %v4589_v41, %v4587_v48  ;;  %v4243_v56 = vmin.f32 %v6501_v8, %v4212_v12  ;;  %v4254_v26 = vsub.f32 %v4212_v12, %v4184_v32 }
 0xd5c   : > { %v6731_v12 = vsel %vm4577_vm15, 1.0, %v5688_v15 }
 0xd5d   : > { %v4591_v21 = vmul.f32 %v6629_v28, %v4282_v57  ;;  %v4245_v1 = vsub.f32 %v4243_v56, %v4241_v5  ;;  %v4256_v7 = vmul.f32 %v4255_v55, %v4254_v26  ;;  %v4580_v57 = vmul.f32 %v6731_v12, %v6612_v29 }
 0xd5e   : > { %v4599_v59 = vmul.f32 %v6731_v12, %v4942_v31 }
 0xd5f   : > { %v4592_v24 = vadd.f32 %v4591_v21, %v4590_v13  ;;  %v4246_v47 = vmax.f32 %v4245_v1, 0.0  ;;  %v4257_v61 = vadd.f32 %v4256_v7, %v6648_v3  ;;  %v4581_v13 = vadd.f32 %v4580_v57, %v6665_v38 }
 0xd60   : > { %v4955_v21 = vsel %vm4601_vm4, 1.0, %v5688_v15 }
 0xd61   : > { %v4594_v62 = vadd.f32 %v4593_v46, %v4592_v24  ;;  %v4585_v46 = vmul.f32 %v4954_v50, %v4581_v13 }
 0xd63   : > { %v4596_v2 = vadd.f32 %v4595_v63, %v4594_v62 }
 0xdcb   : > { %v4251_v9 = vpop.permute.xlu0 %4250 }
 0xdcc   : > { %v4253_v4 = vmul.f32 %v4251_v9, %v4246_v47 }
 0xdce   : > { %v4258_v16 = vsub.f32 %v4257_v61, %v4253_v4 }
 0xdd0   : > { %5599 = vrcp.f32 %v4258_v16  ;;  %vm4259_vm13 = vcmp.gt.f32.partialorder %v4258_v16, 0.0 }
 0xdd9   : > { %v4234_v14 = vpop.xlane.xlu1 %4233 }
 0xdda   : > { %v5600_v18 = vpop.eup %5599  ;;  %v4235_v19 = vrot.slane %v4234_v14, 4 }
 0xddb   : > { %v4261_v34 = vmul.f32 %v5600_v18, %v4253_v4 }
 0xddc   : > { %v4236_v36 = vadd.f32 %v4235_v19, %v4234_v14 }
 0xddd   : > { %v4262_v10 = vsel %vm4259_vm13, %v4261_v34, 0.0 }
 0xdde   : > { %v4237_v11 = vrot.slane %v4236_v36, 2  ;;  %vm4267_vm14 = vcmp.gt.f32.partialorder %v4262_v10, 0.5 }
 0xddf   : > { %v4268_v32 = vsel %vm4267_vm14, 1, %v5687_v0 }
 0xde0   : > { %v4238_v39 = vadd.f32 %v4237_v11, %v4236_v36  ;;  %4269 = vrot.lane.b32.xlu0 %v4268_v32, %s5700_s20 }
 0xde2   : > { %v4239_v55 = vrot.slane %v4238_v39, 1 }
 0xde4   : > { %v4240_v42 = vadd.f32 %v4239_v55, %v4238_v39 }
 0xde6   : > { %v4286_v49 = vadd.f32 1.0, %v4240_v42  ;;  %vm4263_vm5 = vcmp.eq.f32.partialorder %v6528_v53, %v4240_v42 }
 0xde7   : > { %vm4266_vm11 = vmand %vm4150_vm12, %vm4263_vm5 }
 0xde8   : > { %v4287_v48 = vmul.f32 %v4942_v31, %v4286_v49 }
 0xdea   : > { %v4597_v41 = vmul.f32 %v6656_v35, %v4287_v48 }
 0xdec   : > { %v4598_v45 = vadd.f32 %v4597_v41, %v4596_v2 }
 0xdee   : > { %v4600_v24 = vadd.f32 %v4599_v59, %v4598_v45 }
 0xdf0   : > { %v4604_v62 = vmul.f32 %v4955_v21, %v4600_v24 }
 0xdf2   : > { %v6742_v63 = vadd.f32 %v4604_v62, %v4585_v46 }
 0xe52   : > { %v4270_v29 = vpop.permute.xlu0 %4269 }
 0xe53   : > { %vm4271_vm6 = vcmp.ne.s32.totalorder %v4270_v29, 0 }
 0xe54   : > { %vm4272_vm7 = vmand %vm4266_vm11, %vm4271_vm6  ;;  %vm4620_vm6 = vcmp.eq.s32.totalorder %v6525_v51, 2 }
 0xe55   : > { %vm4273_vm8 = vmxor %vm4272_vm7, %vm5701_vm3 }
 0xe56   : > { %v4274_v38 = vsel %vm4273_vm8, 1, %v5687_v0 }
 0xe57   : > { %4275 = vrot.lane.b32.xlu0 %v4274_v38, %s5698_s12 }
 0xec9   : > { %v4276_v31 = vpop.permute.xlu0 %4275 }
 0xeca   : > { %vm4277_vm9 = vcmp.ne.s32.totalorder %v4276_v31, 0 }
 0xecb   : > { %vm6752_vm13 = vmand %vm6669_vm2, %vm4277_vm9 }
 0xecc   : > { %v4288_v60 = vsel %vm6752_vm13, %v6536_v58, -1.0 }
 0xecd   : > { %v4289_v56 = vsel %vm3967_vm10, %v4288_v60, -inf }
 0xece   : > { %4290 = vmax.xlane.f32.xlu0 %v4289_v56 }
 0xf5b   : > { %v4291_v5 = vpop.xlane.xlu0 %4290 }
 0xf5c   : > { %v4292_v26 = vrot.slane %v4291_v5, 4 }
 0xf5e   : > { %v4293_v1 = vmax.f32 %v4291_v5, %v4292_v26 }
 0xf60   : > { %v4294_v7 = vrot.slane %v4293_v1, 2 }
 0xf62   : > { %v4295_v47 = vmax.f32 %v4293_v1, %v4294_v7 }
 0xf64   : > { %v4296_v9 = vrot.slane %v4295_v47, 1 }
 0xf66   : > { %v6760_v61 = vmax.f32 %v4295_v47, %v4296_v9 }
 0xf68   : > { %vm4299_vm2 = vcmp.ge.f32.partialorder %v4288_v60, %v6760_v61  ;;  %vm4298_vm4 = vcmp.gt.f32.partialorder %v6760_v61, 0.0 }
 0xf69   : > { %vm6765_vm12 = vmand %vm6752_vm13, %vm4299_vm2 }
 0xf6a   : > { %v4301_v4 = vsel %vm6765_vm12, %v6549_v52, 1e+09 }
 0xf6b   : > { %v4302_v16 = vsel %vm3967_vm10, %v4301_v4, inf }
 0xf6c   : > { %4303 = vmin.xlane.f32.xlu1 %v4302_v16 }
 0xff9   : > { %v4304_v14 = vpop.xlane.xlu1 %4303 }
 0xffa   : > { %v4305_v18 = vrot.slane %v4304_v14, 4 }
 0xffc   : > { %v4306_v19 = vmin.f32 %v4304_v14, %v4305_v18 }
 0xffe   : > { %v4307_v34 = vrot.slane %v4306_v19, 2 }
0x1000   : > { %v4308_v36 = vmin.f32 %v4306_v19, %v4307_v34 }
0x1002   : > { %v4309_v10 = vrot.slane %v4308_v36, 1 }
0x1004   : > { %v4310_v11 = vmin.f32 %v4308_v36, %v4309_v10 }
0x1006   : > { %vm4311_vm14 = vcmp.eq.f32.partialorder %v6532_v17, %v4310_v11 }
0x1007   : > { %v4312_v32 = vsel %vm4311_vm14, 1, %v5687_v0 }
0x1008   : > { %4313 = vrot.lane.b32.xlu1 %v4312_v32, %s5698_s12 }
0x107a   : > { %v4314_v39 = vpop.permute.xlu1 %4313 }
0x107b   : > { %vm4315_vm15 = vcmp.ne.s32.totalorder %v4314_v39, 0 }
0x107c   : > { %vm4316_vm0 = vmand %vm6765_vm12, %vm4315_vm15 }
0x107d   : > { %v4943_v55 = vsel %vm4316_vm0, 1.0, %v5688_v15 }
0x107e   : > { %v4361_v42 = vmul.f32 %v4943_v55, %v6580_v6  ;;  %v4333_v49 = vmul.f32 %v4943_v55, %v6576_v20  ;;  %v4319_v48 = vmul.f32 %v4943_v55, %v6582_v33  ;;  %v4347_v41 = vmul.f32 %v4943_v55, %v6586_v30 }
0x107f   : > { %v4375_v62 = vmul.f32 %v4943_v55, %v6600_v40 }
0x1080   : > { %4363 = vrot.lane.b32.xlu1 %v4361_v42, %s5699_s18  ;;  %4335 = vrot.lane.b32.xlu0 %v4333_v49, %s5699_s18 }
0x1084   : > { %4321 = vrot.lane.b32.xlu1 %v4319_v48, %s5699_s18 }
0x1088   : > { %4349 = vrot.lane.b32.xlu1 %v4347_v41, %s5699_s18 }
0x10f2   : > { %v4364_v57 = vpop.permute.xlu1 %4363  ;;  %v4336_v45 = vpop.permute.xlu0 %4335 }
0x10f3   : > { %v4338_v13 = vsel %vm4011_vm1, %v4336_v45, 0.0  ;;  %v4366_v59 = vsel %vm4011_vm1, %v4364_v57, 0.0  ;;  %v4944_v45 = vsel %vm4298_vm4, 1.0, %v5688_v15 }
0x10f4   : > { %4339 = vadd.xlane.f32.xlu0 %v4338_v13  ;;  %4367 = vadd.xlane.f32.xlu1 %v4366_v59 }
0x10f6   : > { %v4322_v50 = vpop.permute.xlu1 %4321 }
0x10f7   : > { %v4324_v21 = vsel %vm4011_vm1, %v4322_v50, 0.0 }
0x10f8   : > { %4325 = vadd.xlane.f32.xlu0 %v4324_v21 }
0x10fa   : > { %v4350_v24 = vpop.permute.xlu1 %4349 }
0x10fb   : > { %v4352_v46 = vsel %vm4011_vm1, %v4350_v24, 0.0 }
0x10fc   : > { %4353 = vadd.xlane.f32.xlu0 %v4352_v46 }
0x1105   : > { %4377 = vrot.lane.b32.xlu1 %v4375_v62, %s5699_s18 }
0x1181   : > { %v4340_v29 = vpop.xlane.xlu0 %4339  ;;  %v4368_v38 = vpop.xlane.xlu1 %4367 }
0x1182   : > { %v4341_v31 = vrot.slane %v4340_v29, 4  ;;  %v4369_v60 = vrot.slane %v4368_v38, 4 }
0x1184   : > { %v4342_v56 = vadd.f32 %v4341_v31, %v4340_v29  ;;  %v4370_v5 = vadd.f32 %v4369_v60, %v4368_v38  ;;  %v4432_v29 = vmax.f32 %v6760_v61, 0.0 }
0x1185   : > { %v4326_v26 = vpop.xlane.xlu0 %4325  ;;  %v4378_v1 = vpop.permute.xlu1 %4377 }
0x1186   : > { %v4343_v7 = vrot.slane %v4342_v56, 2  ;;  %v4371_v47 = vrot.slane %v4370_v5, 2  ;;  %v4327_v9 = vrot.slane %v4326_v26, 4  ;;  %v4380_v37 = vsel %vm4011_vm1, %v4378_v1, 0.0 }
0x1187   : > { %4381 = vadd.xlane.f32.xlu1 %v4380_v37 }
0x1188   : > { %v4344_v4 = vadd.f32 %v4343_v7, %v4342_v56  ;;  %v4372_v16 = vadd.f32 %v4371_v47, %v4370_v5  ;;  %v4328_v14 = vadd.f32 %v4327_v9, %v4326_v26  ;;  %v4433_v5 = vmul.f32 %v4944_v45, %v4432_v29 }
0x1189   : > { %v4354_v18 = vpop.xlane.xlu0 %4353 }
0x118a   : > { %v4345_v19 = vrot.slane %v4344_v4, 1  ;;  %v4373_v34 = vrot.slane %v4372_v16, 1  ;;  %v4329_v36 = vrot.slane %v4328_v14, 2  ;;  %v4355_v10 = vrot.slane %v4354_v18, 4 }
0x118b   : > { %v4614_v9 = vmul.f32 %v6640_v54, %v4433_v5 }
0x118c   : > { %v4346_v11 = vadd.f32 %v4345_v19, %v4344_v4  ;;  %v4374_v32 = vadd.f32 %v4373_v34, %v4372_v16  ;;  %v4330_v39 = vadd.f32 %v4329_v36, %v4328_v14  ;;  %v4356_v55 = vadd.f32 %v4355_v10, %v4354_v18 }
0x118e   : > { %v4331_v42 = vrot.slane %v4330_v39, 1  ;;  %v4357_v49 = vrot.slane %v4356_v55, 2  ;;  %v4390_v48 = vmax.f32 %v6512_v44, %v4346_v11  ;;  %v4392_v41 = vmin.f32 %v6514_v22, %v4374_v32 }
0x118f   : > { %v4403_v57 = vsub.f32 %v4374_v32, %v4346_v11  ;;  %v4429_v21 = vmul.f32 %v4944_v45, %v4346_v11  ;;  %v4431_v60 = vmul.f32 %v4944_v45, %v4374_v32 }
0x1190   : > { %v4332_v13 = vadd.f32 %v4331_v42, %v4330_v39  ;;  %v4358_v59 = vadd.f32 %v4357_v49, %v4356_v55  ;;  %v4395_v50 = vsub.f32 %v4392_v41, %v4390_v48 }
0x1191   : > { %v4608_v22 = vmul.f32 %v6619_v23, %v4429_v21  ;;  %v4612_v1 = vmul.f32 %v6635_v43, %v4431_v60 }
0x1192   : > { %v4359_v24 = vrot.slane %v4358_v59, 1  ;;  %v4396_v46 = vmax.f32 %v4395_v50, 0.0  ;;  %v4428_v62 = vmul.f32 %v4944_v45, %v4332_v13  ;;  %v4389_v16 = vmax.f32 %v6499_v27, %v4332_v13 }
0x1194   : > { %v4360_v38 = vadd.f32 %v4359_v24, %v4358_v59  ;;  %4398 = vrot.lane.b32.xlu0 %v4396_v46, %s5700_s20  ;;  %v4606_v44 = vmul.f32 %v6616_v25, %v4428_v62  ;;  %v4618_v46 = vmul.f32 %v6731_v12, %v4944_v45  ;;  %v4956_v62 = vsel %vm4620_vm6, 1.0, %v5688_v15 }
0x1196   : > { %v4430_v31 = vmul.f32 %v4944_v45, %v4360_v38  ;;  %v4609_v56 = vadd.f32 %v4608_v22, %v4606_v44  ;;  %v4391_v4 = vmin.f32 %v6501_v8, %v4360_v38  ;;  %v4402_v14 = vsub.f32 %v4360_v38, %v4332_v13 }
0x1198   : > { %v4610_v26 = vmul.f32 %v6629_v28, %v4430_v31  ;;  %v4393_v18 = vsub.f32 %v4391_v4, %v4389_v16  ;;  %v4404_v19 = vmul.f32 %v4403_v57, %v4402_v14 }
0x119a   : > { %v4611_v7 = vadd.f32 %v4610_v26, %v4609_v56  ;;  %v4394_v34 = vmax.f32 %v4393_v18, 0.0  ;;  %v4405_v10 = vadd.f32 %v4404_v19, %v6648_v3 }
0x119c   : > { %v4613_v47 = vadd.f32 %v4612_v1, %v4611_v7 }
0x119e   : > { %v4615_v37 = vadd.f32 %v4614_v9, %v4613_v47 }
0x1206   : > { %v4399_v36 = vpop.permute.xlu0 %4398 }
0x1207   : > { %v4401_v11 = vmul.f32 %v4399_v36, %v4394_v34 }
0x1209   : > { %v4406_v32 = vsub.f32 %v4405_v10, %v4401_v11 }
0x120b   : > { %5601 = vrcp.f32 %v4406_v32  ;;  %vm4407_vm5 = vcmp.gt.f32.partialorder %v4406_v32, 0.0 }
0x1214   : > { %v4382_v39 = vpop.xlane.xlu1 %4381 }
0x1215   : > { %v5602_v55 = vpop.eup %5601  ;;  %v4383_v42 = vrot.slane %v4382_v39, 4 }
0x1216   : > { %v4409_v49 = vmul.f32 %v5602_v55, %v4401_v11 }
0x1217   : > { %v4384_v48 = vadd.f32 %v4383_v42, %v4382_v39 }
0x1218   : > { %v4410_v41 = vsel %vm4407_vm5, %v4409_v49, 0.0 }
0x1219   : > { %v4385_v8 = vrot.slane %v4384_v48, 2  ;;  %vm4415_vm11 = vcmp.gt.f32.partialorder %v4410_v41, 0.5 }
0x121a   : > { %v4416_v27 = vsel %vm4415_vm11, 1, %v5687_v0 }
0x121b   : > { %v4386_v13 = vadd.f32 %v4385_v8, %v4384_v48  ;;  %4417 = vrot.lane.b32.xlu0 %v4416_v27, %s5700_s20 }
0x121d   : > { %v4387_v57 = vrot.slane %v4386_v13, 1 }
0x121f   : > { %v4388_v59 = vadd.f32 %v4387_v57, %v4386_v13 }
0x1221   : > { %v4434_v3 = vadd.f32 1.0, %v4388_v59  ;;  %vm4411_vm7 = vcmp.eq.f32.partialorder %v6528_v53, %v4388_v59 }
0x1222   : > { %vm4414_vm8 = vmand %vm4298_vm4, %vm4411_vm7 }
0x1223   : > { %v4435_v50 = vmul.f32 %v4944_v45, %v4434_v3 }
0x1225   : > { %v4616_v21 = vmul.f32 %v6656_v35, %v4435_v50 }
0x1227   : > { %v4617_v24 = vadd.f32 %v4616_v21, %v4615_v37 }
0x1229   : > { %v4619_v29 = vadd.f32 %v4618_v46, %v4617_v24 }
0x122b   : > { %v4623_v38 = vmul.f32 %v4956_v62, %v4619_v29 }
0x122d   : > { %v6817_v44 = vadd.f32 %v4623_v38, %v6742_v63 }
0x128d   : > { %v4418_v22 = vpop.permute.xlu0 %4417 }
0x128e   : > { %vm4419_vm9 = vcmp.ne.s32.totalorder %v4418_v22, 0 }
0x128f   : > { %vm4420_vm2 = vmand %vm4414_vm8, %vm4419_vm9 }
0x1290   : > { %vm4421_vm12 = vmxor %vm4420_vm2, %vm5701_vm3 }
0x1291   : > { %v4422_v31 = vsel %vm4421_vm12, 1, %v5687_v0 }
0x1292   : > { %4423 = vrot.lane.b32.xlu0 %v4422_v31, %s5698_s12 }
0x1304   : > { %v4424_v45 = vpop.permute.xlu0 %4423 }
0x1305   : > { %vm4425_vm14 = vcmp.ne.s32.totalorder %v4424_v45, 0 }
0x1306   : > { %vm4426_vm15 = vmand %vm6752_vm13, %vm4425_vm14 }
0x1307   : > { %v4436_v63 = vsel %vm4426_vm15, %v6536_v58, -1.0 }
0x1308   : > { %v4437_v53 = vsel %vm3967_vm10, %v4436_v63, -inf }
0x1309   : > { %4438 = vmax.xlane.f32.xlu0 %v4437_v53 }
0x1396   : > { %v4439_v61 = vpop.xlane.xlu0 %4438 }
0x1397   : > { %v4440_v60 = vrot.slane %v4439_v61, 4 }
0x1399   : > { %v4441_v56 = vmax.f32 %v4439_v61, %v4440_v60 }
0x139b   : > { %v4442_v5 = vrot.slane %v4441_v56, 2 }
0x139d   : > { %v4443_v26 = vmax.f32 %v4441_v56, %v4442_v5 }
0x139f   : > { %v4444_v1 = vrot.slane %v4443_v26, 1 }
0x13a1   : > { %v6829_v7 = vmax.f32 %v4443_v26, %v4444_v1 }
0x13a3   : > { %vm4447_vm3 = vcmp.ge.f32.partialorder %v4436_v63, %v6829_v7 }
0x13a4   : > { %vm6832_vm0 = vmand %vm4426_vm15, %vm4447_vm3 }
0x13a5   : > { %v4449_v58 = vsel %vm6832_vm0, %v6549_v52, 1e+09 }
0x13a6   : > { %v4450_v2 = vsel %vm3967_vm10, %v4449_v58, inf  ;;  %vm4446_vm10 = vcmp.gt.f32.partialorder %v6829_v7, 0.0 }
0x13a7   : > { %4451 = vmin.xlane.f32.xlu1 %v4450_v2  ;;  %v4946_v60 = vsel %vm4446_vm10, 1.0, %v5688_v15 }
0x1434   : > { %v4452_v9 = vpop.xlane.xlu1 %4451 }
0x1435   : > { %v4453_v37 = vrot.slane %v4452_v9, 4 }
0x1437   : > { %v4454_v4 = vmin.f32 %v4452_v9, %v4453_v37  ;;  %v4543_v37 = vmax.f32 %v6829_v7, 0.0 }
0x1439   : > { %v4455_v16 = vrot.slane %v4454_v4, 2 }
0x143b   : > { %v4456_v14 = vmin.f32 %v4454_v4, %v4455_v16 }
0x143d   : > { %v4457_v18 = vrot.slane %v4456_v14, 1 }
0x143f   : > { %v4458_v19 = vmin.f32 %v4456_v14, %v4457_v18 }
0x1441   : > { %vm4459_vm13 = vcmp.eq.f32.partialorder %v6532_v17, %v4458_v19 }
0x1442   : > { %v4460_v34 = vsel %vm4459_vm13, 1, %v5687_v0 }
0x1443   : > { %4461 = vrot.lane.b32.xlu1 %v4460_v34, %s5698_s12  ;;  %s5618_s12 = scalar_lea.vmem %s6881_s11, 128 }
0x1444   : > { %p5619_p9 = scmp.ne.s32.totalorder %s6881_s11, %s5618_s12 }
0x1446   : > { %p5620_p10 = pnand %p5619_p9, %p5796_p5 }
0x1448   : > { %p5621_p12 = pneg %p5620_p10 }
0x14b5   : > { %v4462_v36 = vpop.permute.xlu1 %4461 }
0x14b6   : > { %vm4463_vm4 = vcmp.ne.s32.totalorder %v4462_v36, 0 }
0x14b7   : > { %vm4464_vm5 = vmand %vm6832_vm0, %vm4463_vm4 }
0x14b8   : > { %v4945_v52 = vsel %vm4464_vm5, 1.0, %v5688_v15 }
0x14b9   : > { %v4495_v10 = vmul.f32 %v4945_v52, %v6586_v30  ;;  %v4467_v11 = vmul.f32 %v4945_v52, %v6582_v33  ;;  %v4481_v17 = vmul.f32 %v4945_v52, %v6576_v20  ;;  %v4509_v0 = vmul.f32 %v4945_v52, %v6580_v6 }
0x14ba   : > { %v4523_v6 = vmul.f32 %v4945_v52, %v6600_v40  ;;  %v4544_v52 = vmul.f32 %v4946_v60, %v4543_v37 }
0x14bb   : > { %4497 = vrot.lane.b32.xlu1 %v4495_v10, %s5699_s18  ;;  %4469 = vrot.lane.b32.xlu0 %v4467_v11, %s5699_s18 }
0x14bf   : > { %4483 = vrot.lane.b32.xlu0 %v4481_v17, %s5699_s18 }
0x14c3   : > { %4511 = vrot.lane.b32.xlu0 %v4509_v0, %s5699_s18  ;;  %v4633_v0 = vmul.f32 %v6640_v54, %v4544_v52  ;;  %v4637_v54 = vmul.f32 %v6731_v12, %v4946_v60 }
0x152d   : > { %v4470_v32 = vpop.permute.xlu0 %4469  ;;  %v4498_v33 = vpop.permute.xlu1 %4497 }
0x152e   : > { %v4472_v39 = vsel %vm4011_vm1, %v4470_v32, 0.0  ;;  %v4500_v49 = vsel %vm4011_vm1, %v4498_v33, 0.0 }
0x152f   : > { %4473 = vadd.xlane.f32.xlu1 %v4472_v39 }
0x1531   : > { %v4484_v55 = vpop.permute.xlu0 %4483 }
0x1532   : > { %v4486_v30 = vsel %vm4011_vm1, %v4484_v55, 0.0 }
0x1533   : > { %4487 = vadd.xlane.f32.xlu0 %v4486_v30 }
0x1535   : > { %v4512_v42 = vpop.permute.xlu0 %4511 }
0x1536   : > { %v4514_v20 = vsel %vm4011_vm1, %v4512_v42, 0.0 }
0x1537   : > { %4501 = vadd.xlane.f32.xlu0 %v4500_v49  ;;  %4515 = vadd.xlane.f32.xlu1 %v4514_v20 }
0x154d   : > { %4525 = vrot.lane.b32.xlu0 %v4523_v6, %s5699_s18  ;;  %s5702_s18 = smov [#allocation5]  }
0x154e   : > { %s5622_s20 = sshll.u32 %s5702_s18, 4  ;;  %s5623_s20 = int_to_ptr.vmem [resolvable:$false] %s5622_s20 }
0x154f   : > { %s5624_s25 = scalar_lea.vmem %s5623_s20, 256  ;;  %p5625_p13 = scmp.lt.s32.totalorder %s6881_s11, %s5623_s20 }
0x1550   : > { %p5626_p0 = scmp.lt.s32.totalorder %s5624_s25, %s5618_s12 }
0x1552   : > { %p5627_p1 = por %p5626_p0, %p5625_p13 }
0x1554   : > { %p5628_p2 = pnand %p5627_p1, %p5621_p12 }
0x15bc   : > { %v4474_v48 = vpop.xlane.xlu1 %4473 }
0x15bd   : > { %v4475_v41 = vrot.slane %v4474_v48, 4 }
0x15bf   : > { %v4476_v8 = vadd.f32 %v4475_v41, %v4474_v48 }
0x15c0   : > { %v4488_v27 = vpop.xlane.xlu0 %4487 }
0x15c1   : > { %v4477_v13 = vrot.slane %v4476_v8, 2  ;;  %v4489_v57 = vrot.slane %v4488_v27, 4 }
0x15c3   : > { %v4478_v59 = vadd.f32 %v4477_v13, %v4476_v8  ;;  %v4490_v3 = vadd.f32 %v4489_v57, %v4488_v27 }
0x15c4   : > { %v4516_v50 = vpop.xlane.xlu1 %4515  ;;  %v4502_v21 = vpop.xlane.xlu0 %4501 }
0x15c5   : > { %v4479_v24 = vrot.slane %v4478_v59, 1  ;;  %v4491_v46 = vrot.slane %v4490_v3, 2  ;;  %v4517_v62 = vrot.slane %v4516_v50, 4  ;;  %v4503_v29 = vrot.slane %v4502_v21, 4 }
0x15c7   : > { %v4480_v38 = vadd.f32 %v4479_v24, %v4478_v59  ;;  %v4492_v40 = vadd.f32 %v4491_v46, %v4490_v3  ;;  %v4518_v22 = vadd.f32 %v4517_v62, %v4516_v50  ;;  %v4504_v31 = vadd.f32 %v4503_v29, %v4502_v21 }
0x15c8   : > { %v4526_v45 = vpop.permute.xlu0 %4525 }
0x15c9   : > { %v4493_v63 = vrot.slane %v4492_v40, 1  ;;  %v4519_v53 = vrot.slane %v4518_v22, 2  ;;  %v4505_v61 = vrot.slane %v4504_v31, 2  ;;  %v4528_v56 = vsel %vm4011_vm1, %v4526_v45, 0.0 }
0x15ca   : > { %v4539_v5 = vmul.f32 %v4946_v60, %v4480_v38  ;;  %4529 = vadd.xlane.f32.xlu0 %v4528_v56  ;;  %vm4639_vm1 = vcmp.eq.s32.totalorder %v6525_v51, 3 }
0x15cb   : > { %v4494_v26 = vadd.f32 %v4493_v63, %v4492_v40  ;;  %v4520_v1 = vadd.f32 %v4519_v53, %v4518_v22  ;;  %v4506_v47 = vadd.f32 %v4505_v61, %v4504_v31  ;;  %v4957_v6 = vsel %vm4639_vm1, 1.0, %v5688_v15 }
0x15cc   : > { %v4625_v4 = vmul.f32 %v6616_v25, %v4539_v5 }
0x15cd   : > { %v4540_v58 = vmul.f32 %v4946_v60, %v4494_v26  ;;  %v4521_v2 = vrot.slane %v4520_v1, 1  ;;  %v4507_v9 = vrot.slane %v4506_v47, 1 }
0x15cf   : > { %v4627_v16 = vmul.f32 %v6619_v23, %v4540_v58  ;;  %v4522_v14 = vadd.f32 %v4521_v2, %v4520_v1  ;;  %v4508_v18 = vadd.f32 %v4507_v9, %v4506_v47 }
0x15d1   : > { %v4628_v19 = vadd.f32 %v4627_v16, %v4625_v4  ;;  %v4542_v34 = vmul.f32 %v4946_v60, %v4522_v14  ;;  %v4541_v36 = vmul.f32 %v4946_v60, %v4508_v18 }
0x15d3   : > { %v4629_v10 = vmul.f32 %v6629_v28, %v4541_v36  ;;  %v4631_v11 = vmul.f32 %v6635_v43, %v4542_v34 }
0x15d5   : > { %v4630_v17 = vadd.f32 %v4629_v10, %v4628_v19 }
0x15d7   : > { %v4632_v32 = vadd.f32 %v4631_v11, %v4630_v17 }
0x15d9   : > { %v4634_v7 = vadd.f32 %v4633_v0, %v4632_v32 }
0x1657   : > { %v4530_v39 = vpop.xlane.xlu0 %4529 }
0x1658   : > { %v4531_v25 = vrot.slane %v4530_v39, 4 }
0x165a   : > { %v4532_v55 = vadd.f32 %v4531_v25, %v4530_v39 }
0x165c   : > { %v4533_v23 = vrot.slane %v4532_v55, 2 }
0x165e   : > { %v4534_v30 = vadd.f32 %v4533_v23, %v4532_v55 }
0x1660   : > { %v4535_v33 = vrot.slane %v4534_v30, 1 }
0x1662   : > { %v4536_v42 = vadd.f32 %v4535_v33, %v4534_v30 }
0x1664   : > { %v4545_v49 = vadd.f32 1.0, %v4536_v42 }
0x1666   : > { %v4546_v20 = vmul.f32 %v4946_v60, %v4545_v49 }
0x1668   : > { %v4635_v28 = vmul.f32 %v6656_v35, %v4546_v20 }
0x166a   : > { %v4636_v43 = vadd.f32 %v4635_v28, %v4634_v7 }
0x166c   : > { %v4638_v48 = vadd.f32 %v4637_v54, %v4636_v43 }
0x166e   : > { %v4642_v41 = vmul.f32 %v4957_v6, %v4638_v48 }
0x1670   : > { %v4643_v8 = vadd.f32 %v4642_v41, %v6817_v44 }
0x1672   : > { %4644 = vst [vmem:[%s394_s26] sm:$0xff] %v4643_v8 }
0x1673   : > { %5631 = shalt.err (!%p5628_p2)
}
0x1674   : > { %s5632_s27 = scalar_lea.hbm %s6879_s29, 128  ;;  %s5636_s17 = scalar_lea.hbm %s6931_s10, 256 }
0x1675   : > { %p5633_p3 = scmp.ne.s32.totalorder %s6879_s29, %s5632_s27  ;;  %p5637_p8 = scmp.lt.u32.totalorder %s6879_s29, %s6931_s10 }
0x1676   : > { %p5638_p11 = scmp.lt.u32.totalorder %s5636_s17, %s5632_s27  ;;  %p5640_p10 = scmp.lt.u32.totalorder %s5632_s27, %s6879_s29 }
0x1677   : > { %p5634_p4 = pnand %p5633_p3, %p5796_p5 }
0x1678   : > { %p5639_p9 = por %p5638_p11, %p5637_p8 }
0x1679   : > { %p5635_p7 = pneg %p5634_p4 }
0x167a   : > { %p5641_p12 = por %p5640_p10, %p5639_p9 }
0x167c   : > { %p5642_p13 = pnand %p5641_p12, %p5635_p7 }
0x167e   : > { %5645 = shalt.err (!%p5642_p13)
}
0x167f   : > { %5382 = dma.vmem_to_hbm [thread:$0]  (%p5796_p5), %s6881_s11, 128, %s6879_s29, %s4646_s30  }
0x1680 PF: > { %p5394_p0 = scmp.ge.s32.totalorder %s5684_s16, 2  ;;  %s4671_s12 = sand.u32 1, %s5672_s13  }
0x1681   : > { %s4672_s20 = scalar_lea.sflag [#allocation3], %s4671_s12 }
0x1682   : > { %p5389_p1 = pnand %p5394_p0, %p5800_p6 }
0x1684   : > { %5667 = dma.done.wait (!%p5389_p1), %s4672_s20, 128  }
0x1685   : > { %5669 = vsyncadd (!%p5389_p1), %s4672_s20, 4294967168  ;;  %p21_p2 = scmp.ge.s32.totalorder %s5783_s19, 4   ;;  %s6949_s13 = smov %s5676_s14 }
0x1686   : > { %s6950_s14 = smov %s5680_s15  ;;  %s6951_s15 = smov %s5794_s22 }
0x1687   : > { %s6952_s16 = smov %s5783_s19  ;;  %23 = sbr.rel (!%p21_p2) target bundleno = 4 (0x4), region = 106 }
0x168e   :  { %4677 = vsyncpa [#allocation3], 1 }
0x168f   :  { %4679 = vsyncpa [#allocation3 + $0x1], 1 }
0x1690   :  { %4680 = vsyncpa [#allocation4], 1 }
0x1691   :  { %4682 = vsyncpa [#allocation4 + $0x1], 1 }

</bundles_post_ra>
